<compile_context>
chip_gen: v5e
topology: v5e:2x2
jax: 0.10.0
libtpu: 0.0.40
codegen_flags: <defaults>
</compile_context>

<pallas_src>
import functools

import numpy as np
import jax
import jax.numpy as jnp
from jax.experimental import pallas as pl
from jax.experimental.pallas import tpu as pltpu

K = 20                               # spline bins
KP = ((K + 7) // 8) * 8              # per-dim parameter segment padded to sublane tiles (24)
P = 3 * K - 1                        # raw spline params per (batch, dim)
MIN_BIN_WIDTH = 1e-3
MIN_BIN_HEIGHT = 1e-3                # must equal MIN_BIN_WIDTH for the shared w/h path
MIN_DERIVATIVE = 1e-3
TAIL_BOUND = 10.0

# boundary derivative = min_derivative + softplus(log(exp(1 - min_derivative) - 1)) == 1.0
_BOUNDARY_LOGIT = float(np.log(np.exp(1.0 - MIN_DERIVATIVE) - 1.0))
_BOUNDARY_DERIV = float(MIN_DERIVATIVE + np.log1p(np.exp(_BOUNDARY_LOGIT)))
_NEG_PAD = -1e9                      # bias of padded softmax rows: never wins max, exp -> 0

# bf16 MXU path for the conditioner MLP (weights pre-cast once in prepare_layer).
# Off by default to keep the f32 numerics of the PyTorch reference.
MLP_BF16 = False

_LAYER_INPUT_KEYS = ("w0m", "b0", "w1", "b1", "w2g", "b2g", "cmat", "rowpos",
                     "repseg", "seg2", "segA", "gmat", "smat", "maskcol")


# ---------------------------------------------------------------------------
# Fused FlowLayer kernel: conditioner MLP -> RQ spline (dim-batched) -> combine
# ---------------------------------------------------------------------------
def _flow_layer_kernel(z_ref, w0_ref, b0_ref, w1_ref, b1_ref, w2_ref, b2_ref,
                       cmat_ref, rowpos_ref, repseg_ref, seg2_ref, segA_ref,
                       gmat_ref, smat_ref, maskcol_ref,
                       x_ref, ld_ref, *, A, Kp, mlp_bf16):
    left, right = -TAIL_BOUND, TAIL_BOUND
    Kf = float(K)
    RW = A * Kp                       # rows of one parameter group (widths/heights/derivs)
    R2 = 2 * A * Kp                   # widths + heights rows
    f32 = jnp.float32
    dot = functools.partial(jnp.dot, preferred_element_type=f32)

    z = z_ref[...]                                            # (D, N), batch on lanes

    # ---- conditioner MLP (coupling mask is baked into the w0 columns) ----------------
    def mm(w_ref_, x):
        if mlp_bf16:
            x = x.astype(jnp.bfloat16)
        return dot(w_ref_[...], x)

    h = jnp.maximum(mm(w0_ref, z) + b0_ref[...], 0.0)         # (H0, N)
    h = jnp.maximum(mm(w1_ref, h) + b1_ref[...], 0.0)         # (H1, N)
    sp = mm(w2_ref, h) + b2_ref[...]                          # (3*A*Kp, N) grouped/padded

    rowpos = rowpos_ref[...]                                  # (3*A*Kp, 1) row-in-segment
    rowpos2 = rowpos[:R2, :]
    rowposW = rowpos[:RW, :]
    repseg = repseg_ref[...]                                  # (R2, 2A) segment -> rows
    seg2 = seg2_ref[...]                                      # (2A, R2) segment sums
    segA = segA_ref[...]                                      # (A, RW)  segment sums

    uwh = sp[:R2, :]                                          # width + height logits
    ud = sp[R2:, :]                                           # derivative logits (RW, N)

    # ---- per-segment softmax: max via 2A small sublane reduces, sum on the MXU -------
    seg_max = jnp.concatenate(
        [jnp.max(uwh[s * Kp:(s + 1) * Kp, :], axis=0, keepdims=True)
         for s in range(2 * A)], axis=0)                      # (2A, N)
    e = jnp.exp(uwh - dot(repseg, seg_max))                   # pad rows (bias -1e9) -> 0
    sinv = 1.0 / dot(seg2, e)                                 # one divide per segment
    p = e * dot(repseg, sinv)
    wh = MIN_BIN_WIDTH + (1.0 - MIN_BIN_WIDTH * K) * p        # min widths == min heights

    # ---- cumulative knots: ONE block-diagonal MXU matmul for all dims (w & h) --------
    cum = dot(cmat_ref[...], wh)                              # (R2, N), knot j at row j
    cum = (right - left) * cum + left
    cum = jnp.where(rowpos2 == Kf, right, cum)                # knot K forced exactly

    # ---- z of the transformed dims (gather via MXU) ----------------------------------
    zact = dot(gmat_ref[...], z)                              # (A, N)
    zcl = jnp.clip(zact, left, right)

    # ---- searchsorted(cumwidths, z): compare + segment-count matmul ------------------
    cw = cum[:RW, :]
    cw_s = cw + jnp.where(rowposW == Kf, 1e-6, 0.0)           # eps on the last knot
    cw_s = jnp.where(rowposW > Kf, 1e9, cw_s)                 # padded rows never counted
    zrep = dot(repseg, jnp.concatenate([zcl, zcl], axis=0))[:RW, :]
    cnt = dot(segA, (zrep >= cw_s).astype(f32))               # (A, N)
    b = jnp.clip(cnt - 1.0, 0.0, Kf - 1.0)                    # bin index (small exact f32)

    # ---- gathers at bin / bin+1: one-hot masks + segment-sum matmuls (MXU) -----------
    brep = dot(repseg, jnp.concatenate([b, b], axis=0))       # (R2, N)
    oh0 = (rowpos2 == brep).astype(f32)
    oh1 = (rowpos2 == brep + 1.0).astype(f32)
    g0 = dot(seg2, oh0 * cum)                                 # (2A, N): [cw[b] ; ch[b]]
    g1 = dot(seg2, oh1 * cum)                                 # (2A, N): [cw[b+1]; ch[b+1]]
    cw0, ch0 = g0[:A, :], g0[A:, :]
    cw1, ch1 = g1[:A, :], g1[A:, :]

    # derivatives: min_derivative + softplus (stable form); boundary value at both ends
    dvals = MIN_DERIVATIVE + (jnp.maximum(ud, 0.0)
                              + jnp.log(1.0 + jnp.exp(-jnp.abs(ud))))      # (RW, N)
    ohm1 = (rowposW == brep[:RW, :] - 1.0).astype(f32)
    d_b = jnp.where(b == 0.0, _BOUNDARY_DERIV, dot(segA, ohm1 * dvals))
    d_b1 = jnp.where(b == Kf - 1.0, _BOUNDARY_DERIV, dot(segA, oh0[:RW, :] * dvals))

    # ---- rational-quadratic spline (forward) on (A, N) slabs -------------------------
    rw = 1.0 / (cw1 - cw0)
    heights_b = ch1 - ch0
    delta = heights_b * rw
    theta = (zcl - cw0) * rw
    tomt = theta * (1.0 - theta)
    denom = delta + (d_b + d_b1 - 2.0 * delta) * tomt
    out_sp = ch0 + heights_b * (delta * theta * theta + d_b * tomt) / denom
    dnum = (delta * delta) * (d_b1 * theta * theta + 2.0 * delta * tomt
                              + d_b * (1.0 - theta) * (1.0 - theta))
    ld = jnp.log(dnum) - 2.0 * jnp.log(denom)                 # reference two-log form

    inside = (zact >= left) & (zact <= right)
    x_act = jnp.where(inside, out_sp, zact)                   # linear tails: identity
    ld_act = jnp.where(inside, ld, 0.0)

    # ---- outputs: lane-dense slab stores, scatter via one tiny MXU matmul ------------
    ld_ref[...] = jnp.sum(ld_act, axis=0, keepdims=True)      # (1, N)
    x_ref[...] = maskcol_ref[...] * z + dot(smat_ref[...], x_act)


# ---------------------------------------------------------------------------
# Wrapper / parameter preparation
# ---------------------------------------------------------------------------
def _pick_batch_tile(Bp):
    """Lane tile for the (padded) batch; prefer >=2 grid steps for megacore sharding."""
    for tb in (512, 256, 128):
        if Bp % tb == 0 and Bp // tb >= 2:
            return tb
    return min(Bp, 512)


def _vmem_limit(layer, D, tb):
    """Size the scoped VMEM limit from buffer math instead of a fixed constant."""
    const_b = sum(int(np.prod(layer[k].shape)) * layer[k].dtype.itemsize
                  for k in _LAYER_INPUT_KEYS)
    tile_b = (2 * D * tb + tb) * 4
    slab_b = 3 * layer["A"] * layer["Kp"] * tb * 4
    est = 2 * const_b + 2 * tile_b + 16 * slab_b + (1 << 20)
    cap = 64 * 1024 * 1024
    try:
        cap = max(32 * 1024 * 1024,
                  int(0.75 * pltpu.get_tpu_info().vmem_capacity_bytes))
    except Exception:
        pass
    return int(min(max(est, 32 * 1024 * 1024), cap))


def _flow_layer(zT, layer, tb):
    D, Bp = zT.shape
    A = layer["A"]
    if A == 0:                                   # fully masked layer: identity, logdet 0
        return zT, jnp.zeros((1, Bp), jnp.float32)

    ins = [layer[k] for k in _LAYER_INPUT_KEYS]
    kern = functools.partial(_flow_layer_kernel, A=A, Kp=layer["Kp"], mlp_bf16=MLP_BF16)
    resident = lambda a: pl.BlockSpec(a.shape, lambda i: (0, 0))

    xT, ld = pl.pallas_call(
        kern,
        out_shape=(jax.ShapeDtypeStruct((D, Bp), jnp.float32),
                   jax.ShapeDtypeStruct((1, Bp), jnp.float32)),
        grid=(Bp // tb,),
        in_specs=[pl.BlockSpec((D, tb), lambda i: (0, i))] + [resident(a) for a in ins],
        out_specs=(pl.BlockSpec((D, tb), lambda i: (0, i)),
                   pl.BlockSpec((1, tb), lambda i: (0, i))),
        compiler_params=pltpu.CompilerParams(
            dimension_semantics=("parallel",),
            vmem_limit_bytes=_vmem_limit(layer, D, tb)),
    )(zT, *ins)
    return xT, ld


def prepare_layer(params, mask_np):
    """Bake the mask into W0, regroup/pad W2 rows to aligned per-dim segments, and build
    the constant gather/scatter/cumsum matrices used by the dim-batched kernel."""
    w0, b0, w1, b1, w2, b2 = [np.asarray(p, np.float32) for p in params]
    D, H0 = w0.shape
    H1 = w1.shape[1]
    mask = np.asarray(mask_np).reshape(-1).astype(np.int64)
    active = [d for d in range(D) if mask[d] == 0]
    A = len(active)
    layer = dict(A=A, Kp=KP)
    if A == 0:
        return layer

    # conditioner weights (transposed), coupling mask baked into the W0 columns
    w0m = w0.T.copy()                                 # (H0, D)
    w0m[:, np.array(active, dtype=int)] = 0.0
    b0c = b0.reshape(-1, 1)
    w1t = w1.T.copy()                                 # (H1, H0)
    b1c = b1.reshape(-1, 1)

    # W2 rows regrouped: [widths of all active dims | heights | derivatives], each dim's
    # segment padded to Kp=24 rows so every slice is sublane-aligned.
    w2t = w2.T                                        # (D*P, H1)
    b2v = b2.reshape(-1)
    R3 = 3 * A * KP
    w2g = np.zeros((R3, H1), np.float32)
    b2g = np.zeros((R3, 1), np.float32)
    b2g[:2 * A * KP, 0] = _NEG_PAD                    # padded softmax rows -> ~-inf logits
    for a, d in enumerate(active):
        base = d * P
        rw_ = a * KP                                  # widths segment
        w2g[rw_:rw_ + K, :] = w2t[base:base + K, :]
        b2g[rw_:rw_ + K, 0] = b2v[base:base + K]
        rh_ = (A + a) * KP                            # heights segment
        w2g[rh_:rh_ + K, :] = w2t[base + K:base + 2 * K, :]
        b2g[rh_:rh_ + K, 0] = b2v[base + K:base + 2 * K]
        rd_ = (2 * A + a) * KP                        # derivatives segment (K-1 real rows)
        w2g[rd_:rd_ + K - 1, :] = w2t[base + 2 * K:base + 3 * K - 1, :]
        b2g[rd_:rd_ + K - 1, 0] = b2v[base + 2 * K:base + 3 * K - 1]

    R2 = 2 * A * KP
    RW = A * KP
    # block-diagonal cumsum matrix (pad columns excluded, rows j>K zero)
    cmat = np.zeros((R2, R2), np.float32)
    for s in range(2 * A):
        for j in range(K + 1):
            cmat[s * KP + j, s * KP:s * KP + j] = 1.0
    rowpos = np.tile(np.arange(KP, dtype=np.float32), 3 * A).reshape(-1, 1)   # (R3, 1)
    repseg = np.zeros((R2, 2 * A), np.float32)        # broadcast per-segment row -> rows
    seg2 = np.zeros((2 * A, R2), np.float32)          # per-segment sums (w & h groups)
    for s in range(2 * A):
        repseg[s * KP:(s + 1) * KP, s] = 1.0
        seg2[s, s * KP:(s + 1) * KP] = 1.0
    segA = np.zeros((A, RW), np.float32)              # per-segment sums (one group)
    for a in range(A):
        segA[a, a * KP:(a + 1) * KP] = 1.0
    gmat = np.zeros((A, D), np.float32)               # gather active rows of z
    smat = np.zeros((D, A), np.float32)               # scatter spline outputs back
    for a, d in enumerate(active):
        gmat[a, d] = 1.0
        smat[d, a] = 1.0
    maskcol = mask.astype(np.float32).reshape(-1, 1)

    wdt = jnp.bfloat16 if MLP_BF16 else jnp.float32   # pre-cast weights once if bf16 path
    layer.update(
        w0m=jnp.asarray(w0m, wdt), b0=jnp.asarray(b0c),
        w1=jnp.asarray(w1t, wdt), b1=jnp.asarray(b1c),
        w2g=jnp.asarray(w2g, wdt), b2g=jnp.asarray(b2g),
        cmat=jnp.asarray(cmat), rowpos=jnp.asarray(rowpos),
        repseg=jnp.asarray(repseg), seg2=jnp.asarray(seg2), segA=jnp.asarray(segA),
        gmat=jnp.asarray(gmat), smat=jnp.asarray(smat), maskcol=jnp.asarray(maskcol))
    return layer


def neural_spline_encoder_forward(z, layers):
    """Forward pass of NeuralSplineEncoder (p_x = None): returns (x, sum_logdet)."""
    B, D = z.shape
    Bp = ((B + 127) // 128) * 128                     # pad batch -> lane-dense tiles
    zT = jnp.asarray(z, jnp.float32).T                # (D, B), batch on lanes
    if Bp != B:
        zT = jnp.pad(zT, ((0, 0), (0, Bp - B)))
    tb = _pick_batch_tile(Bp)
    sum_logp = jnp.zeros((1, Bp), jnp.float32)
    for layer in layers:
        zT, ld = _flow_layer(zT, layer, tb)
        sum_logp = sum_logp + ld
    return zT[:, :B].T, sum_logp[0, :B]


def init_params(key, D, hidden):
    """Spline MLP: Linear(D,h0)->ReLU->Linear(h0,h1)->ReLU->Linear(h1, D*(3K-1))."""
    dims = [D] + list(hidden) + [D * P]
    params = []
    for i in range(len(dims) - 1):
        key, k1, k2 = jax.random.split(key, 3)
        bound = 1.0 / np.sqrt(dims[i])
        w = jax.random.uniform(k1, (dims[i], dims[i + 1]), jnp.float32,
                               minval=-bound, maxval=bound)
        b = jax.random.uniform(k2, (dims[i + 1],), jnp.float32,
                               minval=-bound, maxval=bound)
        params += [w, b]
    return tuple(params)


if __name__ == "__main__":
    B, D, k = 200, 5, 3
    hidden = [32, 32]

    key = jax.random.PRNGKey(0)
    kz, kp = jax.random.split(key)
    # scale so a few samples land in the linear tails (|z| > 10)
    z = 4.0 * jax.random.normal(kz, (B, D), dtype=jnp.float32)

    # default NeuralSplineEncoder masks: alternating parity per layer
    masks = [np.array([(j + i) % 2 for j in range(D)], dtype=np.float32)
             for i in range(k)]

    layers = []
    for i in range(k):
        kp, kl = jax.random.split(kp)
        layers.append(prepare_layer(init_params(kl, D, hidden), masks[i]))

    x, sum_logp = neural_spline_encoder_forward(z, layers)
    jax.block_until_ready((x, sum_logp))

    assert x.shape == (B, D) and sum_logp.shape == (B,)
    assert bool(jnp.all(jnp.isfinite(x))) and bool(jnp.all(jnp.isfinite(sum_logp)))
    print("KERNEL_OK")
</pallas_src>

<mosaic_0001>
module attributes {stable_mosaic.version = 11 : i64} {
  func.func @_flow_layer_kernel(%arg0: i32, %arg1: memref<5x128xf32, #tpu.memory_space<vmem>>, %arg2: memref<32x5xf32, #tpu.memory_space<vmem>>, %arg3: memref<32x1xf32, #tpu.memory_space<vmem>>, %arg4: memref<32x32xf32, #tpu.memory_space<vmem>>, %arg5: memref<32x1xf32, #tpu.memory_space<vmem>>, %arg6: memref<216x32xf32, #tpu.memory_space<vmem>>, %arg7: memref<216x1xf32, #tpu.memory_space<vmem>>, %arg8: memref<144x144xf32, #tpu.memory_space<vmem>>, %arg9: memref<216x1xf32, #tpu.memory_space<vmem>>, %arg10: memref<144x6xf32, #tpu.memory_space<vmem>>, %arg11: memref<6x144xf32, #tpu.memory_space<vmem>>, %arg12: memref<3x72xf32, #tpu.memory_space<vmem>>, %arg13: memref<3x5xf32, #tpu.memory_space<vmem>>, %arg14: memref<5x3xf32, #tpu.memory_space<vmem>>, %arg15: memref<5x1xf32, #tpu.memory_space<vmem>>, %arg16: memref<5x128xf32, #tpu.memory_space<vmem>>, %arg17: memref<1x128xf32, #tpu.memory_space<vmem>>) attributes {dimension_semantics = [#tpu.dimension_semantics<parallel>], iteration_bounds = array<i64: 2>, scalar_prefetch = 0 : i64, scratch_operands = 0 : i64, tpu.core_type = #tpu.core_type<tc>, window_params = [{transform_indices = @transform_0, window_bounds = array<i64: 5, 128>}, {pipeline_mode = #tpu.pipeline_mode<synchronous>, transform_indices = @transform_1, window_bounds = array<i64: 32, 5>}, {pipeline_mode = #tpu.pipeline_mode<synchronous>, transform_indices = @transform_2, window_bounds = array<i64: 32, 1>}, {pipeline_mode = #tpu.pipeline_mode<synchronous>, transform_indices = @transform_3, window_bounds = array<i64: 32, 32>}, {pipeline_mode = #tpu.pipeline_mode<synchronous>, transform_indices = @transform_4, window_bounds = array<i64: 32, 1>}, {pipeline_mode = #tpu.pipeline_mode<synchronous>, transform_indices = @transform_5, window_bounds = array<i64: 216, 32>}, {pipeline_mode = #tpu.pipeline_mode<synchronous>, transform_indices = @transform_6, window_bounds = array<i64: 216, 1>}, {pipeline_mode = #tpu.pipeline_mode<synchronous>, transform_indices = @transform_7, window_bounds = array<i64: 144, 144>}, {pipeline_mode = #tpu.pipeline_mode<synchronous>, transform_indices = @transform_8, window_bounds = array<i64: 216, 1>}, {pipeline_mode = #tpu.pipeline_mode<synchronous>, transform_indices = @transform_9, window_bounds = array<i64: 144, 6>}, {pipeline_mode = #tpu.pipeline_mode<synchronous>, transform_indices = @transform_10, window_bounds = array<i64: 6, 144>}, {pipeline_mode = #tpu.pipeline_mode<synchronous>, transform_indices = @transform_11, window_bounds = array<i64: 3, 72>}, {pipeline_mode = #tpu.pipeline_mode<synchronous>, transform_indices = @transform_12, window_bounds = array<i64: 3, 5>}, {pipeline_mode = #tpu.pipeline_mode<synchronous>, transform_indices = @transform_13, window_bounds = array<i64: 5, 3>}, {pipeline_mode = #tpu.pipeline_mode<synchronous>, transform_indices = @transform_14, window_bounds = array<i64: 5, 1>}, {transform_indices = @transform_15, window_bounds = array<i64: 5, 128>}, {transform_indices = @transform_16, window_bounds = array<i64: 1, 128>}]} {
    %c0 = arith.constant 0 : index
    %c0_0 = arith.constant 0 : index
    %0 = vector.load %arg1[%c0, %c0_0] : memref<5x128xf32, #tpu.memory_space<vmem>>, vector<5x128xf32>
    %c0_1 = arith.constant 0 : index
    %c0_2 = arith.constant 0 : index
    %1 = vector.load %arg2[%c0_1, %c0_2] : memref<32x5xf32, #tpu.memory_space<vmem>>, vector<32x5xf32>
    %cst = arith.constant dense<0.000000e+00> : vector<32x128xf32>
    %2 = tpu.matmul %1, %0, %cst {dimension_numbers = #tpu.dot_dimension_numbers<[1], [0], [0], [1], [0, 0, 1, 1], [], []>} : vector<32x5xf32>, vector<5x128xf32>, vector<32x128xf32> -> vector<32x128xf32>
    %c0_3 = arith.constant 0 : index
    %c0_4 = arith.constant 0 : index
    %3 = vector.load %arg3[%c0_3, %c0_4] : memref<32x1xf32, #tpu.memory_space<vmem>>, vector<32x1xf32>
    %4 = vector.broadcast %3 : vector<32x1xf32> to vector<32x128xf32>
    %5 = arith.addf %2, %4 : vector<32x128xf32>
    %cst_5 = arith.constant 0.000000e+00 : f32
    %6 = vector.broadcast %cst_5 : f32 to vector<32x128xf32>
    %7 = arith.maximumf %5, %6 : vector<32x128xf32>
    %c0_6 = arith.constant 0 : index
    %c0_7 = arith.constant 0 : index
    %8 = vector.load %arg4[%c0_6, %c0_7] : memref<32x32xf32, #tpu.memory_space<vmem>>, vector<32x32xf32>
    %cst_8 = arith.constant dense<0.000000e+00> : vector<32x128xf32>
    %9 = tpu.matmul %8, %7, %cst_8 {dimension_numbers = #tpu.dot_dimension_numbers<[1], [0], [0], [1], [0, 0, 1, 1], [], []>} : vector<32x32xf32>, vector<32x128xf32>, vector<32x128xf32> -> vector<32x128xf32>
    %c0_9 = arith.constant 0 : index
    %c0_10 = arith.constant 0 : index
    %10 = vector.load %arg5[%c0_9, %c0_10] : memref<32x1xf32, #tpu.memory_space<vmem>>, vector<32x1xf32>
    %11 = vector.broadcast %10 : vector<32x1xf32> to vector<32x128xf32>
    %12 = arith.addf %9, %11 : vector<32x128xf32>
    %cst_11 = arith.constant 0.000000e+00 : f32
    %13 = vector.broadcast %cst_11 : f32 to vector<32x128xf32>
    %14 = arith.maximumf %12, %13 : vector<32x128xf32>
    %c0_12 = arith.constant 0 : index
    %c0_13 = arith.constant 0 : index
    %15 = vector.load %arg6[%c0_12, %c0_13] : memref<216x32xf32, #tpu.memory_space<vmem>>, vector<216x32xf32>
    %cst_14 = arith.constant dense<0.000000e+00> : vector<216x128xf32>
    %16 = tpu.matmul %15, %14, %cst_14 {dimension_numbers = #tpu.dot_dimension_numbers<[1], [0], [0], [1], [0, 0, 1, 1], [], []>} : vector<216x32xf32>, vector<32x128xf32>, vector<216x128xf32> -> vector<216x128xf32>
    %c0_15 = arith.constant 0 : index
    %c0_16 = arith.constant 0 : index
    %17 = vector.load %arg7[%c0_15, %c0_16] : memref<216x1xf32, #tpu.memory_space<vmem>>, vector<216x1xf32>
    %18 = vector.broadcast %17 : vector<216x1xf32> to vector<216x128xf32>
    %19 = arith.addf %16, %18 : vector<216x128xf32>
    %c0_17 = arith.constant 0 : index
    %c0_18 = arith.constant 0 : index
    %20 = vector.load %arg9[%c0_17, %c0_18] : memref<216x1xf32, #tpu.memory_space<vmem>>, vector<216x1xf32>
    %21 = vector.extract_strided_slice %20 {offsets = [0, 0], sizes = [144, 1], strides = [1, 1]} : vector<216x1xf32> to vector<144x1xf32>
    %22 = vector.extract_strided_slice %20 {offsets = [0, 0], sizes = [72, 1], strides = [1, 1]} : vector<216x1xf32> to vector<72x1xf32>
    %c0_19 = arith.constant 0 : index
    %c0_20 = arith.constant 0 : index
    %23 = vector.load %arg10[%c0_19, %c0_20] : memref<144x6xf32, #tpu.memory_space<vmem>>, vector<144x6xf32>
    %c0_21 = arith.constant 0 : index
    %c0_22 = arith.constant 0 : index
    %24 = vector.load %arg11[%c0_21, %c0_22] : memref<6x144xf32, #tpu.memory_space<vmem>>, vector<6x144xf32>
    %c0_23 = arith.constant 0 : index
    %c0_24 = arith.constant 0 : index
    %25 = vector.load %arg12[%c0_23, %c0_24] : memref<3x72xf32, #tpu.memory_space<vmem>>, vector<3x72xf32>
    %26 = vector.extract_strided_slice %19 {offsets = [0, 0], sizes = [144, 128], strides = [1, 1]} : vector<216x128xf32> to vector<144x128xf32>
    %27 = vector.extract_strided_slice %19 {offsets = [144, 0], sizes = [72, 128], strides = [1, 1]} : vector<216x128xf32> to vector<72x128xf32>
    %28 = vector.extract_strided_slice %26 {offsets = [0, 0], sizes = [24, 128], strides = [1, 1]} : vector<144x128xf32> to vector<24x128xf32>
    %cst_25 = arith.constant dense<0xFF800000> : vector<128xf32>
    %29 = vector.multi_reduction <maximumf>, %28, %cst_25 [0] : vector<24x128xf32> to vector<128xf32>
    %30 = vector.shape_cast %29 : vector<128xf32> to vector<1x128xf32>
    %31 = vector.extract_strided_slice %26 {offsets = [24, 0], sizes = [24, 128], strides = [1, 1]} : vector<144x128xf32> to vector<24x128xf32>
    %cst_26 = arith.constant dense<0xFF800000> : vector<128xf32>
    %32 = vector.multi_reduction <maximumf>, %31, %cst_26 [0] : vector<24x128xf32> to vector<128xf32>
    %33 = vector.shape_cast %32 : vector<128xf32> to vector<1x128xf32>
    %34 = vector.extract_strided_slice %26 {offsets = [48, 0], sizes = [24, 128], strides = [1, 1]} : vector<144x128xf32> to vector<24x128xf32>
    %cst_27 = arith.constant dense<0xFF800000> : vector<128xf32>
    %35 = vector.multi_reduction <maximumf>, %34, %cst_27 [0] : vector<24x128xf32> to vector<128xf32>
    %36 = vector.shape_cast %35 : vector<128xf32> to vector<1x128xf32>
    %37 = vector.extract_strided_slice %26 {offsets = [72, 0], sizes = [24, 128], strides = [1, 1]} : vector<144x128xf32> to vector<24x128xf32>
    %cst_28 = arith.constant dense<0xFF800000> : vector<128xf32>
    %38 = vector.multi_reduction <maximumf>, %37, %cst_28 [0] : vector<24x128xf32> to vector<128xf32>
    %39 = vector.shape_cast %38 : vector<128xf32> to vector<1x128xf32>
    %40 = vector.extract_strided_slice %26 {offsets = [96, 0], sizes = [24, 128], strides = [1, 1]} : vector<144x128xf32> to vector<24x128xf32>
    %cst_29 = arith.constant dense<0xFF800000> : vector<128xf32>
    %41 = vector.multi_reduction <maximumf>, %40, %cst_29 [0] : vector<24x128xf32> to vector<128xf32>
    %42 = vector.shape_cast %41 : vector<128xf32> to vector<1x128xf32>
    %43 = vector.extract_strided_slice %26 {offsets = [120, 0], sizes = [24, 128], strides = [1, 1]} : vector<144x128xf32> to vector<24x128xf32>
    %cst_30 = arith.constant dense<0xFF800000> : vector<128xf32>
    %44 = vector.multi_reduction <maximumf>, %43, %cst_30 [0] : vector<24x128xf32> to vector<128xf32>
    %45 = vector.shape_cast %44 : vector<128xf32> to vector<1x128xf32>
    %46 = tpu.concatenate %30, %33, %36, %39, %42, %45 in 0 : vector<1x128xf32>, vector<1x128xf32>, vector<1x128xf32>, vector<1x128xf32>, vector<1x128xf32>, vector<1x128xf32> -> vector<6x128xf32>
    %cst_31 = arith.constant dense<0.000000e+00> : vector<144x128xf32>
    %47 = tpu.matmul %23, %46, %cst_31 {dimension_numbers = #tpu.dot_dimension_numbers<[1], [0], [0], [1], [0, 0, 1, 1], [], []>} : vector<144x6xf32>, vector<6x128xf32>, vector<144x128xf32> -> vector<144x128xf32>
    %48 = arith.subf %26, %47 : vector<144x128xf32>
    %49 = math.exp %48 : vector<144x128xf32>
    %cst_32 = arith.constant dense<0.000000e+00> : vector<6x128xf32>
    %50 = tpu.matmul %24, %49, %cst_32 {dimension_numbers = #tpu.dot_dimension_numbers<[1], [0], [0], [1], [0, 0, 1, 1], [], []>} : vector<6x144xf32>, vector<144x128xf32>, vector<6x128xf32> -> vector<6x128xf32>
    %cst_33 = arith.constant 1.000000e+00 : f32
    %51 = vector.broadcast %cst_33 : f32 to vector<6x128xf32>
    %52 = arith.divf %51, %50 : vector<6x128xf32>
    %cst_34 = arith.constant dense<0.000000e+00> : vector<144x128xf32>
    %53 = tpu.matmul %23, %52, %cst_34 {dimension_numbers = #tpu.dot_dimension_numbers<[1], [0], [0], [1], [0, 0, 1, 1], [], []>} : vector<144x6xf32>, vector<6x128xf32>, vector<144x128xf32> -> vector<144x128xf32>
    %54 = arith.mulf %49, %53 : vector<144x128xf32>
    %cst_35 = arith.constant 9.800000e-01 : f32
    %55 = vector.broadcast %cst_35 : f32 to vector<144x128xf32>
    %56 = arith.mulf %55, %54 : vector<144x128xf32>
    %cst_36 = arith.constant 1.000000e-03 : f32
    %57 = vector.broadcast %cst_36 : f32 to vector<144x128xf32>
    %58 = arith.addf %57, %56 : vector<144x128xf32>
    %c0_37 = arith.constant 0 : index
    %c0_38 = arith.constant 0 : index
    %59 = vector.load %arg8[%c0_37, %c0_38] : memref<144x144xf32, #tpu.memory_space<vmem>>, vector<144x144xf32>
    %cst_39 = arith.constant dense<0.000000e+00> : vector<144x128xf32>
    %60 = tpu.matmul %59, %58, %cst_39 {dimension_numbers = #tpu.dot_dimension_numbers<[1], [0], [0], [1], [0, 0, 1, 1], [], []>} : vector<144x144xf32>, vector<144x128xf32>, vector<144x128xf32> -> vector<144x128xf32>
    %cst_40 = arith.constant 2.000000e+01 : f32
    %61 = vector.broadcast %cst_40 : f32 to vector<144x128xf32>
    %62 = arith.mulf %61, %60 : vector<144x128xf32>
    %cst_41 = arith.constant -1.000000e+01 : f32
    %63 = vector.broadcast %cst_41 : f32 to vector<144x128xf32>
    %64 = arith.addf %62, %63 : vector<144x128xf32>
    %cst_42 = arith.constant 2.000000e+01 : f32
    %65 = vector.broadcast %cst_42 : f32 to vector<144x1xf32>
    %66 = arith.cmpf oeq, %21, %65 : vector<144x1xf32>
    %cst_43 = arith.constant 1.000000e+01 : f32
    %67 = vector.shape_cast %66 : vector<144x1xi1> to vector<144x1xi1>
    %68 = vector.broadcast %67 : vector<144x1xi1> to vector<144x128xi1>
    %69 = vector.broadcast %cst_43 : f32 to vector<144x128xf32>
    %70 = arith.select %68, %69, %64 : vector<144x128xi1>, vector<144x128xf32>
    %c0_44 = arith.constant 0 : index
    %c0_45 = arith.constant 0 : index
    %71 = vector.load %arg13[%c0_44, %c0_45] : memref<3x5xf32, #tpu.memory_space<vmem>>, vector<3x5xf32>
    %cst_46 = arith.constant dense<0.000000e+00> : vector<3x128xf32>
    %72 = tpu.matmul %71, %0, %cst_46 {dimension_numbers = #tpu.dot_dimension_numbers<[1], [0], [0], [1], [0, 0, 1, 1], [], []>} : vector<3x5xf32>, vector<5x128xf32>, vector<3x128xf32> -> vector<3x128xf32>
    %cst_47 = arith.constant -1.000000e+01 : f32
    %cst_48 = arith.constant 1.000000e+01 : f32
    %73 = vector.broadcast %cst_47 : f32 to vector<3x128xf32>
    %74 = arith.maximumf %73, %72 : vector<3x128xf32>
    %75 = vector.broadcast %cst_48 : f32 to vector<3x128xf32>
    %76 = arith.minimumf %75, %74 : vector<3x128xf32>
    %77 = vector.extract_strided_slice %70 {offsets = [0, 0], sizes = [72, 128], strides = [1, 1]} : vector<144x128xf32> to vector<72x128xf32>
    %cst_49 = arith.constant 2.000000e+01 : f32
    %78 = vector.broadcast %cst_49 : f32 to vector<72x1xf32>
    %79 = arith.cmpf oeq, %22, %78 : vector<72x1xf32>
    %cst_50 = arith.constant 9.99999997E-7 : f32
    %cst_51 = arith.constant 0.000000e+00 : f32
    %80 = vector.broadcast %cst_50 : f32 to vector<72x1xf32>
    %81 = vector.broadcast %cst_51 : f32 to vector<72x1xf32>
    %82 = arith.select %79, %80, %81 : vector<72x1xi1>, vector<72x1xf32>
    %83 = vector.broadcast %82 : vector<72x1xf32> to vector<72x128xf32>
    %84 = arith.addf %77, %83 : vector<72x128xf32>
    %cst_52 = arith.constant 2.000000e+01 : f32
    %85 = vector.broadcast %cst_52 : f32 to vector<72x1xf32>
    %86 = arith.cmpf ogt, %22, %85 : vector<72x1xf32>
    %cst_53 = arith.constant 1.000000e+09 : f32
    %87 = vector.shape_cast %86 : vector<72x1xi1> to vector<72x1xi1>
    %88 = vector.broadcast %87 : vector<72x1xi1> to vector<72x128xi1>
    %89 = vector.broadcast %cst_53 : f32 to vector<72x128xf32>
    %90 = arith.select %88, %89, %84 : vector<72x128xi1>, vector<72x128xf32>
    %91 = tpu.concatenate %76, %76 in 0 : vector<3x128xf32>, vector<3x128xf32> -> vector<6x128xf32>
    %cst_54 = arith.constant dense<0.000000e+00> : vector<144x128xf32>
    %92 = tpu.matmul %23, %91, %cst_54 {dimension_numbers = #tpu.dot_dimension_numbers<[1], [0], [0], [1], [0, 0, 1, 1], [], []>} : vector<144x6xf32>, vector<6x128xf32>, vector<144x128xf32> -> vector<144x128xf32>
    %93 = vector.extract_strided_slice %92 {offsets = [0, 0], sizes = [72, 128], strides = [1, 1]} : vector<144x128xf32> to vector<72x128xf32>
    %94 = arith.cmpf oge, %93, %90 : vector<72x128xf32>
    %95 = arith.extui %94 : vector<72x128xi1> to vector<72x128xi32>
    %96 = arith.sitofp %95 : vector<72x128xi32> to vector<72x128xf32>
    %cst_55 = arith.constant dense<0.000000e+00> : vector<3x128xf32>
    %97 = tpu.matmul %25, %96, %cst_55 {dimension_numbers = #tpu.dot_dimension_numbers<[1], [0], [0], [1], [0, 0, 1, 1], [], []>} : vector<3x72xf32>, vector<72x128xf32>, vector<3x128xf32> -> vector<3x128xf32>
    %cst_56 = arith.constant 1.000000e+00 : f32
    %98 = vector.broadcast %cst_56 : f32 to vector<3x128xf32>
    %99 = arith.subf %97, %98 : vector<3x128xf32>
    %cst_57 = arith.constant 0.000000e+00 : f32
    %cst_58 = arith.constant 1.900000e+01 : f32
    %100 = vector.broadcast %cst_57 : f32 to vector<3x128xf32>
    %101 = arith.maximumf %100, %99 : vector<3x128xf32>
    %102 = vector.broadcast %cst_58 : f32 to vector<3x128xf32>
    %103 = arith.minimumf %102, %101 : vector<3x128xf32>
    %104 = tpu.concatenate %103, %103 in 0 : vector<3x128xf32>, vector<3x128xf32> -> vector<6x128xf32>
    %cst_59 = arith.constant dense<0.000000e+00> : vector<144x128xf32>
    %105 = tpu.matmul %23, %104, %cst_59 {dimension_numbers = #tpu.dot_dimension_numbers<[1], [0], [0], [1], [0, 0, 1, 1], [], []>} : vector<144x6xf32>, vector<6x128xf32>, vector<144x128xf32> -> vector<144x128xf32>
    %106 = vector.broadcast %21 : vector<144x1xf32> to vector<144x128xf32>
    %107 = arith.cmpf oeq, %106, %105 : vector<144x128xf32>
    %108 = arith.extui %107 : vector<144x128xi1> to vector<144x128xi32>
    %109 = arith.sitofp %108 : vector<144x128xi32> to vector<144x128xf32>
    %cst_60 = arith.constant 1.000000e+00 : f32
    %110 = vector.broadcast %cst_60 : f32 to vector<144x128xf32>
    %111 = arith.addf %105, %110 : vector<144x128xf32>
    %112 = vector.broadcast %21 : vector<144x1xf32> to vector<144x128xf32>
    %113 = arith.cmpf oeq, %112, %111 : vector<144x128xf32>
    %114 = arith.extui %113 : vector<144x128xi1> to vector<144x128xi32>
    %115 = arith.sitofp %114 : vector<144x128xi32> to vector<144x128xf32>
    %116 = arith.mulf %109, %70 : vector<144x128xf32>
    %cst_61 = arith.constant dense<0.000000e+00> : vector<6x128xf32>
    %117 = tpu.matmul %24, %116, %cst_61 {dimension_numbers = #tpu.dot_dimension_numbers<[1], [0], [0], [1], [0, 0, 1, 1], [], []>} : vector<6x144xf32>, vector<144x128xf32>, vector<6x128xf32> -> vector<6x128xf32>
    %118 = arith.mulf %115, %70 : vector<144x128xf32>
    %cst_62 = arith.constant dense<0.000000e+00> : vector<6x128xf32>
    %119 = tpu.matmul %24, %118, %cst_62 {dimension_numbers = #tpu.dot_dimension_numbers<[1], [0], [0], [1], [0, 0, 1, 1], [], []>} : vector<6x144xf32>, vector<144x128xf32>, vector<6x128xf32> -> vector<6x128xf32>
    %120 = vector.extract_strided_slice %117 {offsets = [0, 0], sizes = [3, 128], strides = [1, 1]} : vector<6x128xf32> to vector<3x128xf32>
    %121 = vector.extract_strided_slice %117 {offsets = [3, 0], sizes = [3, 128], strides = [1, 1]} : vector<6x128xf32> to vector<3x128xf32>
    %122 = vector.extract_strided_slice %119 {offsets = [0, 0], sizes = [3, 128], strides = [1, 1]} : vector<6x128xf32> to vector<3x128xf32>
    %123 = vector.extract_strided_slice %119 {offsets = [3, 0], sizes = [3, 128], strides = [1, 1]} : vector<6x128xf32> to vector<3x128xf32>
    %cst_63 = arith.constant 0.000000e+00 : f32
    %124 = vector.broadcast %cst_63 : f32 to vector<72x128xf32>
    %125 = arith.maximumf %27, %124 : vector<72x128xf32>
    %126 = math.absf %27 : vector<72x128xf32>
    %cst_64 = arith.constant 0.000000e+00 : f32
    %127 = vector.broadcast %cst_64 : f32 to vector<72x128xf32>
    %128 = arith.subf %127, %126 : vector<72x128xf32>
    %129 = math.exp %128 : vector<72x128xf32>
    %cst_65 = arith.constant 1.000000e+00 : f32
    %130 = vector.broadcast %cst_65 : f32 to vector<72x128xf32>
    %131 = arith.addf %130, %129 : vector<72x128xf32>
    %132 = math.log %131 : vector<72x128xf32>
    %133 = arith.addf %125, %132 : vector<72x128xf32>
    %cst_66 = arith.constant 1.000000e-03 : f32
    %134 = vector.broadcast %cst_66 : f32 to vector<72x128xf32>
    %135 = arith.addf %134, %133 : vector<72x128xf32>
    %136 = vector.extract_strided_slice %105 {offsets = [0, 0], sizes = [72, 128], strides = [1, 1]} : vector<144x128xf32> to vector<72x128xf32>
    %cst_67 = arith.constant 1.000000e+00 : f32
    %137 = vector.broadcast %cst_67 : f32 to vector<72x128xf32>
    %138 = arith.subf %136, %137 : vector<72x128xf32>
    %139 = vector.broadcast %22 : vector<72x1xf32> to vector<72x128xf32>
    %140 = arith.cmpf oeq, %139, %138 : vector<72x128xf32>
    %141 = arith.extui %140 : vector<72x128xi1> to vector<72x128xi32>
    %142 = arith.sitofp %141 : vector<72x128xi32> to vector<72x128xf32>
    %cst_68 = arith.constant 0.000000e+00 : f32
    %143 = vector.broadcast %cst_68 : f32 to vector<3x128xf32>
    %144 = arith.cmpf oeq, %103, %143 : vector<3x128xf32>
    %145 = arith.mulf %142, %135 : vector<72x128xf32>
    %cst_69 = arith.constant dense<0.000000e+00> : vector<3x128xf32>
    %146 = tpu.matmul %25, %145, %cst_69 {dimension_numbers = #tpu.dot_dimension_numbers<[1], [0], [0], [1], [0, 0, 1, 1], [], []>} : vector<3x72xf32>, vector<72x128xf32>, vector<3x128xf32> -> vector<3x128xf32>
    %cst_70 = arith.constant 1.000000e+00 : f32
    %147 = vector.broadcast %cst_70 : f32 to vector<3x128xf32>
    %148 = arith.select %144, %147, %146 : vector<3x128xi1>, vector<3x128xf32>
    %cst_71 = arith.constant 1.900000e+01 : f32
    %149 = vector.broadcast %cst_71 : f32 to vector<3x128xf32>
    %150 = arith.cmpf oeq, %103, %149 : vector<3x128xf32>
    %151 = vector.extract_strided_slice %109 {offsets = [0, 0], sizes = [72, 128], strides = [1, 1]} : vector<144x128xf32> to vector<72x128xf32>
    %152 = arith.mulf %151, %135 : vector<72x128xf32>
    %cst_72 = arith.constant dense<0.000000e+00> : vector<3x128xf32>
    %153 = tpu.matmul %25, %152, %cst_72 {dimension_numbers = #tpu.dot_dimension_numbers<[1], [0], [0], [1], [0, 0, 1, 1], [], []>} : vector<3x72xf32>, vector<72x128xf32>, vector<3x128xf32> -> vector<3x128xf32>
    %cst_73 = arith.constant 1.000000e+00 : f32
    %154 = vector.broadcast %cst_73 : f32 to vector<3x128xf32>
    %155 = arith.select %150, %154, %153 : vector<3x128xi1>, vector<3x128xf32>
    %156 = arith.subf %122, %120 : vector<3x128xf32>
    %cst_74 = arith.constant 1.000000e+00 : f32
    %157 = vector.broadcast %cst_74 : f32 to vector<3x128xf32>
    %158 = arith.divf %157, %156 : vector<3x128xf32>
    %159 = arith.subf %123, %121 : vector<3x128xf32>
    %160 = arith.mulf %159, %158 : vector<3x128xf32>
    %161 = arith.subf %76, %120 : vector<3x128xf32>
    %162 = arith.mulf %161, %158 : vector<3x128xf32>
    %cst_75 = arith.constant 1.000000e+00 : f32
    %163 = vector.broadcast %cst_75 : f32 to vector<3x128xf32>
    %164 = arith.subf %163, %162 : vector<3x128xf32>
    %165 = arith.mulf %162, %164 : vector<3x128xf32>
    %166 = arith.addf %148, %155 : vector<3x128xf32>
    %cst_76 = arith.constant 2.000000e+00 : f32
    %167 = vector.broadcast %cst_76 : f32 to vector<3x128xf32>
    %168 = arith.mulf %167, %160 : vector<3x128xf32>
    %169 = arith.subf %166, %168 : vector<3x128xf32>
    %170 = arith.mulf %169, %165 : vector<3x128xf32>
    %171 = arith.addf %160, %170 : vector<3x128xf32>
    %172 = arith.mulf %160, %162 : vector<3x128xf32>
    %173 = arith.mulf %172, %162 : vector<3x128xf32>
    %174 = arith.mulf %148, %165 : vector<3x128xf32>
    %175 = arith.addf %173, %174 : vector<3x128xf32>
    %176 = arith.mulf %159, %175 : vector<3x128xf32>
    %177 = arith.divf %176, %171 : vector<3x128xf32>
    %178 = arith.addf %121, %177 : vector<3x128xf32>
    %179 = arith.mulf %160, %160 : vector<3x128xf32>
    %180 = arith.mulf %155, %162 : vector<3x128xf32>
    %181 = arith.mulf %180, %162 : vector<3x128xf32>
    %cst_77 = arith.constant 2.000000e+00 : f32
    %182 = vector.broadcast %cst_77 : f32 to vector<3x128xf32>
    %183 = arith.mulf %182, %160 : vector<3x128xf32>
    %184 = arith.mulf %183, %165 : vector<3x128xf32>
    %185 = arith.addf %181, %184 : vector<3x128xf32>
    %cst_78 = arith.constant 1.000000e+00 : f32
    %186 = vector.broadcast %cst_78 : f32 to vector<3x128xf32>
    %187 = arith.subf %186, %162 : vector<3x128xf32>
    %188 = arith.mulf %148, %187 : vector<3x128xf32>
    %cst_79 = arith.constant 1.000000e+00 : f32
    %189 = vector.broadcast %cst_79 : f32 to vector<3x128xf32>
    %190 = arith.subf %189, %162 : vector<3x128xf32>
    %191 = arith.mulf %188, %190 : vector<3x128xf32>
    %192 = arith.addf %185, %191 : vector<3x128xf32>
    %193 = arith.mulf %179, %192 : vector<3x128xf32>
    %194 = math.log %193 : vector<3x128xf32>
    %195 = math.log %171 : vector<3x128xf32>
    %cst_80 = arith.constant 2.000000e+00 : f32
    %196 = vector.broadcast %cst_80 : f32 to vector<3x128xf32>
    %197 = arith.mulf %196, %195 : vector<3x128xf32>
    %198 = arith.subf %194, %197 : vector<3x128xf32>
    %cst_81 = arith.constant -1.000000e+01 : f32
    %199 = vector.broadcast %cst_81 : f32 to vector<3x128xf32>
    %200 = arith.cmpf oge, %72, %199 : vector<3x128xf32>
    %cst_82 = arith.constant 1.000000e+01 : f32
    %201 = vector.broadcast %cst_82 : f32 to vector<3x128xf32>
    %202 = arith.cmpf ole, %72, %201 : vector<3x128xf32>
    %203 = arith.andi %200, %202 : vector<3x128xi1>
    %204 = arith.select %203, %178, %72 : vector<3x128xi1>, vector<3x128xf32>
    %cst_83 = arith.constant 0.000000e+00 : f32
    %205 = vector.broadcast %cst_83 : f32 to vector<3x128xf32>
    %206 = arith.select %203, %198, %205 : vector<3x128xi1>, vector<3x128xf32>
    %cst_84 = arith.constant dense<0.000000e+00> : vector<128xf32>
    %207 = vector.multi_reduction <add>, %206, %cst_84 [0] : vector<3x128xf32> to vector<128xf32>
    %208 = vector.shape_cast %207 : vector<128xf32> to vector<1x128xf32>
    %c0_85 = arith.constant 0 : index
    %c0_86 = arith.constant 0 : index
    %209 = vector.load %arg17[%c0_85, %c0_86] : memref<1x128xf32, #tpu.memory_space<vmem>>, vector<1x128xf32>
    tpu.vector_store %arg17[%c0_85, %c0_86], %208 {strides = array<i32>} : memref<1x128xf32, #tpu.memory_space<vmem>>, vector<1x128xf32>,
    %c0_87 = arith.constant 0 : index
    %c0_88 = arith.constant 0 : index
    %210 = vector.load %arg15[%c0_87, %c0_88] : memref<5x1xf32, #tpu.memory_space<vmem>>, vector<5x1xf32>
    %211 = vector.broadcast %210 : vector<5x1xf32> to vector<5x128xf32>
    %212 = arith.mulf %211, %0 : vector<5x128xf32>
    %c0_89 = arith.constant 0 : index
    %c0_90 = arith.constant 0 : index
    %213 = vector.load %arg14[%c0_89, %c0_90] : memref<5x3xf32, #tpu.memory_space<vmem>>, vector<5x3xf32>
    %cst_91 = arith.constant dense<0.000000e+00> : vector<5x128xf32>
    %214 = tpu.matmul %213, %204, %cst_91 {dimension_numbers = #tpu.dot_dimension_numbers<[1], [0], [0], [1], [0, 0, 1, 1], [], []>} : vector<5x3xf32>, vector<3x128xf32>, vector<5x128xf32> -> vector<5x128xf32>
    %215 = arith.addf %212, %214 : vector<5x128xf32>
    %c0_92 = arith.constant 0 : index
    %c0_93 = arith.constant 0 : index
    %216 = vector.load %arg16[%c0_92, %c0_93] : memref<5x128xf32, #tpu.memory_space<vmem>>, vector<5x128xf32>
    tpu.vector_store %arg16[%c0_92, %c0_93], %215 {strides = array<i32>} : memref<5x128xf32, #tpu.memory_space<vmem>>, vector<5x128xf32>,
    return
  }
  func.func @transform_0(%arg0: i32) -> (i32, i32) {
    %c0_i32 = arith.constant 0 : i32
    %c0_i32_0 = arith.constant 0 : i32
    return %c0_i32, %arg0 : i32, i32
  }
  func.func @transform_1(%arg0: i32) -> (i32, i32) {
    %c0_i32 = arith.constant 0 : i32
    %c0_i32_0 = arith.constant 0 : i32
    %c0_i32_1 = arith.constant 0 : i32
    return %c0_i32, %c0_i32_0 : i32, i32
  }
  func.func @transform_2(%arg0: i32) -> (i32, i32) {
    %c0_i32 = arith.constant 0 : i32
    %c0_i32_0 = arith.constant 0 : i32
    %c0_i32_1 = arith.constant 0 : i32
    return %c0_i32, %c0_i32_0 : i32, i32
  }
  func.func @transform_3(%arg0: i32) -> (i32, i32) {
    %c0_i32 = arith.constant 0 : i32
    %c0_i32_0 = arith.constant 0 : i32
    %c0_i32_1 = arith.constant 0 : i32
    return %c0_i32, %c0_i32_0 : i32, i32
  }
  func.func @transform_4(%arg0: i32) -> (i32, i32) {
    %c0_i32 = arith.constant 0 : i32
    %c0_i32_0 = arith.constant 0 : i32
    %c0_i32_1 = arith.constant 0 : i32
    return %c0_i32, %c0_i32_0 : i32, i32
  }
  func.func @transform_5(%arg0: i32) -> (i32, i32) {
    %c0_i32 = arith.constant 0 : i32
    %c0_i32_0 = arith.constant 0 : i32
    %c0_i32_1 = arith.constant 0 : i32
    return %c0_i32, %c0_i32_0 : i32, i32
  }
  func.func @transform_6(%arg0: i32) -> (i32, i32) {
    %c0_i32 = arith.constant 0 : i32
    %c0_i32_0 = arith.constant 0 : i32
    %c0_i32_1 = arith.constant 0 : i32
    return %c0_i32, %c0_i32_0 : i32, i32
  }
  func.func @transform_7(%arg0: i32) -> (i32, i32) {
    %c0_i32 = arith.constant 0 : i32
    %c0_i32_0 = arith.constant 0 : i32
    %c0_i32_1 = arith.constant 0 : i32
    return %c0_i32, %c0_i32_0 : i32, i32
  }
  func.func @transform_8(%arg0: i32) -> (i32, i32) {
    %c0_i32 = arith.constant 0 : i32
    %c0_i32_0 = arith.constant 0 : i32
    %c0_i32_1 = arith.constant 0 : i32
    return %c0_i32, %c0_i32_0 : i32, i32
  }
  func.func @transform_9(%arg0: i32) -> (i32, i32) {
    %c0_i32 = arith.constant 0 : i32
    %c0_i32_0 = arith.constant 0 : i32
    %c0_i32_1 = arith.constant 0 : i32
    return %c0_i32, %c0_i32_0 : i32, i32
  }
  func.func @transform_10(%arg0: i32) -> (i32, i32) {
    %c0_i32 = arith.constant 0 : i32
    %c0_i32_0 = arith.constant 0 : i32
    %c0_i32_1 = arith.constant 0 : i32
    return %c0_i32, %c0_i32_0 : i32, i32
  }
  func.func @transform_11(%arg0: i32) -> (i32, i32) {
    %c0_i32 = arith.constant 0 : i32
    %c0_i32_0 = arith.constant 0 : i32
    %c0_i32_1 = arith.constant 0 : i32
    return %c0_i32, %c0_i32_0 : i32, i32
  }
  func.func @transform_12(%arg0: i32) -> (i32, i32) {
    %c0_i32 = arith.constant 0 : i32
    %c0_i32_0 = arith.constant 0 : i32
    %c0_i32_1 = arith.constant 0 : i32
    return %c0_i32, %c0_i32_0 : i32, i32
  }
  func.func @transform_13(%arg0: i32) -> (i32, i32) {
    %c0_i32 = arith.constant 0 : i32
    %c0_i32_0 = arith.constant 0 : i32
    %c0_i32_1 = arith.constant 0 : i32
    return %c0_i32, %c0_i32_0 : i32, i32
  }
  func.func @transform_14(%arg0: i32) -> (i32, i32) {
    %c0_i32 = arith.constant 0 : i32
    %c0_i32_0 = arith.constant 0 : i32
    %c0_i32_1 = arith.constant 0 : i32
    return %c0_i32, %c0_i32_0 : i32, i32
  }
  func.func @transform_15(%arg0: i32) -> (i32, i32) {
    %c0_i32 = arith.constant 0 : i32
    %c0_i32_0 = arith.constant 0 : i32
    return %c0_i32, %arg0 : i32, i32
  }
  func.func @transform_16(%arg0: i32) -> (i32, i32) {
    %c0_i32 = arith.constant 0 : i32
    %c0_i32_0 = arith.constant 0 : i32
    return %c0_i32, %arg0 : i32, i32
  }
}

</mosaic_0001>

<bundles_post_ra>
// kernel: tpu_custom_call.1
= control target key start
LH: loop header
LB: loop body
LE: loop exit
PB: predicated region body
PF: predicated region fallthrough
CT: control target
= control target key end

     0   :  { %s5290_s0 = inlined_call_operand.vmem [shape: f32[5,256], index: 0, kind: input, shape index: {}]   ;;  %s5291_s1 = inlined_call_operand.vmem [shape: f32[32,5], index: 1, kind: input, shape index: {}]   ;;  %s5292_s2 = inlined_call_operand.vmem [shape: f32[32,1], index: 2, kind: input, shape index: {}]   ;;  %s5293_s3 = inlined_call_operand.vmem [shape: f32[32,32], index: 3, kind: input, shape index: {}]   ;;  %s5294_s4 = inlined_call_operand.vmem [shape: f32[32,1], index: 4, kind: input, shape index: {}]   ;;  %s5295_s5 = inlined_call_operand.vmem [shape: f32[216,32], index: 5, kind: input, shape index: {}]   ;;  %s5296_s6 = inlined_call_operand.vmem [shape: f32[216,1], index: 6, kind: input, shape index: {}]   ;;  %s5297_s7 = inlined_call_operand.vmem [shape: f32[144,144], index: 7, kind: input, shape index: {}]   ;;  %s5298_s8 = inlined_call_operand.vmem [shape: f32[216,1], index: 8, kind: input, shape index: {}]   ;;  %s5299_s9 = inlined_call_operand.vmem [shape: f32[144,6], index: 9, kind: input, shape index: {}]   ;;  %s5300_s10 = inlined_call_operand.vmem [shape: f32[6,144], index: 10, kind: input, shape index: {}]   ;;  %s5301_s11 = inlined_call_operand.vmem [shape: f32[3,72], index: 11, kind: input, shape index: {}]   ;;  %s5302_s12 = inlined_call_operand.vmem [shape: f32[3,5], index: 12, kind: input, shape index: {}]   ;;  %s5303_s13 = inlined_call_operand.vmem [shape: f32[5,3], index: 13, kind: input, shape index: {}]   ;;  %s5304_s14 = inlined_call_operand.vmem [shape: f32[5,1], index: 14, kind: input, shape index: {}]   ;;  %s5305_s15 = inlined_call_operand.hbm [shape: f32[5,256], index: 15, kind: output, shape index: {0}]   ;;  %s5306_s16 = inlined_call_operand.hbm [shape: f32[1,256], index: 16, kind: output, shape index: {1}]  }
   0x1   :  { %5339 = sst [smem:[#allocation38_spill]] %s5290_s0 }
   0x2   :  { %5340 = sst [smem:[#allocation39_spill]] %s5291_s1 }
   0x3   :  { %5341 = sst [smem:[#allocation40_spill]] %s5292_s2 }
   0x4   :  { %5342 = sst [smem:[#allocation41_spill]] %s5293_s3 }
   0x5   :  { %5343 = sst [smem:[#allocation42_spill]] %s5294_s4 }
   0x6   :  { %22 = vsyncpa [#allocation3], 0 }
   0x7   :  { %24 = vsyncpa [#allocation3 + $0x1], 0 }
   0x8   :  { %25 = vsyncpa [#allocation5], 0 }
   0x9   :  { %27 = vsyncpa [#allocation5 + $0x1], 0  ;;  %s3606_s21 = smov 0   ;;  %s3608_s22 = smov 0  }
   0xa   :  { %s3610_s23 = smov 0   ;;  %s3612_s24 = smov 0  }
   0xb LB: > { %5344 = sst [smem:[#allocation8_spill]] %s3504_s21  ;;  %s3627_s25 = sadd.s32 4294967295, %s3516_s24   ;;  %s3516_s24 = sphi %s3612_s24, %s5411_s24   ;;  %s3512_s23 = sphi %s3610_s23, %s5413_s23   ;;  %s3508_s22 = sphi %s3608_s22, %s5415_s22   ;;  %s3504_s21 = sphi %s3606_s21, %s5414_s21  }
   0xc   : > { %5345 = sst [smem:[#allocation9_spill]] %s3512_s23  ;;  %s3044_s26 = sadd.s32 4294967294, %s3516_s24  }
   0xd   : > { %s3631_s27 = sadd.s32 1, %s3516_s24   ;;  %s360_s28 = sadd.s32 1, %s3512_s23 }
   0xe   : > { %5346 = sst [smem:[#allocation10_spill]] %s3631_s27  ;;  %s357_s29 = ssub.s32 %s3516_s24, %s3631_s27 }
   0xf   : > { %p370_p0 = scmp.ne.s32.totalorder %s3512_s23, %s3508_s22  ;;  %p358_p1 = scmp.eq.s32.totalorder %s357_s29, 0 }
  0x10   : > { %p371_p2 = scmp.eq.s32.totalorder %s3627_s25, 1  ;;  %p376_p3 = scmp.ne.s32.totalorder %s3508_s22, %s3504_s21 }
  0x11   : > { %p377_p4 = scmp.eq.s32.totalorder %s3044_s26, 1  ;;  %p3047_p7 = scmp.ge.s32.totalorder %s3516_s24, 1 }
  0x12   : > { %s3642_s30 = scalar_select %p358_p1, %s3512_s23, %s360_s28  }
  0x13   : > { %p3644_p5 = por %p371_p2, %p370_p0  ;;  %p3648_p6 = por %p377_p4, %p376_p3 }
  0x14   : > { %5347 = sst [smem:[#allocation11_spill]] %s3642_s30  ;;  %p470_p8 = scmp.lt.s32.totalorder %s3516_s24, 3 }
  0x15   : > { %s5349_s17 = scalar_select %p3648_p6, 1, 0 }
  0x16   : > { %p471_p9 = pnand %p3047_p7, %p470_p8 }
  0x17   : > { %5350 = sst [smem:[#allocation12_spill]] %s5349_s17 }
  0x18   : > { %474 = sbr.rel (%p471_p9) target bundleno = 2395 (0x95b), region = 80 }
  0x1d   : > { %s5351_s4 = sld [smem:[#allocation42_spill]]  ;;  %p523_p10 = scmp.lt.s32.totalorder %s3627_s25, 1  ;;  %v3518_v3 = vmov 0   ;;  %vm569_vm0 = vcmask 1044480   ;;  %vm556_vm1 = vcmask 39936   ;;  %v707_v10 = vld [vmem:[%s5296_s6] sm:$0xff] }
  0x1e   : > { %s5352_s2 = sld [smem:[#allocation40_spill]]  ;;  %3317 = vset.pattern.permute.xlu2 %v3518_v3  ;;  %3316 = vset.pattern.permute.xlu1 %v3518_v3  ;;  %v711_v14 = vld [vmem:[%s5296_s6 + $0x20] sm:$0xff]  ;;  %v708_v15 = vld [vmem:[%s5296_s6 + $0x8] sm:$0xff]  ;;  %v710_v16 = vld [vmem:[%s5296_s6 + $0x18] sm:$0xff]  ;;  %v5312_v37 = vmov 0.0   ;;  %s5238_s28 = sand.u32 1, %s3508_s22  }
  0x1f   : > { %3315 = vset.pattern.permute.xlu0 %v3518_v3  ;;  %s524_s18 = scalar_select %p523_p10, %s3627_s25, 1  ;;  %v709_v18 = vld [vmem:[%s5296_s6 + $0x10] sm:$0xff]  ;;  %v714_v20 = vld [vmem:[%s5296_s6 + $0x38] sm:$0xff]  ;;  %v712_v22 = vld [vmem:[%s5296_s6 + $0x28] sm:$0xff] }
  0x20   : > { %s5353_s30 = sld [smem:[#allocation38_spill]]  ;;  %v713_v19 = vld [vmem:[%s5296_s6 + $0x30] sm:$0xff]  ;;  %v716_v23 = vld [vmem:[%s5296_s6 + $0x48] sm:$0xff]  ;;  %v715_v25 = vld [vmem:[%s5296_s6 + $0x40] sm:$0xff]  ;;  %s2952_s21 = scalar_lea.hbm %s5306_s16, %s3627_s25 }
  0x21   : > { %s3049_s19 = sshll.u32 %s524_s18, 3  ;;  %s5354_s1 = sld [smem:[#allocation39_spill]]  ;;  %v717_v21 = vld [vmem:[%s5296_s6 + $0x50] sm:$0xff]  ;;  %v720_v24 = vld [vmem:[%s5296_s6 + $0x68] sm:$0xff]  ;;  %v719_v26 = vld [vmem:[%s5296_s6 + $0x60] sm:$0xff] }
  0x22   : > { %v723_v27 = vld [vmem:[%s5296_s6 + $0x80] sm:$0xff]  ;;  %v718_v28 = vld [vmem:[%s5296_s6 + $0x58] sm:$0xff]  ;;  %v721_v32 = vld [vmem:[%s5296_s6 + $0x70] sm:$0xff]  ;;  %s5355_s3 = sld [smem:[#allocation41_spill]]  ;;  %s522_s29 = scalar_lea.vmem [#allocation4], %s5238_s28 }
  0x23   : > { %v613_v0 = vld [vmem:[%s5351_s4 + $0x18] sm:$0xff]  ;;  %v612_v6 = vld [vmem:[%s5351_s4 + $0x10] sm:$0xff]  ;;  %v611_v11 = vld [vmem:[%s5351_s4 + $0x8] sm:$0xff]  ;;  %s2954_s18 = sshll.u32 %s522_s29, 4  ;;  %s2955_s18 = int_to_ptr.vmem [resolvable:$true] %s2954_s18 }
  0x24   : > { %v535_v1 = vld [vmem:[%s5352_s2 + $0x18] sm:$0xff]  ;;  %v533_v2 = vld [vmem:[%s5352_s2 + $0x8] sm:$0xff]  ;;  %631 = vperm.xlu2 %3317, %v613_v0   ;;  %v534_v7 = vld [vmem:[%s5352_s2 + $0x10] sm:$0xff] }
  0x25   : > { %553 = vperm.xlu0 %3315, %v535_v1   ;;  %543 = vperm.xlu1 %3316, %v533_v2   ;;  %v532_v8 = vld [vmem:[%s5352_s2] sm:$0xff]  ;;  %v722_v29 = vld [vmem:[%s5296_s6 + $0x78] sm:$0xff]  ;;  %v724_v33 = vld [vmem:[%s5296_s6 + $0x88] sm:$0xff] }
  0x26   : > { %s3671_s23 = scalar_lea.vmem %s5353_s30, %s3049_s19  ;;  %v610_v12 = vld [vmem:[%s5351_s4] sm:$0xff]  ;;  %v3770_v34 = vld [vmem:[%s5298_s8 + $0x38] sm:$0xff]  ;;  %v3780_v39 = vld [vmem:[%s5298_s8 + $0x30] sm:$0xff]  ;;  %s2956_s30 = sshll.u32 %s2952_s21, 4  ;;  %s2957_s30 = int_to_ptr.hbm [resolvable:$true] %s2956_s30 }
  0x27   : > { %v528_v4 = vld [vmem:[%s5354_s1] sm:$0xff]  ;;  %v529_v9 = vld [vmem:[%s5354_s1 + $0x8] sm:$0xff]  ;;  %v530_v13 = vld [vmem:[%s5354_s1 + $0x10] sm:$0xff]  ;;  %vm1790_vm4 = vcmp.eq.f32.partialorder %v3770_v34, 20.0  ;;  %vm2005_vm5 = vcmp.gt.f32.partialorder %v3770_v34, 20.0  ;;  %vm1789_vm6 = vcmp.eq.f32.partialorder %v3780_v39, 20.0 }
  0x28   : > { %v527_v5 = vld [vmem:[%s3671_s23] sm:$0x1f]  ;;  %v531_v17 = vld [vmem:[%s5354_s1 + $0x18] sm:$0xff]  ;;  %v1808_v36 = vsel %vm1790_vm4, 1, %v3518_v3  ;;  %v2014_v40 = vsel %vm2005_vm5, 1, %v3518_v3  ;;  %v1807_v41 = vsel %vm1789_vm6, 1, %v3518_v3 }
  0x29   : > { %3050 = vmatpush.msk.msra.mxu2 %vm569_vm0, %v527_v5  ;;  %v3757_v30 = vld [vmem:[%s5298_s8 + $0x40] sm:$0xff]  ;;  %v1942_v42 = vsel %vm1790_vm4, 1e-06, %v5312_v37  ;;  %v3790_v43 = vld [vmem:[%s5298_s8 + $0x28] sm:$0xff]  ;;  %vm2004_vm7 = vcmp.gt.f32.partialorder %v3780_v39, 20.0  ;;  %v3810_v51 = vld [vmem:[%s5298_s8 + $0x18] sm:$0xff] }
  0x2a   : > { %3051 = vmatmul.msk.f32.vlgmr.msra.gmra.mxu2 %vm556_vm1, %v528_v4  ;;  %vm1791_vm2 = vcmp.eq.f32.partialorder %v3757_v30, 20.0  ;;  %vm2006_vm3 = vcmp.gt.f32.partialorder %v3757_v30, 20.0  ;;  %vm1788_vm8 = vcmp.eq.f32.partialorder %v3790_v43, 20.0  ;;  %v2013_v44 = vsel %vm2004_vm7, 1, %v3518_v3  ;;  %v3800_v47 = vld [vmem:[%s5298_s8 + $0x20] sm:$0xff]  ;;  %v3820_v55 = vld [vmem:[%s5298_s8 + $0x10] sm:$0xff] }
  0x2b   : > { %v1809_v31 = vsel %vm1791_vm2, 1, %v3518_v3  ;;  %v2015_v35 = vsel %vm2006_vm3, 1, %v3518_v3  ;;  %v1943_v38 = vsel %vm1791_vm2, 1e-06, %v5312_v37  ;;  %v1806_v45 = vsel %vm1788_vm8, 1, %v3518_v3  ;;  %v3830_v59 = vld [vmem:[%s5298_s8 + $0x8] sm:$0xff] }
  0x2c   : > { %626 = vperm.xlu2 %3317, %v612_v6   ;;  %v1941_v46 = vsel %vm1789_vm6, 1e-06, %v5312_v37  ;;  %vm2003_vm9 = vcmp.gt.f32.partialorder %v3790_v43, 20.0  ;;  %vm1787_vm10 = vcmp.eq.f32.partialorder %v3800_v47, 20.0  ;;  %v1940_v50 = vsel %vm1788_vm8, 1e-06, %v5312_v37 }
  0x2d   : > { %548 = vperm.xlu0 %3315, %v534_v7   ;;  %538 = vperm.xlu1 %3316, %v532_v8   ;;  %v2012_v48 = vsel %vm2003_vm9, 1, %v3518_v3  ;;  %v1805_v49 = vsel %vm1787_vm10, 1, %v3518_v3  ;;  %vm2002_vm11 = vcmp.gt.f32.partialorder %v3800_v47, 20.0  ;;  %vm1786_vm12 = vcmp.eq.f32.partialorder %v3810_v51, 20.0  ;;  %v3840_v63 = vld [vmem:[%s5298_s8] sm:$0xff]  ;;  %v1063_v4 = vld [vmem:[%s5298_s8 + $0x78] sm:$0xff] }
  0x2e   : > { %v2011_v52 = vsel %vm2002_vm11, 1, %v3518_v3  ;;  %v1804_v53 = vsel %vm1786_vm12, 1, %v3518_v3  ;;  %v1939_v54 = vsel %vm1787_vm10, 1e-06, %v5312_v37  ;;  %vm2001_vm13 = vcmp.gt.f32.partialorder %v3810_v51, 20.0  ;;  %v1062_v8 = vld [vmem:[%s5298_s8 + $0x70] sm:$0xff] }
  0x2f   : > { %vm1785_vm14 = vcmp.eq.f32.partialorder %v3820_v55, 20.0  ;;  %v2010_v56 = vsel %vm2001_vm13, 1, %v3518_v3  ;;  %v1938_v58 = vsel %vm1786_vm12, 1e-06, %v5312_v37  ;;  %vm2000_vm15 = vcmp.gt.f32.partialorder %v3820_v55, 20.0  ;;  %s2930_s19 = scalar_lea.sflag [#allocation5], %s5238_s28 }
  0x30   : > { %v1803_v57 = vsel %vm1785_vm14, 1, %v3518_v3  ;;  %vm1784_vm2 = vcmp.eq.f32.partialorder %v3830_v59, 20.0  ;;  %v2009_v60 = vsel %vm2000_vm15, 1, %v3518_v3  ;;  %v1937_v62 = vsel %vm1785_vm14, 1e-06, %v5312_v37  ;;  %s3436_s20 = sshra.s32 %s2957_s30, 4  ;;  %s3437_s20 = int_to_ptr.hbm [resolvable:$true] %s3436_s20 }
  0x31   : > { %v1802_v61 = vsel %vm1784_vm2, 1, %v3518_v3  ;;  %vm1999_vm3 = vcmp.gt.f32.partialorder %v3830_v59, 20.0  ;;  %vm1783_vm4 = vcmp.eq.f32.partialorder %v3840_v63, 20.0  ;;  %v1936_v2 = vsel %vm1784_vm2, 1e-06, %v5312_v37  ;;  %s3438_s26 = scalar_lea.hbm %s3437_s20, 1  ;;  %p3443_p0 = scmp.lt.s32.totalorder %s3437_s20, %s5306_s16 }
  0x32   : > { %3052 = vmatmul.msk.f32.gmra.mxu2 %vm556_vm1, %v529_v9  ;;  %v2008_v0 = vsel %vm1999_vm3, 1, %v3518_v3  ;;  %v1801_v1 = vsel %vm1783_vm4, 1, %v3518_v3  ;;  %vm1798_vm5 = vcmp.eq.f32.partialorder %v1063_v4, 20.0  ;;  %vm1998_vm6 = vcmp.gt.f32.partialorder %v3840_v63, 20.0  ;;  %p3439_p11 = scmp.ne.s32.totalorder %s3437_s20, %s3438_s26 }
  0x33   : > { %v1816_v5 = vsel %vm1798_vm5, 1, %v3518_v3  ;;  %v1935_v6 = vsel %vm1783_vm4, 1e-06, %v5312_v37  ;;  %v2007_v7 = vsel %vm1998_vm6, 1, %v3518_v3  ;;  %vm1797_vm7 = vcmp.eq.f32.partialorder %v1062_v8, 20.0 }
  0x34   : > { %736 = vperm.xlu2 %3317, %v707_v10   ;;  %v1815_v10 = vsel %vm1797_vm7, 1, %v3518_v3  ;;  %vm634_vm13 = vcmask 261120   ;;  %vm1135_vm2 = vcmask 1040384   ;;  %vm1137_vm3 = vcmask 1041408   ;;  %p3440_p12 = pnand %p3439_p11, %p3644_p5 }
  0x35   : > { %621 = vperm.xlu0 %3315, %v611_v11   ;;  %616 = vperm.xlu1 %3316, %v610_v12   ;;  %v1060_v11 = vld [vmem:[%s5298_s8 + $0x60] sm:$0xff]  ;;  %v1061_v12 = vld [vmem:[%s5298_s8 + $0x68] sm:$0xff]  ;;  %vm1139_vm4 = vcmask 1042432   ;;  %vm1141_vm5 = vcmask 1043456   ;;  %vm1199_vm6 = vcmask 1045504   ;;  %vm1144_vm7 = vcmask 48128  }
  0x36   : > { %vm1795_vm8 = vcmp.eq.f32.partialorder %v1060_v11, 20.0  ;;  %vm1796_vm9 = vcmp.eq.f32.partialorder %v1061_v12, 20.0  ;;  %p3441_p13 = pneg %p3440_p12 }
  0x3a   : > { %3053 = vmatmul.msk.f32.gmra.mxu2 %vm556_vm1, %v530_v13 }
  0x3c   : > { %756 = vperm.xlu2 %3317, %v711_v14   ;;  %v1813_v14 = vsel %vm1795_vm8, 1, %v3518_v3  ;;  %vm1328_vm8 = vcmask 130048  }
  0x3d   : > { %741 = vperm.xlu0 %3315, %v708_v15   ;;  %751 = vperm.xlu1 %3316, %v710_v16   ;;  %v1814_v15 = vsel %vm1796_vm9, 1, %v3518_v3 }
  0x42   : > { %3054 = vmatmul.msk.f32.gmra.mxu2 %vm556_vm1, %v531_v17  ;;  %v1059_v17 = vld [vmem:[%s5298_s8 + $0x58] sm:$0xff] }
  0x43   : > { %vm1794_vm10 = vcmp.eq.f32.partialorder %v1059_v17, 20.0 }
  0x44   : > { %746 = vperm.xlu2 %3317, %v709_v18  }
  0x45   : > { %766 = vperm.xlu0 %3315, %v713_v19   ;;  %771 = vperm.xlu1 %3316, %v714_v20   ;;  %v1812_v20 = vsel %vm1794_vm10, 1, %v3518_v3 }
  0x4c   : > { %786 = vperm.xlu2 %3317, %v717_v21   ;;  %v1057_v21 = vld [vmem:[%s5298_s8 + $0x48] sm:$0xff] }
  0x4d   : > { %761 = vperm.xlu0 %3315, %v712_v22   ;;  %781 = vperm.xlu1 %3316, %v716_v23   ;;  %v1058_v22 = vld [vmem:[%s5298_s8 + $0x50] sm:$0xff]  ;;  %vm1792_vm11 = vcmp.eq.f32.partialorder %v1057_v21, 20.0 }
  0x4e   : > { %vm1793_vm12 = vcmp.eq.f32.partialorder %v1058_v22, 20.0 }
  0x54   : > { %801 = vperm.xlu2 %3317, %v720_v24  }
  0x55   : > { %776 = vperm.xlu0 %3315, %v715_v25   ;;  %796 = vperm.xlu1 %3316, %v719_v26  }
  0x5c   : > { %816 = vperm.xlu2 %3317, %v723_v27  }
  0x5d   : > { %791 = vperm.xlu0 %3315, %v718_v28   ;;  %811 = vperm.xlu1 %3316, %v722_v29  }
  0x64   : > { %1844 = vperm.xlu2 %3317, %v1809_v31   ;;  %v1810_v31 = vsel %vm1792_vm11, 1, %v3518_v3 }
  0x65   : > { %806 = vperm.xlu0 %3315, %v721_v32   ;;  %821 = vperm.xlu1 %3316, %v724_v33   ;;  %v1811_v33 = vsel %vm1793_vm12, 1, %v3518_v3 }
  0x6c   : > { %2041 = vperm.xlu2 %3317, %v2015_v35  }
  0x6d   : > { %1841 = vperm.xlu0 %3315, %v1808_v36   ;;  %1986 = vperm.xlu1 %3316, %v1943_v38  }
  0x74   : > { %2038 = vperm.xlu2 %3317, %v2014_v40   ;;  %v606_v40 = vld [vmem:[%s5355_s3] sm:$0xff] }
  0x75   : > { %1838 = vperm.xlu0 %3315, %v1807_v41   ;;  %1981 = vperm.xlu1 %3316, %v1942_v42   ;;  %v607_v41 = vld [vmem:[%s5355_s3 + $0x8] sm:$0xff]  ;;  %v608_v42 = vld [vmem:[%s5355_s3 + $0x10] sm:$0xff] }
  0x7c   : > { %2035 = vperm.xlu2 %3317, %v2013_v44   ;;  %v1064_v44 = vld [vmem:[%s5298_s8 + $0x80] sm:$0xff] }
  0x7d   : > { %1835 = vperm.xlu0 %3315, %v1806_v45   ;;  %1976 = vperm.xlu1 %3316, %v1941_v46   ;;  %vm1799_vm15 = vcmp.eq.f32.partialorder %v1064_v44, 20.0  ;;  %v732_v46 = vld [vmem:[%s5296_s6 + $0xc8] sm:$0xff] }
  0x7e   : > { %v1817_v45 = vsel %vm1799_vm15, 1, %v3518_v3 }
  0x84   : > { %2032 = vperm.xlu2 %3317, %v2012_v48   ;;  %v731_v48 = vld [vmem:[%s5296_s6 + $0xc0] sm:$0xff] }
  0x85   : > { %1832 = vperm.xlu0 %3315, %v1805_v49   ;;  %1971 = vperm.xlu1 %3316, %v1940_v50   ;;  %v729_v49 = vld [vmem:[%s5296_s6 + $0xb0] sm:$0xff]  ;;  %v728_v50 = vld [vmem:[%s5296_s6 + $0xa8] sm:$0xff] }
  0x8c   : > { %2029 = vperm.xlu2 %3317, %v2011_v52   ;;  %v726_v52 = vld [vmem:[%s5296_s6 + $0x98] sm:$0xff] }
  0x8d   : > { %1829 = vperm.xlu0 %3315, %v1804_v53   ;;  %1966 = vperm.xlu1 %3316, %v1939_v54   ;;  %v725_v53 = vld [vmem:[%s5296_s6 + $0x90] sm:$0xff] }
  0x94   : > { %2026 = vperm.xlu2 %3317, %v2010_v56   ;;  %v632_v56 = vpop.permute.xlu2 %631 }
  0x95   : > { %1826 = vperm.xlu0 %3315, %v1803_v57   ;;  %1961 = vperm.xlu1 %3316, %v1938_v58  }
  0x97   : > { %v554_v16 = vpop.permute.xlu0 %553  ;;  %v544_v19 = vpop.permute.xlu1 %543 }
  0x9c   : > { %2023 = vperm.xlu2 %3317, %v2009_v60   ;;  %v627_v58 = vpop.permute.xlu2 %626 }
  0x9d   : > { %1823 = vperm.xlu0 %3315, %v1802_v61   ;;  %1956 = vperm.xlu1 %3316, %v1937_v62  }
  0x9f   : > { %v549_v23 = vpop.permute.xlu0 %548  ;;  %v539_v29 = vpop.permute.xlu1 %538 }
  0xa4   : > { %2020 = vperm.xlu2 %3317, %v2008_v0  }
  0xa5   : > { %1820 = vperm.xlu0 %3315, %v1801_v1   ;;  %1951 = vperm.xlu1 %3316, %v1936_v2  }
  0xa7   : > { %v622_v62 = vpop.permute.xlu0 %621  ;;  %v617_v1 = vpop.permute.xlu1 %616 }
  0xac   : > { %1865 = vperm.xlu2 %3317, %v1816_v5  }
  0xad   : > { %1946 = vperm.xlu0 %3315, %v1935_v6   ;;  %2017 = vperm.xlu1 %3316, %v2007_v7   ;;  %v590_v9 = vpop.f32.mrf.mxu2  ;;  %v680_v7 = vld [vmem:[%s5295_s5] sm:$0xff] }
  0xae   : > { %v591_v32 = vadd.f32 %v590_v9, %v539_v29  ;;  %v682_v9 = vld [vmem:[%s5295_s5 + $0x10] sm:$0xff]  ;;  %v699_v29 = vld [vmem:[%s5295_s5 + $0x98] sm:$0xff] }
  0xb0   : > { %v602_v38 = vmax.f32 %v591_v32, 0.0  ;;  %v700_v32 = vld [vmem:[%s5295_s5 + $0xa0] sm:$0xff] }
  0xb4   : > { %2334 = vperm.xlu2 %3317, %v1062_v8   ;;  %v681_v8 = vld [vmem:[%s5295_s5 + $0x8] sm:$0xff] }
  0xb5   : > { %2339 = vperm.xlu0 %3315, %v1063_v4   ;;  %1862 = vperm.xlu1 %3316, %v1815_v10   ;;  %v593_v13 = vpop.f32.mrf.mxu2  ;;  %v683_v10 = vld [vmem:[%s5295_s5 + $0x18] sm:$0xff] }
  0xb6   : > { %v594_v27 = vadd.f32 %v593_v13, %v544_v19  ;;  %v686_v13 = vld [vmem:[%s5295_s5 + $0x30] sm:$0xff]  ;;  %v692_v19 = vld [vmem:[%s5295_s5 + $0x60] sm:$0xff] }
  0xb8   : > { %v603_v36 = vmax.f32 %v594_v27, 0.0  ;;  %v698_v27 = vld [vmem:[%s5295_s5 + $0x90] sm:$0xff] }
  0xbc   : > { %1856 = vperm.xlu2 %3317, %v1813_v14   ;;  %v687_v14 = vld [vmem:[%s5295_s5 + $0x38] sm:$0xff] }
  0xbd   : > { %1859 = vperm.xlu0 %3315, %v1814_v15   ;;  %2329 = vperm.xlu1 %3316, %v1061_v12   ;;  %v596_v18 = vpop.f32.mrf.mxu2  ;;  %v685_v12 = vld [vmem:[%s5295_s5 + $0x28] sm:$0xff]  ;;  %v688_v15 = vld [vmem:[%s5295_s5 + $0x40] sm:$0xff] }
  0xbe   : > { %v597_v25 = vadd.f32 %v596_v18, %v549_v23  ;;  %v691_v18 = vld [vmem:[%s5295_s5 + $0x58] sm:$0xff]  ;;  %v696_v23 = vld [vmem:[%s5295_s5 + $0x80] sm:$0xff] }
  0xc0   : > { %v604_v35 = vmax.f32 %v597_v25, 0.0  ;;  %v697_v25 = vld [vmem:[%s5295_s5 + $0x88] sm:$0xff] }
  0xc4   : > { %2319 = vperm.xlu2 %3317, %v1059_v17   ;;  %v690_v17 = vld [vmem:[%s5295_s5 + $0x50] sm:$0xff] }
  0xc5   : > { %2324 = vperm.xlu0 %3315, %v1060_v11   ;;  %1853 = vperm.xlu1 %3316, %v1812_v20   ;;  %v599_v24 = vpop.f32.mrf.mxu2  ;;  %v684_v11 = vld [vmem:[%s5295_s5 + $0x20] sm:$0xff]  ;;  %v693_v20 = vld [vmem:[%s5295_s5 + $0x68] sm:$0xff] }
  0xc6   : > { %v600_v26 = vadd.f32 %v599_v24, %v554_v16  ;;  %v689_v16 = vld [vmem:[%s5295_s5 + $0x48] sm:$0xff] }
  0xc8   : > { %v605_v28 = vmax.f32 %v600_v26, 0.0 }
  0xca   : > { %659 = vmatpush.msra.mxu3 %v605_v28 }
  0xcc   : > { %1847 = vperm.xlu2 %3317, %v1810_v31   ;;  %660 = vmatpush.msra.mxu3 %v604_v35  ;;  %v701_v35 = vld [vmem:[%s5295_s5 + $0xa8] sm:$0xff] }
  0xcd   : > { %1850 = vperm.xlu0 %3315, %v1811_v33   ;;  %2314 = vperm.xlu1 %3316, %v1058_v22   ;;  %v695_v22 = vld [vmem:[%s5295_s5 + $0x78] sm:$0xff] }
  0xce   : > { %661 = vmatpush.msra.mxu3 %v603_v36 }
  0xd0   : > { %662 = vmatpush.msra.mxu3 %v602_v38  ;;  %v702_v38 = vld [vmem:[%s5295_s5 + $0xb0] sm:$0xff] }
  0xd1   : > { %3055 = vmatmul.msk.f32.vlgmr.msra.gmra.mxu3 %vm634_vm13, %v606_v40 }
  0xd4   : > { %2299 = vperm.xlu2 %3317, %v3770_v34   ;;  %v609_v34 = vld [vmem:[%s5355_s3 + $0x18] sm:$0xff]  ;;  %s3442_s3 = scalar_lea.hbm %s5306_s16, 2 }
  0xd5   : > { %2309 = vperm.xlu0 %3315, %v1057_v21   ;;  %2304 = vperm.xlu1 %3316, %v3757_v30   ;;  %v1065_v30 = vld [vmem:[%s5298_s8 + $0x88] sm:$0xff]  ;;  %v694_v21 = vld [vmem:[%s5295_s5 + $0x70] sm:$0xff]  ;;  %p3444_p1 = scmp.lt.s32.totalorder %s3442_s3, %s3438_s26 }
  0xd6   : > { %vm1800_vm14 = vcmp.eq.f32.partialorder %v1065_v30, 20.0 }
  0xd7   : > { %p3445_p2 = por %p3444_p1, %p3443_p0 }
  0xd9   : > { %3056 = vmatmul.msk.f32.gmra.mxu3 %vm634_vm13, %v607_v41  ;;  %v703_v41 = vld [vmem:[%s5295_s5 + $0xb8] sm:$0xff]  ;;  %p3446_p3 = pnand %p3445_p2, %p3441_p13 }
  0xdc   : > { %2284 = vperm.xlu2 %3317, %v3800_v47   ;;  %v730_v47 = vld [vmem:[%s5296_s6 + $0xb8] sm:$0xff] }
  0xdd   : > { %2294 = vperm.xlu0 %3315, %v3780_v39   ;;  %2289 = vperm.xlu1 %3316, %v3790_v43   ;;  %v1818_v39 = vsel %vm1800_vm14, 1, %v3518_v3  ;;  %v733_v43 = vld [vmem:[%s5296_s6 + $0xd0] sm:$0xff]  ;;  %v727_v3 = vld [vmem:[%s5296_s6 + $0xa0] sm:$0xff] }
  0xe1   : > { %3057 = vmatmul.msk.f32.gmra.mxu3 %vm634_vm13, %v608_v42 }
  0xe4   : > { %2269 = vperm.xlu2 %3317, %v3830_v59  }
  0xe5   : > { %2279 = vperm.xlu0 %3315, %v3810_v51   ;;  %2274 = vperm.xlu1 %3316, %v3820_v55   ;;  %v2887_v51 = vld [vmem:[%s5304_s14] sm:$0x1f] }
  0xe9   : > { %3058 = vmatmul.msk.f32.gmra.mxu3 %vm634_vm13, %v609_v34 }
  0xec   : > { %1871 = vperm.xlu2 %3317, %v1818_v39   ;;  %v705_v39 = vld [vmem:[%s5295_s5 + $0xc8] sm:$0xff] }
  0xed   : > { %2264 = vperm.xlu0 %3315, %v3840_v63   ;;  %866 = vperm.xlu1 %3316, %v733_v43   ;;  %v742_v43 = vpop.permute.xlu0 %741 }
  0xf4   : > { %1868 = vperm.xlu2 %3317, %v1817_v45   ;;  %v706_v45 = vld [vmem:[%s5295_s5 + $0xd0] sm:$0xff] }
  0xf5   : > { %2349 = vperm.xlu0 %3315, %v1065_v30   ;;  %861 = vperm.xlu1 %3316, %v732_v46   ;;  %v704_v30 = vld [vmem:[%s5295_s5 + $0xc0] sm:$0xff]  ;;  %v737_v46 = vpop.permute.xlu2 %736 }
  0xfc   : > { %851 = vperm.xlu2 %3317, %v730_v47   ;;  %v767_v47 = vpop.permute.xlu0 %766 }
  0xfd   : > { %2344 = vperm.xlu0 %3315, %v1064_v44   ;;  %856 = vperm.xlu1 %3316, %v731_v48  }
 0x104   : > { %836 = vperm.xlu2 %3317, %v727_v3   ;;  %v752_v3 = vpop.permute.xlu1 %751 }
 0x105   : > { %846 = vperm.xlu0 %3315, %v729_v49   ;;  %841 = vperm.xlu1 %3316, %v728_v50   ;;  %v757_v49 = vpop.permute.xlu2 %756 }
 0x10c   : > { %2890 = vperm.xlu2 %3317, %v2887_v51   ;;  %v762_v51 = vpop.permute.xlu0 %761 }
 0x10d   : > { %831 = vperm.xlu0 %3315, %v726_v52   ;;  %826 = vperm.xlu1 %3316, %v725_v53   ;;  %v772_v52 = vpop.permute.xlu1 %771 }
 0x154   : > { %v664_v54 = vpop.f32.mrf.mxu3 }
 0x155   : > { %v665_v2 = vadd.f32 %v664_v54, %v617_v1  ;;  %v747_v54 = vpop.permute.xlu2 %746 }
 0x157   : > { %v676_v6 = vmax.f32 %v665_v2, 0.0 }
 0x15c   : > { %v667_v55 = vpop.f32.mrf.mxu3 }
 0x15d   : > { %v668_v63 = vadd.f32 %v667_v55, %v622_v62  ;;  %v777_v55 = vpop.permute.xlu0 %776 }
 0x15f   : > { %v677_v5 = vmax.f32 %v668_v63, 0.0 }
 0x164   : > { %v670_v57 = vpop.f32.mrf.mxu3 }
 0x165   : > { %v671_v60 = vadd.f32 %v670_v57, %v627_v58  ;;  %v782_v57 = vpop.permute.xlu1 %781  ;;  %v787_v58 = vpop.permute.xlu2 %786 }
 0x167   : > { %v678_v4 = vmax.f32 %v671_v60, 0.0 }
 0x16c   : > { %v673_v59 = vpop.f32.mrf.mxu3 }
 0x16d   : > { %v674_v61 = vadd.f32 %v673_v59, %v632_v56  ;;  %v792_v59 = vpop.permute.xlu0 %791  ;;  %v797_v62 = vpop.permute.xlu1 %796 }
 0x16f   : > { %v679_v0 = vmax.f32 %v674_v61, 0.0 }
 0x171   : > { %962 = vmatpush.msrb.mxu2 %v679_v0  ;;  %v802_v0 = vpop.permute.xlu2 %801 }
 0x173   : > { %963 = vmatpush.msrb.mxu2 %v678_v4 }
 0x175   : > { %964 = vmatpush.msrb.mxu2 %v677_v5 }
 0x177   : > { %965 = vmatpush.msrb.mxu2 %v676_v6 }
 0x178   : > { %3059 = vmatmul.msk.f32.vlgmr.msrb.gmra.mxu2 %vm634_vm13, %v680_v7 }
 0x180   : > { %3060 = vmatmul.msk.f32.gmra.mxu2 %vm634_vm13, %v681_v8 }
 0x188   : > { %3061 = vmatmul.msk.f32.gmra.mxu2 %vm634_vm13, %v682_v9 }
 0x190   : > { %3062 = vmatmul.msk.f32.gmra.mxu2 %vm634_vm13, %v683_v10  ;;  %v807_v10 = vpop.permute.xlu0 %806 }
 0x198   : > { %3063 = vmatmul.msk.f32.gmra.mxu2 %vm634_vm13, %v684_v11 }
 0x1a0   : > { %3064 = vmatmul.msk.f32.gmra.mxu2 %vm634_vm13, %v685_v12 }
 0x1a8   : > { %3065 = vmatmul.msk.f32.gmra.mxu2 %vm634_vm13, %v686_v13 }
 0x1b0   : > { %3066 = vmatmul.msk.f32.gmra.mxu2 %vm634_vm13, %v687_v14 }
 0x1b8   : > { %3067 = vmatmul.msk.f32.gmra.mxu2 %vm634_vm13, %v688_v15 }
 0x1c0   : > { %3068 = vmatmul.msk.f32.gmra.mxu2 %vm634_vm13, %v689_v16 }
 0x1c8   : > { %3069 = vmatmul.msk.f32.gmra.mxu2 %vm634_vm13, %v690_v17 }
 0x1d0   : > { %3070 = vmatmul.msk.f32.gmra.mxu2 %vm634_vm13, %v691_v18 }
 0x1d8   : > { %3071 = vmatmul.msk.f32.gmra.mxu2 %vm634_vm13, %v692_v19 }
 0x1e0   : > { %3072 = vmatmul.msk.f32.gmra.mxu2 %vm634_vm13, %v693_v20 }
 0x1e8   : > { %3073 = vmatmul.msk.f32.gmra.mxu2 %vm634_vm13, %v694_v21 }
 0x1f0   : > { %3074 = vmatmul.msk.f32.gmra.mxu2 %vm634_vm13, %v695_v22 }
 0x1f8   : > { %3075 = vmatmul.msk.f32.gmra.mxu2 %vm634_vm13, %v696_v23 }
 0x1fb   : > { %v967_v24 = vpop.f32.mrf.mxu2 }
 0x1fc   : > { %v4061_v6 = vadd.f32 %v967_v24, %v737_v46 }
 0x200   : > { %3076 = vmatmul.msk.f32.gmra.mxu2 %vm634_vm13, %v697_v25 }
 0x203   : > { %v970_v26 = vpop.f32.mrf.mxu2 }
 0x204   : > { %v4053_v1 = vadd.f32 %v970_v26, %v742_v43 }
 0x206   : > { %v1087_v19 = vmax.f32 %v4061_v6, %v4053_v1 }
 0x208   : > { %3077 = vmatmul.msk.f32.gmra.mxu2 %vm634_vm13, %v698_v27 }
 0x20b   : > { %v973_v28 = vpop.f32.mrf.mxu2 }
 0x20c   : > { %v4069_v11 = vadd.f32 %v973_v28, %v747_v54  ;;  %v812_v28 = vpop.permute.xlu1 %811 }
 0x20e   : > { %v1088_v24 = vmax.f32 %v1087_v19, %v4069_v11 }
 0x210   : > { %3078 = vmatmul.msk.f32.gmra.mxu2 %vm634_vm13, %v699_v29 }
 0x213   : > { %v976_v31 = vpop.f32.mrf.mxu2 }
 0x214   : > { %v4055_v2 = vadd.f32 %v976_v31, %v752_v3  ;;  %v1089_v31 = vrot.slane %v1088_v24, 4 }
 0x218   : > { %3079 = vmatmul.msk.f32.gmra.mxu2 %vm634_vm13, %v700_v32 }
 0x21b   : > { %v979_v33 = vpop.f32.mrf.mxu2 }
 0x21c   : > { %v4049_v61 = vadd.f32 %v979_v33, %v757_v49 }
 0x21e   : > { %v1095_v12 = vmax.f32 %v4055_v2, %v4049_v61 }
 0x220   : > { %3080 = vmatmul.msk.f32.gmra.mxu2 %vm634_vm13, %v701_v35 }
 0x223   : > { %v982_v36 = vpop.f32.mrf.mxu2 }
 0x224   : > { %v4057_v4 = vadd.f32 %v982_v36, %v762_v51 }
 0x226   : > { %v1096_v20 = vmax.f32 %v1095_v12, %v4057_v4 }
 0x228   : > { %3081 = vmatmul.msk.f32.gmra.mxu2 %vm634_vm13, %v702_v38  ;;  %v1097_v27 = vrot.slane %v1096_v20, 4 }
 0x22a   : > { %v1098_v36 = vmax.f32 %v1096_v20, %v1097_v27 }
 0x22b   : > { %v985_v40 = vpop.f32.mrf.mxu2 }
 0x22c   : > { %v4063_v7 = vadd.f32 %v985_v40, %v767_v47  ;;  %v1090_v40 = vmax.f32 %v1088_v24, %v1089_v31  ;;  %v822_v47 = vpop.permute.xlu1 %821 }
 0x230   : > { %3082 = vmatmul.msk.f32.gmra.mxu2 %vm634_vm13, %v703_v41 }
 0x233   : > { %v988_v42 = vpop.f32.mrf.mxu2 }
 0x234   : > { %v4051_v63 = vadd.f32 %v988_v42, %v772_v52  ;;  %v817_v42 = vpop.permute.xlu2 %816 }
 0x236   : > { %v1103_v15 = vmax.f32 %v4063_v7, %v4051_v63 }
 0x238   : > { %3083 = vmatmul.msk.f32.gmra.mxu2 %vm634_vm13, %v704_v30 }
 0x23b   : > { %v991_v34 = vpop.f32.mrf.mxu2 }
 0x23c   : > { %v4065_v8 = vadd.f32 %v991_v34, %v777_v55  ;;  %v1099_v34 = vrot.slane %v1098_v36, 2 }
 0x23e   : > { %v1104_v22 = vmax.f32 %v1103_v15, %v4065_v8  ;;  %v1100_v49 = vmax.f32 %v1098_v36, %v1099_v34  ;;  %v4137_v36 = vld [vmem:[%s5299_s9 + $0x20] sm:$0xff]  ;;  %v4179_v34 = vld [vmem:[%s5299_s9 + $0x50] sm:$0xff] }
 0x240   : > { %3084 = vmatmul.msk.f32.gmra.mxu2 %vm634_vm13, %v705_v39  ;;  %v1105_v29 = vrot.slane %v1104_v22, 4 }
 0x242   : > { %v1106_v38 = vmax.f32 %v1104_v22, %v1105_v29  ;;  %v4107_v29 = vld [vmem:[%s5299_s9] sm:$0xff] }
 0x243   : > { %v994_v44 = vpop.f32.mrf.mxu2 }
 0x244   : > { %v4073_v13 = vadd.f32 %v994_v44, %v782_v57  ;;  %v1107_v43 = vrot.slane %v1106_v38, 2  ;;  %v1091_v44 = vrot.slane %v1090_v40, 2  ;;  %v1101_v57 = vrot.slane %v1100_v49, 1 }
 0x246   : > { %v1108_v52 = vmax.f32 %v1106_v38, %v1107_v43  ;;  %v1102_v12 = vmax.f32 %v1100_v49, %v1101_v57  ;;  %v4144_v38 = vld [vmem:[%s5299_s9 + $0x28] sm:$0xff]  ;;  %v4186_v43 = vld [vmem:[%s5299_s9 + $0x58] sm:$0xff] }
 0x248   : > { %3085 = vmatmul.msk.f32.gmra.mxu2 %vm634_vm13, %v706_v45 }
 0x24b   : > { %v997_v48 = vpop.f32.mrf.mxu2 }
 0x24c   : > { %v4059_v5 = vadd.f32 %v997_v48, %v787_v58 }
 0x24e   : > { %v1111_v21 = vmax.f32 %v4073_v13, %v4059_v5 }
 0x253   : > { %v1000_v50 = vpop.f32.mrf.mxu2 }
 0x254   : > { %v4075_v14 = vadd.f32 %v1000_v50, %v792_v59  ;;  %v1109_v59 = vrot.slane %v1108_v52, 1 }
 0x256   : > { %v1112_v25 = vmax.f32 %v1111_v21, %v4075_v14 }
 0x258   : > { %v1113_v32 = vrot.slane %v1112_v25, 4 }
 0x25a   : > { %v1114_v41 = vmax.f32 %v1112_v25, %v1113_v32  ;;  %v4116_v32 = vld [vmem:[%s5299_s9 + $0x8] sm:$0xff] }
 0x25b   : > { %v1003_v53 = vpop.f32.mrf.mxu2 }
 0x25c   : > { %v4079_v16 = vadd.f32 %v1003_v53, %v797_v62  ;;  %v1115_v45 = vrot.slane %v1114_v41, 2  ;;  %v1092_v53 = vmax.f32 %v1090_v40, %v1091_v44  ;;  %v4151_v40 = vld [vmem:[%s5299_s9 + $0x30] sm:$0xff]  ;;  %v4193_v44 = vld [vmem:[%s5299_s9 + $0x60] sm:$0xff] }
 0x25e   : > { %v1116_v54 = vmax.f32 %v1114_v41, %v1115_v45  ;;  %v4158_v41 = vld [vmem:[%s5299_s9 + $0x38] sm:$0xff]  ;;  %v4200_v45 = vld [vmem:[%s5299_s9 + $0x68] sm:$0xff] }
 0x260   : > { %v1117_v62 = vrot.slane %v1116_v54, 1 }
 0x262   : > { %v1118_v20 = vmax.f32 %v1116_v54, %v1117_v62 }
 0x263   : > { %v1006_v56 = vpop.f32.mrf.mxu2 }
 0x264   : > { %v4067_v9 = vadd.f32 %v1006_v56, %v802_v0 }
 0x266   : > { %v1119_v23 = vmax.f32 %v4079_v16, %v4067_v9 }
 0x26b   : > { %v1009_v60 = vpop.f32.mrf.mxu2 }
 0x26c   : > { %v4081_v17 = vadd.f32 %v1009_v60, %v807_v10  ;;  %v1093_v60 = vrot.slane %v1092_v53, 1 }
 0x26e   : > { %v1120_v26 = vmax.f32 %v1119_v23, %v4081_v17  ;;  %v1094_v19 = vmax.f32 %v1092_v53, %v1093_v60 }
 0x270   : > { %v1121_v33 = vrot.slane %v1120_v26, 4  ;;  %v1136_v24 = vsel %vm1135_vm2, %v1094_v19, %v1102_v12 }
 0x272   : > { %v1122_v30 = vmax.f32 %v1120_v26, %v1121_v33  ;;  %v4123_v33 = vld [vmem:[%s5299_s9 + $0x10] sm:$0xff] }
 0x273   : > { %v1012_v18 = vpop.f32.mrf.mxu2 }
 0x274   : > { %v4096_v46 = vadd.f32 %v1012_v18, %v812_v28  ;;  %v1123_v48 = vrot.slane %v1122_v30, 2  ;;  %v1110_v18 = vmax.f32 %v1108_v52, %v1109_v59 }
 0x276   : > { %v1124_v56 = vmax.f32 %v1122_v30, %v1123_v48  ;;  %v1138_v25 = vsel %vm1137_vm3, %v1136_v24, %v1110_v18  ;;  %v4172_v30 = vld [vmem:[%s5299_s9 + $0x48] sm:$0xff]  ;;  %v4214_v48 = vld [vmem:[%s5299_s9 + $0x78] sm:$0xff] }
 0x277   : > { %v1140_v27 = vsel %vm1139_vm4, %v1138_v25, %v1118_v20 }
 0x278   : > { %v1125_v10 = vrot.slane %v1124_v56, 1 }
 0x27a   : > { %v1126_v22 = vmax.f32 %v1124_v56, %v1125_v10 }
 0x27b   : > { %v1015_v35 = vpop.f32.mrf.mxu2 }
 0x27c   : > { %v4094_v39 = vadd.f32 %v1015_v35, %v817_v42  ;;  %v1142_v28 = vsel %vm1141_vm5, %v1140_v27, %v1126_v22  ;;  %v4130_v35 = vld [vmem:[%s5299_s9 + $0x18] sm:$0xff]  ;;  %v4165_v42 = vld [vmem:[%s5299_s9 + $0x40] sm:$0xff] }
 0x27e   : > { %v1127_v50 = vmax.f32 %v4096_v46, %v4094_v39 }
 0x283   : > { %v1018_v3 = vpop.f32.mrf.mxu2 }
 0x284   : > { %v4100_v51 = vadd.f32 %v1018_v3, %v822_v47  ;;  %v4207_v47 = vld [vmem:[%s5299_s9 + $0x70] sm:$0xff]  ;;  %v4221_v3 = vld [vmem:[%s5299_s9 + $0x80] sm:$0xff] }
 0x286   : > { %v1128_v55 = vmax.f32 %v1127_v50, %v4100_v51  ;;  %v4230_v50 = vld [vmem:[%s5299_s9 + $0x88] sm:$0xff] }
 0x287   : > { %5356 = vst [vmem:[#allocation13_spill] sm:$0xff] %v4230_v50 }
 0x288   : > { %v1129_v58 = vrot.slane %v1128_v55, 4 }
 0x28a   : > { %v1130_v0 = vmax.f32 %v1128_v55, %v1129_v58 }
 0x28c   : > { %v1131_v15 = vrot.slane %v1130_v0, 2 }
 0x28e   : > { %v1132_v21 = vmax.f32 %v1130_v0, %v1131_v15 }
 0x290   : > { %v1133_v23 = vrot.slane %v1132_v21, 1 }
 0x292   : > { %v1134_v26 = vmax.f32 %v1132_v21, %v1133_v23 }
 0x294   : > { %v1143_v31 = vsel %vm569_vm0, %v1142_v28, %v1134_v26 }
 0x295   : > { %3086 = vmatpush.msk.msrb.mxu3 %vm1199_vm6, %v1143_v31 }
 0x296   : > { %3087 = vmatmul.msk.f32.vlgmr.msrb.gmra.mxu3 %vm1144_vm7, %v4107_v29 }
 0x29e   : > { %3088 = vmatmul.msk.f32.gmra.mxu3 %vm1144_vm7, %v4116_v32 }
 0x2a6   : > { %3089 = vmatmul.msk.f32.gmra.mxu3 %vm1144_vm7, %v4123_v33 }
 0x2ae   : > { %3090 = vmatmul.msk.f32.gmra.mxu3 %vm1144_vm7, %v4130_v35 }
 0x2b6   : > { %3091 = vmatmul.msk.f32.gmra.mxu3 %vm1144_vm7, %v4137_v36 }
 0x2be   : > { %3092 = vmatmul.msk.f32.gmra.mxu3 %vm1144_vm7, %v4144_v38 }
 0x2c6   : > { %3093 = vmatmul.msk.f32.gmra.mxu3 %vm1144_vm7, %v4151_v40 }
 0x2ce   : > { %3094 = vmatmul.msk.f32.gmra.mxu3 %vm1144_vm7, %v4158_v41 }
 0x2d6   : > { %3095 = vmatmul.msk.f32.gmra.mxu3 %vm1144_vm7, %v4165_v42 }
 0x2de   : > { %3096 = vmatmul.msk.f32.gmra.mxu3 %vm1144_vm7, %v4172_v30 }
 0x2e6   : > { %3097 = vmatmul.msk.f32.gmra.mxu3 %vm1144_vm7, %v4179_v34 }
 0x2ee   : > { %3098 = vmatmul.msk.f32.gmra.mxu3 %vm1144_vm7, %v4186_v43 }
 0x2f6   : > { %3099 = vmatmul.msk.f32.gmra.mxu3 %vm1144_vm7, %v4193_v44 }
 0x2fe   : > { %3100 = vmatmul.msk.f32.gmra.mxu3 %vm1144_vm7, %v4200_v45 }
 0x306   : > { %3101 = vmatmul.msk.f32.gmra.mxu3 %vm1144_vm7, %v4207_v47 }
 0x30e   : > { %3102 = vmatmul.msk.f32.gmra.mxu3 %vm1144_vm7, %v4214_v48 }
 0x316   : > { %3103 = vmatmul.msk.f32.gmra.mxu3 %vm1144_vm7, %v4221_v3 }
 0x319   : > { %v4225_v49 = vpop.f32.mrf.mxu3 }
 0x31e   : > { %3104 = vmatmul.msk.f32.gmra.mxu3 %vm1144_vm7, %v4230_v50 }
 0x321   : > { %v4234_v52 = vpop.f32.mrf.mxu3 }
 0x329   : > { %v4236_v53 = vpop.f32.mrf.mxu3 }
 0x331   : > { %v4238_v54 = vpop.f32.mrf.mxu3 }
 0x339   : > { %v4240_v55 = vpop.f32.mrf.mxu3 }
 0x341   : > { %v1235_v56 = vpop.f32.mrf.mxu3 }
 0x349   : > { %v1238_v57 = vpop.f32.mrf.mxu3 }
 0x351   : > { %v1241_v58 = vpop.f32.mrf.mxu3 }
 0x359   : > { %v1244_v59 = vpop.f32.mrf.mxu3 }
 0x361   : > { %v1247_v60 = vpop.f32.mrf.mxu3 }
 0x369   : > { %v1250_v62 = vpop.f32.mrf.mxu3 }
 0x36a   : > { %v1284_v27 = vsub.f32 %v4059_v5, %v1250_v62  ;;  %v1280_v62 = vsub.f32 %v4063_v7, %v1238_v57 }
 0x36c   : > { %v1304_v7 = vmul.f32 1.442695, %v1280_v62 }
 0x371   : > { %v1253_v0 = vpop.f32.mrf.mxu3 }
 0x372   : > { %v1285_v25 = vsub.f32 %v4075_v14, %v1253_v0 }
 0x379   : > { %v1256_v10 = vpop.f32.mrf.mxu3 }
 0x37a   : > { %v1286_v22 = vsub.f32 %v4079_v16, %v1256_v10  ;;  %v1312_v16 = vmul.f32 1.442695, %v1284_v27  ;;  %v1281_v10 = vsub.f32 %v4051_v63, %v1241_v58  ;;  %v1279_v58 = vsub.f32 %v4057_v4, %v1235_v56 }
 0x37b   : > { %v1277_v4 = vsub.f32 %v4055_v2, %v4238_v54 }
 0x37c   : > { %v1316_v28 = vmul.f32 1.442695, %v1286_v22  ;;  %v1275_v22 = vsub.f32 %v4053_v1, %v4234_v52  ;;  %v1085_v1 = vld [vmem:[%s5300_s10 + $0x8] sm:$0x3f] }
 0x37d   : > { %v1298_v2 = vmul.f32 1.442695, %v1277_v4 }
 0x381   : > { %v1259_v12 = vpop.f32.mrf.mxu3 }
 0x382   : > { %v1287_v20 = vsub.f32 %v4067_v9, %v1259_v12 }
 0x384   : > { %v1318_v26 = vmul.f32 1.442695, %v1287_v20 }
 0x389   : > { %v1262_v15 = vpop.f32.mrf.mxu3 }
 0x38a   : > { %v1288_v18 = vsub.f32 %v4081_v17, %v1262_v15  ;;  %v1283_v17 = vsub.f32 %v4073_v13, %v1247_v60  ;;  %v1314_v15 = vmul.f32 1.442695, %v1285_v25  ;;  %v1294_v25 = vmul.f32 1.442695, %v1275_v22 }
 0x38c   : > { %v1320_v23 = vmul.f32 1.442695, %v1288_v18  ;;  %v1310_v5 = vmul.f32 1.442695, %v1283_v17  ;;  %v1278_v18 = vsub.f32 %v4049_v61, %v4240_v55  ;;  %v1276_v61 = vsub.f32 %v4069_v11, %v4236_v53  ;;  %v1084_v17 = vld [vmem:[%s5300_s10] sm:$0x3f] }
 0x38d   : > { %v1274_v11 = vsub.f32 %v4061_v6, %v4225_v49 }
 0x38e   : > { %v1300_v55 = vmul.f32 1.442695, %v1278_v18  ;;  %v1296_v53 = vmul.f32 1.442695, %v1276_v61  ;;  %v1909_v61 = vld [vmem:[%s5302_s12] sm:$0x7] }
 0x38f   : > { %v1292_v49 = vmul.f32 1.442695, %v1274_v11 }
 0x391   : > { %v1265_v19 = vpop.f32.mrf.mxu3 }
 0x392   : > { %v1289_v21 = vsub.f32 %v4096_v46, %v1265_v19  ;;  %v1282_v46 = vsub.f32 %v4065_v8, %v1244_v59  ;;  %v1306_v59 = vmul.f32 1.442695, %v1281_v10 }
 0x394   : > { %v1322_v24 = vmul.f32 1.442695, %v1289_v21  ;;  %v1308_v60 = vmul.f32 1.442695, %v1282_v46 }
 0x396   : > { %3318 = vpow2.f32 %v1322_v24 }
 0x397   : > { %3320 = vpow2.f32 %v1320_v23 }
 0x398   : > { %3322 = vpow2.f32 %v1318_v26 }
 0x399   : > { %v1268_v31 = vpop.f32.mrf.mxu3  ;;  %3324 = vpow2.f32 %v1316_v28 }
 0x39a   : > { %3326 = vpow2.f32 %v1314_v15  ;;  %v1290_v8 = vsub.f32 %v4094_v39, %v1268_v31 }
 0x39b   : > { %3328 = vpow2.f32 %v1312_v16 }
 0x39c   : > { %v4249_v9 = vpop.eup %3318  ;;  %3330 = vpow2.f32 %v1310_v5  ;;  %v1324_v39 = vmul.f32 1.442695, %v1290_v8 }
 0x39d   : > { %1332 = vmatpush.msra.mxu0 %v4249_v9  ;;  %v4254_v14 = vpop.eup %3320  ;;  %3332 = vpow2.f32 %v1308_v60 }
 0x39e   : > { %v4258_v13 = vpop.eup %3322  ;;  %3334 = vpow2.f32 %v1306_v59 }
 0x39f   : > { %1333 = vmatpush.msra.mxu0 %v4254_v14  ;;  %v4262_v63 = vpop.eup %3324 }
 0x3a0   : > { %v4267_v57 = vpop.eup %3326 }
 0x3a1   : > { %v1271_v0 = vpop.f32.mrf.mxu3  ;;  %1334 = vmatpush.msra.mxu0 %v4258_v13  ;;  %v4272_v20 = vpop.eup %3328 }
 0x3a2   : > { %v1291_v12 = vsub.f32 %v4100_v51, %v1271_v0  ;;  %v1302_v51 = vmul.f32 1.442695, %v1279_v58  ;;  %v4277_v56 = vpop.eup %3330 }
 0x3a3   : > { %1335 = vmatpush.msra.mxu0 %v4262_v63  ;;  %v4282_v21 = vpop.eup %3332 }
 0x3a4   : > { %v1326_v19 = vmul.f32 1.442695, %v1291_v12  ;;  %v4286_v54 = vpop.eup %3334 }
 0x3a5   : > { %1336 = vmatpush.msra.mxu0 %v4267_v57 }
 0x3a6   : > { %3336 = vpow2.f32 %v1326_v19 }
 0x3a7   : > { %3338 = vpow2.f32 %v1304_v7  ;;  %1337 = vmatpush.msra.mxu0 %v4272_v20 }
 0x3a8   : > { %3340 = vpow2.f32 %v1324_v39  ;;  %v3400_v39 = vld [vmem:[%s3671_s23] sm:$0x1f] }
 0x3a9   : > { %1338 = vmatpush.msra.mxu0 %v4277_v56  ;;  %3342 = vpow2.f32 %v1302_v51 }
 0x3aa   : > { %3344 = vpow2.f32 %v1300_v55 }
 0x3ab   : > { %1339 = vmatpush.msra.mxu0 %v4282_v21  ;;  %3346 = vpow2.f32 %v1298_v2 }
 0x3ac   : > { %v4289_v23 = vpop.eup %3336  ;;  %3348 = vpow2.f32 %v1296_v53 }
 0x3ad   : > { %v4293_v24 = vpop.eup %3338  ;;  %1340 = vmatpush.msra.mxu0 %v4286_v54  ;;  %1366 = vmatpush.msra.mxu1 %v4289_v23  ;;  %3350 = vpow2.f32 %v1294_v25 }
 0x3ae   : > { %v4300_v52 = vpop.eup %3340  ;;  %3352 = vpow2.f32 %v1292_v49 }
 0x3af   : > { %1341 = vmatpush.msra.mxu0 %v4293_v24  ;;  %1367 = vmatpush.msra.mxu1 %v4300_v52  ;;  %v4304_v6 = vpop.eup %3342 }
 0x3b0   : > { %3105 = vmatmul.msk.f32.vlgmr.msra.gmra.mxu1 %vm1328_vm8, %v1085_v1  ;;  %v4308_v26 = vpop.eup %3344 }
 0x3b1   : > { %1342 = vmatpush.msra.mxu0 %v4304_v6  ;;  %v4311_v27 = vpop.eup %3346 }
 0x3b2   : > { %v4314_v28 = vpop.eup %3348 }
 0x3b3   : > { %1343 = vmatpush.msra.mxu0 %v4308_v26  ;;  %v4317_v31 = vpop.eup %3350 }
 0x3b4   : > { %v4323_v15 = vpop.eup %3352 }
 0x3b5   : > { %1344 = vmatpush.msra.mxu0 %v4311_v27 }
 0x3b7   : > { %1345 = vmatpush.msra.mxu0 %v4314_v28 }
 0x3b9   : > { %1346 = vmatpush.msra.mxu0 %v4317_v31 }
 0x3bb   : > { %1347 = vmatpush.msra.mxu0 %v4323_v15 }
 0x3bc   : > { %1348 = vmatmul.f32.vlgmr.msra.gmra.mxu0 %v1084_v17 }
 0x42d   : > { %v1369_v46 = vpop.f32.mrf.mxu1 }
 0x439   : > { %v1349_v16 = vpop.f32.mrf.mxu0 }
 0x43a   : > { %v1370_v10 = vadd.f32 %v1369_v46, %v1349_v16 }
 0x43c   : > { %3354 = vrcp.f32 %v1370_v10  ;;  %v1383_v8 = vand.u32 2147483648, %v1370_v10  ;;  %v1381_v0 = vand.u32 2147483647, %v1370_v10  ;;  %vm1377_vm10 = vweird.f32 %v1370_v10 }
 0x43e   : > { %v1384_v12 = vor.u32 1.1754944e-38, %v1383_v8  ;;  %vm1382_vm12 = vcmp.eq.f32.partialorder %v1381_v0, 8.507059e+37 }
 0x442   : > { %v3355_v5 = vpop.eup %3354 }
 0x443   : > { %v1373_v62 = vmul.f32 %v3355_v5, %v1370_v10  ;;  %vm1378_vm9 = vweird.f32 %v3355_v5 }
 0x444   : > { %vm1379_vm11 = vmor %vm1377_vm10, %vm1378_vm9 }
 0x445   : > { %v1374_v60 = vsub.f32 1.0, %v1373_v62 }
 0x447   : > { %v1375_v59 = vmul.f32 %v3355_v5, %v1374_v60 }
 0x449   : > { %v1376_v58 = vadd.f32 %v3355_v5, %v1375_v59 }
 0x44b   : > { %v1380_v7 = vsel %vm1379_vm11, %v3355_v5, %v1376_v58 }
 0x44c   : > { %v1385_v18 = vsel %vm1382_vm12, %v1384_v12, %v1380_v7 }
 0x44d   : > { %3106 = vmatpush.msk.msrb.mxu0 %vm1199_vm6, %v1385_v18 }
 0x44e   : > { %3107 = vmatmul.msk.f32.vlgmr.msrb.gmra.mxu0 %vm1144_vm7, %v4107_v29 }
 0x44f   : > { %3143 = vmatpush.msk.msra.mxu0 %vm569_vm0, %v3400_v39 }
 0x456   : > { %3108 = vmatmul.msk.f32.gmra.mxu0 %vm1144_vm7, %v4116_v32 }
 0x45e   : > { %3109 = vmatmul.msk.f32.gmra.mxu0 %vm1144_vm7, %v4123_v33 }
 0x466   : > { %3110 = vmatmul.msk.f32.gmra.mxu0 %vm1144_vm7, %v4130_v35 }
 0x46e   : > { %3111 = vmatmul.msk.f32.gmra.mxu0 %vm1144_vm7, %v4137_v36 }
 0x476   : > { %3112 = vmatmul.msk.f32.gmra.mxu0 %vm1144_vm7, %v4144_v38 }
 0x47e   : > { %3113 = vmatmul.msk.f32.gmra.mxu0 %vm1144_vm7, %v4151_v40 }
 0x486   : > { %3114 = vmatmul.msk.f32.gmra.mxu0 %vm1144_vm7, %v4158_v41 }
 0x48e   : > { %3115 = vmatmul.msk.f32.gmra.mxu0 %vm1144_vm7, %v4165_v42 }
 0x496   : > { %3116 = vmatmul.msk.f32.gmra.mxu0 %vm1144_vm7, %v4172_v30 }
 0x49e   : > { %3117 = vmatmul.msk.f32.gmra.mxu0 %vm1144_vm7, %v4179_v34 }
 0x4a6   : > { %3118 = vmatmul.msk.f32.gmra.mxu0 %vm1144_vm7, %v4186_v43 }
 0x4ae   : > { %3119 = vmatmul.msk.f32.gmra.mxu0 %vm1144_vm7, %v4193_v44 }
 0x4b6   : > { %3120 = vmatmul.msk.f32.gmra.mxu0 %vm1144_vm7, %v4200_v45 }
 0x4be   : > { %3121 = vmatmul.msk.f32.gmra.mxu0 %vm1144_vm7, %v4207_v47 }
 0x4c6   : > { %3122 = vmatmul.msk.f32.gmra.mxu0 %vm1144_vm7, %v4214_v48 }
 0x4cb   : > { %v4361_v19 = vpop.f32.mrf.mxu0 }
 0x4ce   : > { %3123 = vmatmul.msk.f32.gmra.mxu0 %vm1144_vm7, %v4221_v3 }
 0x4d3   : > { %v4365_v4 = vpop.f32.mrf.mxu0 }
 0x4d6   : > { %3124 = vmatmul.msk.f32.gmra.mxu0 %vm1144_vm7, %v4230_v50 }
 0x4db   : > { %v4369_v51 = vpop.f32.mrf.mxu0 }
 0x4de   : > { %3144 = vmatmul.msk.f32.vlgmr.msra.gmra.mxu0 %vm556_vm1, %v1909_v61 }
 0x4e3   : > { %v1416_v55 = vpop.f32.mrf.mxu0 }
 0x4eb   : > { %v1419_v22 = vpop.f32.mrf.mxu0 }
 0x4f3   : > { %v1422_v2 = vpop.f32.mrf.mxu0 }
 0x4fb   : > { %v1425_v11 = vpop.f32.mrf.mxu0 }
 0x503   : > { %v1428_v53 = vpop.f32.mrf.mxu0 }
 0x50b   : > { %v1431_v1 = vpop.f32.mrf.mxu0 }
 0x513   : > { %v1434_v25 = vpop.f32.mrf.mxu0 }
 0x51b   : > { %v1437_v49 = vpop.f32.mrf.mxu0 }
 0x51c   : > { %v1471_v39 = vmul.f32 %v4272_v20, %v1437_v49  ;;  %v1467_v20 = vmul.f32 %v4293_v24, %v1425_v11 }
 0x523   : > { %v1440_v17 = vpop.f32.mrf.mxu0 }
 0x524   : > { %v1472_v12 = vmul.f32 %v4267_v57, %v1440_v17  ;;  %v1468_v57 = vmul.f32 %v4286_v54, %v1428_v53  ;;  %v1465_v54 = vmul.f32 %v4308_v26, %v1419_v22  ;;  %v1485_v53 = vmul.f32 0.98, %v1467_v20  ;;  %v1516_v26 = vld [vmem:[%s5297_s7 + $0x8] sm:$0xff] }
 0x525   : > { %v1532_v20 = vld [vmem:[%s5297_s7 + $0x88] sm:$0xff] }
 0x52b   : > { %v1443_v46 = vpop.f32.mrf.mxu0 }
 0x52c   : > { %v1473_v59 = vmul.f32 %v4262_v63, %v1443_v46  ;;  %v1489_v46 = vmul.f32 0.98, %v1471_v39 }
 0x52e   : > { %v1491_v37 = vmul.f32 0.98, %v1473_v59 }
 0x530   : > { %v1509_v63 = vadd.f32 0.001, %v1491_v37 }
 0x533   : > { %v1446_v16 = vpop.f32.mrf.mxu0 }
 0x534   : > { %v1474_v60 = vmul.f32 %v4258_v13, %v1446_v16  ;;  %v1490_v16 = vmul.f32 0.98, %v1472_v12 }
 0x536   : > { %v1492_v7 = vmul.f32 0.98, %v1474_v60  ;;  %v1508_v17 = vadd.f32 0.001, %v1490_v16  ;;  %v1515_v16 = vld [vmem:[%s5297_s7] sm:$0xff] }
 0x538   : > { %v1510_v13 = vadd.f32 0.001, %v1492_v7 }
 0x53b   : > { %v1449_v10 = vpop.f32.mrf.mxu0 }
 0x53c   : > { %v1475_v5 = vmul.f32 %v4254_v14, %v1449_v10  ;;  %v1470_v14 = vmul.f32 %v4277_v56, %v1434_v25 }
 0x53e   : > { %v1493_v0 = vmul.f32 0.98, %v1475_v5  ;;  %v1488_v10 = vmul.f32 0.98, %v1470_v14  ;;  %v1507_v5 = vadd.f32 0.001, %v1489_v46 }
 0x53f   : > { %v1524_v46 = vld [vmem:[%s5297_s7 + $0x48] sm:$0xff] }
 0x540   : > { %v1511_v61 = vadd.f32 0.001, %v1493_v0  ;;  %v1506_v37 = vadd.f32 0.001, %v1488_v10  ;;  %v1483_v0 = vmul.f32 0.98, %v1465_v54 }
 0x541   : > { %v1530_v10 = vld [vmem:[%s5297_s7 + $0x78] sm:$0xff] }
 0x543   : > { %v1452_v62 = vpop.f32.mrf.mxu0 }
 0x544   : > { %v1476_v8 = vmul.f32 %v4249_v9, %v1452_v62  ;;  %v1469_v9 = vmul.f32 %v4282_v21, %v1431_v1  ;;  %v1466_v62 = vmul.f32 %v4304_v6, %v1422_v2  ;;  %v1486_v1 = vmul.f32 0.98, %v1468_v57  ;;  %v1526_v57 = vld [vmem:[%s5297_s7 + $0x58] sm:$0xff] }
 0x545   : > { %v1503_v2 = vadd.f32 0.001, %v1485_v53  ;;  %v1546_v53 = vld [vmem:[%s5297_s7 + $0xf8] sm:$0xff] }
 0x546   : > { %v1494_v58 = vmul.f32 0.98, %v1476_v8  ;;  %v1487_v56 = vmul.f32 0.98, %v1469_v9  ;;  %v1504_v11 = vadd.f32 0.001, %v1486_v1 }
 0x547   : > { %v1484_v59 = vmul.f32 0.98, %v1466_v62  ;;  %v1520_v9 = vld [vmem:[%s5297_s7 + $0x28] sm:$0xff] }
 0x548   : > { %v1512_v18 = vadd.f32 0.001, %v1494_v58  ;;  %v1505_v24 = vadd.f32 0.001, %v1487_v56  ;;  %v1538_v56 = vld [vmem:[%s5297_s7 + $0xb8] sm:$0xff]  ;;  %v1540_v62 = vld [vmem:[%s5297_s7 + $0xc8] sm:$0xff] }
 0x549   : > { %v1544_v1 = vld [vmem:[%s5297_s7 + $0xe8] sm:$0xff] }
 0x54a   : > { %1605 = vmatpush.msrb.mxu1 %v1512_v18 }
 0x54b   : > { %v1455_v50 = vpop.f32.mrf.mxu0 }
 0x54c   : > { %1606 = vmatpush.msrb.mxu1 %v1511_v61  ;;  %v1477_v49 = vmul.f32 %v4300_v52, %v1455_v50  ;;  %v1464_v50 = vmul.f32 %v4311_v27, %v1416_v55  ;;  %v1462_v27 = vmul.f32 %v4317_v31, %v4365_v4  ;;  %v1502_v55 = vadd.f32 0.001, %v1484_v59  ;;  %v1547_v59 = vld [vmem:[%s5297_s7 + $0x100] sm:$0xff] }
 0x54e   : > { %1607 = vmatpush.msrb.mxu1 %v1510_v13  ;;  %v1495_v60 = vmul.f32 0.98, %v1477_v49  ;;  %v1482_v58 = vmul.f32 0.98, %v1464_v50  ;;  %v1480_v31 = vmul.f32 0.98, %v1462_v27 }
 0x54f   : > { %v1534_v49 = vld [vmem:[%s5297_s7 + $0x98] sm:$0xff] }
 0x550   : > { %1608 = vmatpush.msrb.mxu1 %v1509_v63  ;;  %v1513_v6 = vadd.f32 0.001, %v1495_v60  ;;  %v1500_v39 = vadd.f32 0.001, %v1482_v58  ;;  %v1522_v63 = vld [vmem:[%s5297_s7 + $0x38] sm:$0xff] }
 0x551   : > { %v5359_v27 = vld [vmem:[#allocation13_spill] sm:$0xff] }
 0x552   : > { %1609 = vmatpush.msrb.mxu1 %v1508_v17  ;;  %v1528_v17 = vld [vmem:[%s5297_s7 + $0x68] sm:$0xff] }
 0x553   : > { %v1458_v25 = vpop.f32.mrf.mxu0 }
 0x554   : > { %v1478_v21 = vmul.f32 %v4289_v23, %v1458_v25  ;;  %1610 = vmatpush.msrb.mxu1 %v1507_v5  ;;  %v1463_v23 = vmul.f32 %v4314_v28, %v4369_v51  ;;  %v1461_v28 = vmul.f32 %v4323_v15, %v4361_v19  ;;  %v1501_v51 = vadd.f32 0.001, %v1483_v0  ;;  %v1518_v15 = vld [vmem:[%s5297_s7 + $0x18] sm:$0xff]  ;;  %v1536_v5 = vld [vmem:[%s5297_s7 + $0xa8] sm:$0xff]  ;;  %v4508_v25 = vpop.permute.xlu2 %1844 }
 0x555   : > { %v1498_v19 = vadd.f32 0.001, %v1480_v31  ;;  %vm1881_vm13 = vcmp.eq.s32.totalorder %v4508_v25, 1 }
 0x556   : > { %v1496_v8 = vmul.f32 0.98, %v1478_v21  ;;  %1611 = vmatpush.msrb.mxu1 %v1506_v37  ;;  %v1481_v7 = vmul.f32 0.98, %v1463_v23  ;;  %v1479_v14 = vmul.f32 0.98, %v1461_v28  ;;  %v4580_v23 = vpop.permute.xlu0 %1841 }
 0x557   : > { %v1542_v37 = vld [vmem:[%s5297_s7 + $0xd8] sm:$0xff]  ;;  %vm1880_vm0 = vcmp.eq.s32.totalorder %v4580_v23, 1 }
 0x558   : > { %v1514_v52 = vadd.f32 0.001, %v1496_v8  ;;  %1612 = vmatpush.msrb.mxu1 %v1505_v24  ;;  %v1499_v61 = vadd.f32 0.001, %v1481_v7  ;;  %v1497_v13 = vadd.f32 0.001, %v1479_v14 }
 0x559   : > { %v1548_v8 = vld [vmem:[%s5297_s7 + $0x108] sm:$0xff] }
 0x55a   : > { %1613 = vmatpush.msrb.mxu1 %v1504_v11  ;;  %1690 = vmatpush.msra.mxu3 %v1514_v52  ;;  %v1550_v11 = vld [vmem:[%s5297_s7 + $0x118] sm:$0xff] }
 0x55b   : > { %v4395_v22 = vpop.f32.mrf.mxu0 }
 0x55c   : > { %5357 = vst [vmem:[#allocation14_spill] sm:$0xff] %v4395_v22  ;;  %1614 = vmatpush.msrb.mxu1 %v1503_v2  ;;  %1691 = vmatpush.msra.mxu3 %v1513_v6  ;;  %v4400_v12 = vclamps-f32 %v4395_v22, 10.0  ;;  %v4519_v21 = vpop.permute.xlu2 %2041 }
 0x55d   : > { %3125 = vmatmul.msk.f32.vlgmr.msra.gmra.mxu3 %vm1328_vm8, %v1516_v26  ;;  %v4584_v26 = vpop.permute.xlu1 %1986  ;;  %vm2051_vm14 = vcmp.eq.s32.totalorder %v4519_v21, 1 }
 0x55e   : > { %5358 = vst [vmem:[#allocation15_spill] sm:$0xff] %v4400_v12  ;;  %1615 = vmatpush.msrb.mxu1 %v1502_v55  ;;  %v2062_v18 = vrot.slane %v4400_v12, 5  ;;  %v1549_v55 = vld [vmem:[%s5297_s7 + $0x110] sm:$0xff] }
 0x560   : > { %1616 = vmatpush.msrb.mxu1 %v1501_v51  ;;  %v2064_v4 = vsel %vm1139_vm4, %v4400_v12, %v2062_v18  ;;  %v4593_v51 = vpop.permute.xlu0 %1838 }
 0x561   : > { %3146 = vmatpush.msk.msrb.mxu0 %vm1199_vm6, %v2064_v4  ;;  %vm1879_vm1 = vcmp.eq.s32.totalorder %v4593_v51, 1 }
 0x562   : > { %1617 = vmatpush.msrb.mxu1 %v1500_v39  ;;  %3147 = vmatmul.msk.f32.vlgmr.msrb.gmra.mxu0 %vm1144_vm7, %v4107_v29  ;;  %v1517_v29 = vld [vmem:[%s5297_s7 + $0x10] sm:$0xff] }
 0x564   : > { %1618 = vmatpush.msrb.mxu1 %v1499_v61  ;;  %v4535_v54 = vpop.permute.xlu2 %2038 }
 0x565   : > { %3126 = vmatmul.msk.f32.gmra.mxu3 %vm1328_vm8, %v1518_v15  ;;  %v4597_v18 = vpop.permute.xlu1 %1981  ;;  %vm2050_vm2 = vcmp.eq.s32.totalorder %v4535_v54, 1 }
 0x566   : > { %1619 = vmatpush.msrb.mxu1 %v1498_v19 }
 0x568   : > { %1620 = vmatpush.msrb.mxu1 %v1497_v13  ;;  %v4601_v61 = vpop.permute.xlu0 %1835 }
 0x569   : > { %1621 = vmatmul.f32.vlgmr.msrb.gmra.mxu1 %v1515_v16  ;;  %vm1878_vm15 = vcmp.eq.s32.totalorder %v4601_v61, 1 }
 0x56a   : > { %3148 = vmatmul.msk.f32.gmra.mxu0 %vm1144_vm7, %v4116_v32  ;;  %v1519_v32 = vld [vmem:[%s5297_s7 + $0x20] sm:$0xff] }
 0x56c   : > { %v4546_v60 = vpop.permute.xlu2 %2035 }
 0x56d   : > { %3127 = vmatmul.msk.f32.gmra.mxu3 %vm1328_vm8, %v1520_v9  ;;  %v4605_v15 = vpop.permute.xlu1 %1976  ;;  %vm2049_vm9 = vcmp.eq.s32.totalorder %v4546_v60, 1 }
 0x570   : > { %v4609_v9 = vpop.permute.xlu0 %1832 }
 0x571   : > { %1624 = vmatmul.f32.gmra.mxu1 %v1517_v29  ;;  %vm1877_vm3 = vcmp.eq.s32.totalorder %v4609_v9, 1 }
 0x572   : > { %3149 = vmatmul.msk.f32.gmra.mxu0 %vm1144_vm7, %v4123_v33  ;;  %v1521_v33 = vld [vmem:[%s5297_s7 + $0x30] sm:$0xff] }
 0x574   : > { %v4561_v24 = vpop.permute.xlu2 %2032 }
 0x575   : > { %3128 = vmatmul.msk.f32.gmra.mxu3 %vm1328_vm8, %v1522_v63  ;;  %vm2048_vm12 = vcmp.eq.s32.totalorder %v4561_v24, 1 }
 0x579   : > { %1627 = vmatmul.f32.gmra.mxu1 %v1519_v32 }
 0x57a   : > { %3150 = vmatmul.msk.f32.gmra.mxu0 %vm1144_vm7, %v4130_v35  ;;  %v1523_v35 = vld [vmem:[%s5297_s7 + $0x40] sm:$0xff] }
 0x57c   : > { %v4582_v2 = vpop.permute.xlu2 %2029 }
 0x57d   : > { %3129 = vmatmul.msk.f32.gmra.mxu3 %vm1328_vm8, %v1524_v46  ;;  %v4615_v46 = vpop.permute.xlu1 %1971 }
 0x581   : > { %1630 = vmatmul.f32.gmra.mxu1 %v1521_v33 }
 0x582   : > { %3151 = vmatmul.msk.f32.gmra.mxu0 %vm1144_vm7, %v4137_v36  ;;  %v1525_v36 = vld [vmem:[%s5297_s7 + $0x50] sm:$0xff] }
 0x584   : > { %v4595_v7 = vpop.permute.xlu2 %2026 }
 0x585   : > { %3130 = vmatmul.msk.f32.gmra.mxu3 %vm1328_vm8, %v1526_v57 }
 0x589   : > { %1633 = vmatmul.f32.gmra.mxu1 %v1523_v35 }
 0x58a   : > { %3152 = vmatmul.msk.f32.gmra.mxu0 %vm1144_vm7, %v4144_v38  ;;  %v1527_v38 = vld [vmem:[%s5297_s7 + $0x60] sm:$0xff] }
 0x58c   : > { %v4603_v14 = vpop.permute.xlu2 %2023 }
 0x58d   : > { %3131 = vmatmul.msk.f32.gmra.mxu3 %vm1328_vm8, %v1528_v17  ;;  %v4619_v17 = vpop.permute.xlu0 %1829 }
 0x58e   : > { %vm1876_vm5 = vcmp.eq.s32.totalorder %v4619_v17, 1 }
 0x591   : > { %1636 = vmatmul.f32.gmra.mxu1 %v1525_v36 }
 0x592   : > { %3153 = vmatmul.msk.f32.gmra.mxu0 %vm1144_vm7, %v4151_v40  ;;  %v1529_v40 = vld [vmem:[%s5297_s7 + $0x70] sm:$0xff] }
 0x594   : > { %v4611_v63 = vpop.permute.xlu2 %2020 }
 0x595   : > { %3132 = vmatmul.msk.f32.gmra.mxu3 %vm1328_vm8, %v1530_v10 }
 0x599   : > { %1639 = vmatmul.f32.gmra.mxu1 %v1527_v38  ;;  %v4623_v38 = vpop.permute.xlu1 %1966 }
 0x59a   : > { %3154 = vmatmul.msk.f32.gmra.mxu0 %vm1144_vm7, %v4158_v41  ;;  %v1531_v41 = vld [vmem:[%s5297_s7 + $0x80] sm:$0xff] }
 0x59c   : > { %v4621_v10 = vpop.permute.xlu2 %1865 }
 0x59d   : > { %3133 = vmatmul.msk.f32.gmra.mxu3 %vm1328_vm8, %v1532_v20 }
 0x5a1   : > { %1642 = vmatmul.f32.gmra.mxu1 %v1529_v40 }
 0x5a2   : > { %3155 = vmatmul.msk.f32.gmra.mxu0 %vm1144_vm7, %v4165_v42  ;;  %v1533_v42 = vld [vmem:[%s5297_s7 + $0x90] sm:$0xff] }
 0x5a5   : > { %3134 = vmatmul.msk.f32.gmra.mxu3 %vm1328_vm8, %v1534_v49 }
 0x5a9   : > { %1645 = vmatmul.f32.gmra.mxu1 %v1531_v41  ;;  %v4627_v41 = vpop.permute.xlu0 %1826 }
 0x5aa   : > { %3156 = vmatmul.msk.f32.gmra.mxu0 %vm1144_vm7, %v4172_v30  ;;  %v1535_v30 = vld [vmem:[%s5297_s7 + $0xa0] sm:$0xff]  ;;  %vm1875_vm11 = vcmp.eq.s32.totalorder %v4627_v41, 1 }
 0x5ad   : > { %3135 = vmatmul.msk.f32.gmra.mxu3 %vm1328_vm8, %v1536_v5  ;;  %v4629_v5 = vpop.permute.xlu2 %2334 }
 0x5b1   : > { %1648 = vmatmul.f32.gmra.mxu1 %v1533_v42  ;;  %v4631_v42 = vpop.permute.xlu1 %1961 }
 0x5b2   : > { %3157 = vmatmul.msk.f32.gmra.mxu0 %vm1144_vm7, %v4179_v34  ;;  %v1537_v34 = vld [vmem:[%s5297_s7 + $0xb0] sm:$0xff] }
 0x5b5   : > { %3136 = vmatmul.msk.f32.gmra.mxu3 %vm1328_vm8, %v1538_v56 }
 0x5b9   : > { %1651 = vmatmul.f32.gmra.mxu1 %v1535_v30 }
 0x5ba   : > { %3158 = vmatmul.msk.f32.gmra.mxu0 %vm1144_vm7, %v4186_v43  ;;  %v1539_v43 = vld [vmem:[%s5297_s7 + $0xc0] sm:$0xff] }
 0x5bd   : > { %3137 = vmatmul.msk.f32.gmra.mxu3 %vm1328_vm8, %v1540_v62 }
 0x5c1   : > { %1654 = vmatmul.f32.gmra.mxu1 %v1537_v34 }
 0x5c2   : > { %3159 = vmatmul.msk.f32.gmra.mxu0 %vm1144_vm7, %v4193_v44  ;;  %v1541_v44 = vld [vmem:[%s5297_s7 + $0xd0] sm:$0xff] }
 0x5c5   : > { %3138 = vmatmul.msk.f32.gmra.mxu3 %vm1328_vm8, %v1542_v37 }
 0x5c9   : > { %1657 = vmatmul.f32.gmra.mxu1 %v1539_v43 }
 0x5ca   : > { %3160 = vmatmul.msk.f32.gmra.mxu0 %vm1144_vm7, %v4200_v45  ;;  %v1543_v45 = vld [vmem:[%s5297_s7 + $0xe0] sm:$0xff] }
 0x5cd   : > { %3139 = vmatmul.msk.f32.gmra.mxu3 %vm1328_vm8, %v1544_v1 }
 0x5d1   : > { %1660 = vmatmul.f32.gmra.mxu1 %v1541_v44 }
 0x5d2   : > { %3161 = vmatmul.msk.f32.gmra.mxu0 %vm1144_vm7, %v4207_v47  ;;  %v1545_v47 = vld [vmem:[%s5297_s7 + $0xf0] sm:$0xff] }
 0x5d5   : > { %3140 = vmatmul.msk.f32.gmra.mxu3 %vm1328_vm8, %v1546_v53 }
 0x5d9   : > { %1663 = vmatmul.f32.gmra.mxu1 %v1543_v45  ;;  %v4635_v45 = vpop.permute.xlu0 %1823 }
 0x5da   : > { %3162 = vmatmul.msk.f32.gmra.mxu0 %vm1144_vm7, %v4214_v48 }
 0x5dd   : > { %3141 = vmatmul.msk.f32.gmra.mxu3 %vm1328_vm8, %v1548_v8  ;;  %v4637_v8 = vpop.permute.xlu2 %1856 }
 0x5df   : > { %v4563_v50 = vpop.f32.mrf.mxu0 }
 0x5e0   : > { %v4565_v52 = vpop.f32.mrf.mxu3 }
 0x5e1   : > { %1666 = vmatmul.f32.gmra.mxu1 %v1545_v47 }
 0x5e2   : > { %3163 = vmatmul.msk.f32.gmra.mxu0 %vm1144_vm7, %v4221_v3 }
 0x5e5   : > { %3142 = vmatmul.msk.f32.gmra.mxu3 %vm1328_vm8, %v1550_v11 }
 0x5e6   : > { %v4573_v48 = vpop.f32.mrf.mxu1 }
 0x5e7   : > { %v4578_v0 = vpop.f32.mrf.mxu0 }
 0x5e8   : > { %v1696_v6 = vpop.f32.mrf.mxu3 }
 0x5e9   : > { %1669 = vmatmul.f32.gmra.mxu1 %v1547_v59 }
 0x5ea   : > { %3164 = vmatmul.msk.f32.gmra.mxu0 %vm1144_vm7, %v5359_v27  ;;  %v4639_v27 = vpop.permute.xlu1 %1956 }
 0x5ee   : > { %v1625_v3 = vpop.f32.mrf.mxu1 }
 0x5ef   : > { %v4591_v58 = vpop.f32.mrf.mxu0 }
 0x5f0   : > { %v1699_v28 = vpop.f32.mrf.mxu3 }
 0x5f1   : > { %1672 = vmatmul.f32.gmra.mxu1 %v1549_v55 }
 0x5f2   : > { %v1952_v54 = vpop.permute.xlu1 %1951 }
 0x5f6   : > { %v1628_v39 = vpop.f32.mrf.mxu1 }
 0x5f7   : > { %v4599_v31 = vpop.f32.mrf.mxu0  ;;  %v1700_v22 = vadd.f32 %v1699_v28, %v1628_v39 }
 0x5f8   : > { %v1702_v4 = vpop.f32.mrf.mxu3 }
 0x5f9   : > { %v1749_v28 = vmul.f32 20.0, %v1700_v22  ;;  %v1821_v22 = vpop.permute.xlu0 %1820 }
 0x5fe   : > { %v1631_v19 = vpop.f32.mrf.mxu1 }
 0x5ff   : > { %v4607_v13 = vpop.f32.mrf.mxu0  ;;  %v1703_v47 = vadd.f32 %v1702_v4, %v1631_v19  ;;  %v1694_v19 = vadd.f32 %v4565_v52, %v4573_v48 }
 0x600   : > { %v1705_v16 = vpop.f32.mrf.mxu3 }
 0x601   : > { %v1747_v61 = vmul.f32 20.0, %v1694_v19 }
 0x603   : > { %v1765_v21 = vadd.f32 -10.0, %v1747_v61 }
 0x606   : > { %v1634_v29 = vpop.f32.mrf.mxu1 }
 0x607   : > { %v4613_v32 = vpop.f32.mrf.mxu0  ;;  %v1706_v44 = vadd.f32 %v1705_v16, %v1634_v29  ;;  %v1750_v29 = vmul.f32 20.0, %v1703_v47 }
 0x608   : > { %v1708_v33 = vpop.f32.mrf.mxu3 }
 0x60e   : > { %v1637_v57 = vpop.f32.mrf.mxu1 }
 0x60f   : > { %v4617_v35 = vpop.f32.mrf.mxu0  ;;  %v1709_v43 = vadd.f32 %v1708_v33, %v1637_v57  ;;  %v1697_v33 = vadd.f32 %v1696_v6, %v1625_v3  ;;  %v1768_v3 = vadd.f32 -10.0, %v1750_v29 }
 0x610   : > { %v1711_v36 = vpop.f32.mrf.mxu3 }
 0x611   : > { %v1752_v11 = vmul.f32 20.0, %v1709_v43  ;;  %v1748_v6 = vmul.f32 20.0, %v1697_v33 }
 0x613   : > { %v1770_v57 = vadd.f32 -10.0, %v1752_v11 }
 0x615   : > { %v4656_v51 = vsel %vm1878_vm15, 10.0, %v1770_v57  ;;  %vm1873_vm15 = vcmp.eq.s32.totalorder %v1821_v22, 1  ;;  %v4722_v57 = vld [vmem:[%s5301_s11] sm:$0x7] }
 0x616   : > { %v1640_v20 = vpop.f32.mrf.mxu1  ;;  %v1994_v9 = vadd.f32 %v4615_v46, %v4656_v51  ;;  %v3520_v46 = vmov 1.0  }
 0x617   : > { %v4625_v40 = vpop.f32.mrf.mxu0  ;;  %v1712_v30 = vadd.f32 %v1711_v36, %v1640_v20  ;;  %v1751_v36 = vmul.f32 20.0, %v1706_v44 }
 0x618   : > { %v1714_v49 = vpop.f32.mrf.mxu3 }
 0x619   : > { %v1753_v53 = vmul.f32 20.0, %v1712_v30  ;;  %v1769_v39 = vadd.f32 -10.0, %v1751_v36 }
 0x61b   : > { %v1771_v20 = vadd.f32 -10.0, %v1753_v53  ;;  %v4670_v44 = vsel %vm1877_vm3, 10.0, %v1769_v39 }
 0x61c   : > { %5360 = vst [vmem:[#allocation13_spill] sm:$0xff] %v4670_v44  ;;  %v1993_v17 = vadd.f32 %v4623_v38, %v4670_v44 }
 0x61e   : > { %v1643_v56 = vpop.f32.mrf.mxu1 }
 0x61f   : > { %v1715_v62 = vadd.f32 %v1714_v49, %v1643_v56  ;;  %v4633_v34 = vpop.f32.mrf.mxu0 }
 0x620   : > { %v1717_v37 = vpop.f32.mrf.mxu3 }
 0x621   : > { %v1754_v1 = vmul.f32 20.0, %v1715_v62  ;;  %v4649_v62 = vsel %vm1879_vm1, 10.0, %v1771_v20  ;;  %vm1874_vm1 = vcmp.eq.s32.totalorder %v4635_v45, 1 }
 0x622   : > { %v1995_v25 = vadd.f32 %v4605_v15, %v4649_v62 }
 0x623   : > { %v1772_v59 = vadd.f32 -10.0, %v1754_v1  ;;  %v1767_v1 = vadd.f32 -10.0, %v1749_v28 }
 0x625   : > { %v4644_v30 = vsel %vm1880_vm0, 10.0, %v1772_v59  ;;  %v4680_v59 = vsel %vm1876_vm5, 10.0, %v1768_v3  ;;  %v4687_v36 = vsel %vm1875_vm11, 10.0, %v1767_v1  ;;  %vm2045_vm5 = vcmp.eq.s32.totalorder %v4603_v14, 1 }
 0x626   : > { %v1646_v55 = vpop.f32.mrf.mxu1  ;;  %v1996_v23 = vadd.f32 %v4597_v18, %v4644_v30  ;;  %v4668_v18 = vpop.permute.xlu2 %2319  ;;  %5361 = vst [vmem:[#allocation16_spill] sm:$0xff] %v4680_v59  ;;  %v1992_v60 = vadd.f32 %v4631_v42, %v4680_v59  ;;  %v1991_v24 = vadd.f32 %v4639_v27, %v4687_v36 }
 0x627   : > { %v1718_v49 = vadd.f32 %v1717_v37, %v1646_v55  ;;  %v2112_v56 = vpop.f32.mrf.mxu0  ;;  %v2058_v55 = vsel %vm2049_vm9, 1e+09, %v1995_v25  ;;  %5362 = vst [vmem:[#allocation17_spill] sm:$0xff] %v4687_v36  ;;  %v1947_v27 = vpop.permute.xlu0 %1946 }
 0x628   : > { %v4642_v16 = vpop.f32.mrf.mxu3  ;;  %v2059_v47 = vsel %vm2050_vm2, 1e+09, %v1996_v23  ;;  %vm2046_vm2 = vcmp.eq.s32.totalorder %v4595_v7, 1  ;;  %v2018_v56 = vpop.permute.xlu1 %2017  ;;  %v2054_v33 = vsel %vm2045_vm5, 1e+09, %v1991_v24 }
 0x629   : > { %v1755_v4 = vmul.f32 20.0, %v1718_v49  ;;  %vm2137_vm0 = vcmp.ge.f32.partialorder %v4625_v40, %v2059_v47  ;;  %v4702_v40 = vsel %vm1873_vm15, 10.0, %v1765_v21  ;;  %v2055_v45 = vsel %vm2046_vm2, 1e+09, %v1992_v60 }
 0x62a   : > { %5364 = vst [vmem:[#allocation19_spill] sm:$0xff] %v4702_v40  ;;  %v1989_v7 = vadd.f32 %v1947_v27, %v4702_v40  ;;  %vm2133_vm11 = vcmp.ge.f32.partialorder %v4599_v31, %v2055_v45 }
 0x62b   : > { %v1773_v37 = vadd.f32 -10.0, %v1755_v4 }
 0x62d   : > { %v4658_v43 = vsel %vm1881_vm13, 10.0, %v1773_v37  ;;  %vm2047_vm13 = vcmp.eq.s32.totalorder %v4582_v2, 1 }
 0x62e   : > { %v4664_v52 = vpop.f32.mrf.mxu1  ;;  %v1997_v48 = vadd.f32 %v4584_v26, %v4658_v43  ;;  %v1766_v26 = vadd.f32 -10.0, %v1748_v6  ;;  %v2056_v41 = vsel %vm2047_vm13, 1e+09, %v1993_v17  ;;  %v4709_v49 = vpop.permute.xlu2 %1847  ;;  %vm2157_vm13 = vcmask 588800  }
 0x62f   : > { %v2114_v53 = vpop.f32.mrf.mxu0  ;;  %vm2134_vm9 = vcmp.ge.f32.partialorder %v4607_v13, %v2056_v41 }
 0x630   : > { %v2060_v15 = vsel %vm2051_vm14, 1e+09, %v1997_v48  ;;  %v4677_v11 = vpop.f32.mrf.mxu3  ;;  %v4694_v38 = vsel %vm1874_vm1, 10.0, %v1766_v26  ;;  %vm2136_vm14 = vcmp.ge.f32.partialorder %v4617_v35, %v2058_v55 }
 0x631   : > { %vm2138_vm10 = vcmp.ge.f32.partialorder %v4633_v34, %v2060_v15  ;;  %v2057_v34 = vsel %vm2048_vm12, 1e+09, %v1994_v9  ;;  %5363 = vst [vmem:[#allocation18_spill] sm:$0xff] %v4694_v38  ;;  %v1990_v2 = vadd.f32 %v1952_v54, %v4694_v38  ;;  %vm2043_vm12 = vcmp.eq.s32.totalorder %v2018_v56, 1  ;;  %v1863_v54 = vpop.permute.xlu1 %1862 }
 0x632   : > { %3174 = vmatpush.msk.msra.mxu1 %vm2138_vm10, %v3520_v46  ;;  %vm2135_vm3 = vcmp.ge.f32.partialorder %v4613_v32, %v2057_v34  ;;  %vm2044_vm10 = vcmp.eq.s32.totalorder %v4611_v63, 1  ;;  %v2052_v14 = vsel %vm2043_vm12, 1e+09, %v1989_v7  ;;  %vm1887_vm2 = vcmp.eq.s32.totalorder %v1863_v54, 1  ;;  %v3403_v54 = vld [vmem:[%s5299_s9 + $0x10] sm:$0xff] }
 0x633   : > { %v2053_v32 = vsel %vm2044_vm10, 1e+09, %v1990_v2 }
 0x634   : > { %3175 = vmatpush.msk.msra.mxu1 %vm2137_vm0, %v3520_v46  ;;  %vm2132_vm0 = vcmp.ge.f32.partialorder %v4591_v58, %v2054_v33  ;;  %vm2131_vm1 = vcmp.ge.f32.partialorder %v4578_v0, %v2053_v32  ;;  %v4733_v0 = vpop.permute.xlu0 %2339 }
 0x636   : > { %v4699_v20 = vpop.f32.mrf.mxu1  ;;  %3176 = vmatpush.msk.msra.mxu1 %vm2136_vm14, %v3520_v46  ;;  %vm2130_vm14 = vcmp.ge.f32.partialorder %v4563_v50, %v2052_v14  ;;  %v4727_v58 = vpop.permute.xlu2 %2299 }
 0x637   : > { %v2116_v42 = vpop.f32.mrf.mxu0 }
 0x638   : > { %3177 = vmatpush.msk.msra.mxu1 %vm2135_vm3, %v3520_v46  ;;  %v4706_v35 = vpop.f32.mrf.mxu3  ;;  %vm1888_vm3 = vcmp.eq.s32.totalorder %v4621_v10, 1 }
 0x639   : > { %v4750_v32 = vpop.permute.xlu1 %2329 }
 0x63a   : > { %3178 = vmatpush.msk.msra.mxu1 %vm2134_vm9, %v3520_v46 }
 0x63c   : > { %3179 = vmatpush.msk.msra.mxu1 %vm2133_vm11, %v3520_v46  ;;  %v1860_v3 = vpop.permute.xlu0 %1859 }
 0x63d   : > { %vm1886_vm15 = vcmp.eq.s32.totalorder %v1860_v3, 1 }
 0x63e   : > { %v4716_v29 = vpop.f32.mrf.mxu1  ;;  %3180 = vmatpush.msk.msra.mxu1 %vm2132_vm0, %v3520_v46  ;;  %v4735_v28 = vpop.permute.xlu2 %2284 }
 0x63f   : > { %v2118_v13 = vpop.f32.mrf.mxu0 }
 0x640   : > { %3181 = vmatpush.msk.msra.mxu1 %vm2131_vm1, %v3520_v46  ;;  %v4724_v31 = vpop.f32.mrf.mxu3 }
 0x641   : > { %v4754_v13 = vpop.permute.xlu1 %1853 }
 0x642   : > { %3182 = vmatpush.msk.msra.mxu1 %vm2130_vm14, %v3520_v46 }
 0x643   : > { %3183 = vmatmul.msk.f32.vlgmr.msra.gmra.mxu1 %vm2157_vm13, %v4722_v57 }
 0x646   : > { %v4731_v63 = vpop.f32.mrf.mxu1  ;;  %v4739_v61 = vpop.permute.xlu2 %2269 }
 0x647   : > { %v2120_v4 = vpop.f32.mrf.mxu0  ;;  %5365 = vst [vmem:[#allocation20_spill] sm:$0xff] %v4739_v61 }
 0x648   : > { %v1732_v19 = vpop.f32.mrf.mxu3 }
 0x64e   : > { %v1661_v39 = vpop.f32.mrf.mxu1  ;;  %v4743_v21 = vpop.permute.xlu2 %1871 }
 0x64f   : > { %v1733_v37 = vadd.f32 %v1732_v19, %v1661_v39  ;;  %v2122_v23 = vpop.f32.mrf.mxu0  ;;  %5366 = vst [vmem:[#allocation21_spill] sm:$0xff] %v4743_v21 }
 0x650   : > { %v1735_v6 = vpop.f32.mrf.mxu3 }
 0x651   : > { %v1760_v50 = vmul.f32 20.0, %v1733_v37  ;;  %v4758_v37 = vpop.permute.xlu0 %2324 }
 0x653   : > { %v1778_v22 = vadd.f32 -10.0, %v1760_v50  ;;  %v3401_v50 = vld [vmem:[%s5299_s9] sm:$0xff] }
 0x655   : > { %v4737_v25 = vsel %vm1886_vm15, 10.0, %v1778_v22 }
 0x656   : > { %v1664_v48 = vpop.f32.mrf.mxu1  ;;  %v1869_v56 = vpop.permute.xlu2 %1868 }
 0x657   : > { %v1736_v1 = vadd.f32 %v1735_v6, %v1664_v48  ;;  %v2124_v53 = vpop.f32.mrf.mxu0  ;;  %vm1889_vm5 = vcmp.eq.s32.totalorder %v1869_v56, 1  ;;  %v4761_v6 = vpop.permute.xlu1 %2314 }
 0x658   : > { %v1738_v47 = vpop.f32.mrf.mxu3 }
 0x659   : > { %v1761_v9 = vmul.f32 20.0, %v1736_v1  ;;  %v4770_v22 = vpop.permute.xlu0 %1850  ;;  %v3402_v1 = vld [vmem:[%s5299_s9 + $0x8] sm:$0xff] }
 0x65b   : > { %v1779_v15 = vadd.f32 -10.0, %v1761_v9 }
 0x65d   : > { %v4741_v26 = vsel %vm1887_vm2, 10.0, %v1779_v15 }
 0x65e   : > { %v1667_v17 = vpop.f32.mrf.mxu1 }
 0x65f   : > { %v1739_v55 = vadd.f32 %v1738_v47, %v1667_v17  ;;  %v2126_v46 = vpop.f32.mrf.mxu0  ;;  %v4772_v48 = vpop.permute.xlu1 %2304  ;;  %v3404_v47 = vld [vmem:[%s5299_s9 + $0x18] sm:$0xff] }
 0x660   : > { %v1741_v24 = vpop.f32.mrf.mxu3 }
 0x661   : > { %v1762_v60 = vmul.f32 20.0, %v1739_v55  ;;  %v4778_v53 = vpop.permute.xlu0 %2309  ;;  %v3405_v55 = vld [vmem:[%s5299_s9 + $0x20] sm:$0xff] }
 0x663   : > { %v1780_v34 = vadd.f32 -10.0, %v1762_v60 }
 0x665   : > { %v4746_v41 = vsel %vm1888_vm3, 10.0, %v1780_v34  ;;  %v3406_v34 = vld [vmem:[%s5299_s9 + $0x28] sm:$0xff] }
 0x666   : > { %v1670_v42 = vpop.f32.mrf.mxu1 }
 0x667   : > { %v1742_v2 = vadd.f32 %v1741_v24, %v1670_v42  ;;  %v2128_v45 = vpop.f32.mrf.mxu0  ;;  %v4784_v9 = vpop.permute.xlu1 %2289 }
 0x669   : > { %v1763_v27 = vmul.f32 20.0, %v1742_v2  ;;  %v4790_v15 = vpop.permute.xlu0 %2294  ;;  %v3407_v2 = vld [vmem:[%s5299_s9 + $0x30] sm:$0xff] }
 0x66b   : > { %v1781_v7 = vadd.f32 -10.0, %v1763_v27  ;;  %v3408_v27 = vld [vmem:[%s5299_s9 + $0x38] sm:$0xff] }
 0x66d   : > { %v4748_v33 = vsel %vm1889_vm5, 10.0, %v1781_v7  ;;  %v1021_v7 = vpop.f32.mrf.mxu2 }
 0x66e   : > { %5367 = vst [vmem:[#allocation22_spill] sm:$0xff] %v4748_v33  ;;  %v4752_v14 = vpop.f32.mrf.mxu1 }
 0x66f   : > { %v4792_v17 = vpop.permute.xlu1 %2274 }
 0x671   : > { %v4798_v46 = vpop.permute.xlu0 %2279 }
 0x677   : > { %v4800_v60 = vpop.permute.xlu1 %866 }
 0x679   : > { %v4806_v24 = vpop.permute.xlu0 %2264 }
 0x67a   : > { %5369 = vst [vmem:[#allocation24_spill] sm:$0xff] %v4806_v24 }
 0x67f   : > { %v4808_v42 = vpop.permute.xlu1 %861 }
 0x681   : > { %v4814_v45 = vpop.permute.xlu0 %2349 }
 0x682   : > { %5370 = vst [vmem:[#allocation25_spill] sm:$0xff] %v4814_v45 }
 0x687   : > { %v4820_v56 = vpop.permute.xlu1 %856 }
 0x6c0   : > { %v2178_v4 = vpop.f32.mrf.mxu1 }
 0x6c1   : > { %v3184_v10 = vadd.f32 -1.0, %v2178_v4  ;;  %v3409_v4 = vld [vmem:[%s5299_s9 + $0x40] sm:$0xff] }
 0x6c3   : > { %v2182_v19 = vmax.f32 %v3184_v10, 0.0  ;;  %v4826_v10 = vpop.permute.xlu0 %2344 }
 0x6c4   : > { %5371 = vst [vmem:[#allocation26_spill] sm:$0xff] %v4826_v10 }
 0x6c5   : > { %v4756_v39 = vmin.f32 %v2182_v19, 19.0  ;;  %v842_v19 = vpop.permute.xlu1 %841 }
 0x6c7   : > { %5368 = vst [vmem:[#allocation23_spill] sm:$0xff] %v4756_v39  ;;  %v2185_v23 = vrot.slane %v4756_v39, 5 }
 0x6c9   : > { %v2187_v3 = vsel %vm1139_vm4, %v4756_v39, %v2185_v23  ;;  %v1024_v23 = vpop.f32.mrf.mxu2 }
 0x6ca   : > { %3185 = vmatpush.msk.msrb.mxu1 %vm1199_vm6, %v2187_v3  ;;  %v3410_v3 = vld [vmem:[%s5299_s9 + $0x48] sm:$0xff] }
 0x6cb   : > { %3186 = vmatmul.msk.f32.vlgmr.msrb.gmra.mxu1 %vm1144_vm7, %v3401_v50  ;;  %v847_v50 = vpop.permute.xlu0 %846 }
 0x6d3   : > { %3187 = vmatmul.msk.f32.gmra.mxu1 %vm1144_vm7, %v3402_v1  ;;  %v827_v1 = vpop.permute.xlu1 %826 }
 0x6db   : > { %3188 = vmatmul.msk.f32.gmra.mxu1 %vm1144_vm7, %v3403_v54  ;;  %v1022_v54 = vadd.f32 %v1021_v7, %v827_v1 }
 0x6e3   : > { %3189 = vmatmul.msk.f32.gmra.mxu1 %vm1144_vm7, %v3404_v47  ;;  %v3411_v47 = vld [vmem:[%s5299_s9 + $0x50] sm:$0xff] }
 0x6eb   : > { %3190 = vmatmul.msk.f32.gmra.mxu1 %vm1144_vm7, %v3405_v55  ;;  %v1027_v55 = vpop.f32.mrf.mxu2 }
 0x6f3   : > { %3191 = vmatmul.msk.f32.gmra.mxu1 %vm1144_vm7, %v3406_v34  ;;  %v2603_v34 = vand.u32 2147483647, %v1022_v54  ;;  %v1030_v12 = vpop.f32.mrf.mxu2 }
 0x6f4   : > { %v4854_v38 = vadd.f32 %v1030_v12, %v842_v19 }
 0x6fb   : > { %3192 = vmatmul.msk.f32.gmra.mxu1 %vm1144_vm7, %v3407_v2  ;;  %v832_v2 = vpop.permute.xlu0 %831  ;;  %v1033_v21 = vpop.f32.mrf.mxu2 }
 0x6fc   : > { %v4836_v39 = vadd.f32 %v1024_v23, %v832_v2 }
 0x6fe   : > { %v2604_v1 = vand.u32 2147483647, %v4836_v39 }
 0x700   : > { %v2613_v33 = vsub.f32 0.0, %v2604_v1 }
 0x702   : > { %v2623_v2 = vmul.f32 1.442695, %v2613_v33  ;;  %v2606_v33 = vand.u32 2147483647, %v4854_v38 }
 0x703   : > { %3193 = vmatmul.msk.f32.gmra.mxu1 %vm1144_vm7, %v3408_v27  ;;  %v852_v27 = vpop.permute.xlu2 %851 }
 0x704   : > { %v2615_v36 = vsub.f32 0.0, %v2606_v33 }
 0x706   : > { %v2627_v19 = vmul.f32 1.442695, %v2615_v36 }
 0x70b   : > { %3194 = vmatmul.msk.f32.gmra.mxu1 %vm1144_vm7, %v3409_v4  ;;  %v2612_v4 = vsub.f32 0.0, %v2603_v34  ;;  %v837_v23 = vpop.permute.xlu2 %836 }
 0x70c   : > { %v4847_v34 = vadd.f32 %v1027_v55, %v837_v23  ;;  %v1036_v23 = vpop.f32.mrf.mxu2 }
 0x70d   : > { %v2621_v7 = vmul.f32 1.442695, %v2612_v4 }
 0x70f   : > { %3356 = vpow2.f32 %v2621_v7  ;;  %v3414_v7 = vld [vmem:[%s5299_s9 + $0x68] sm:$0xff] }
 0x710   : > { %3358 = vpow2.f32 %v2623_v2 }
 0x713   : > { %3195 = vmatmul.msk.f32.gmra.mxu1 %vm1144_vm7, %v3410_v3  ;;  %v3412_v3 = vld [vmem:[%s5299_s9 + $0x58] sm:$0xff] }
 0x715   : > { %v3357_v40 = vpop.eup %3356 }
 0x716   : > { %v2639_v4 = vadd.f32 1.0, %v3357_v40  ;;  %v3415_v40 = vld [vmem:[%s5299_s9 + $0x70] sm:$0xff] }
 0x718   : > { %3360 = vlog2.f32 %v2639_v4  ;;  %v2594_v4 = vmax.f32 %v1022_v54, 0.0 }
 0x71b   : > { %3196 = vmatmul.msk.f32.gmra.mxu1 %vm1144_vm7, %v3411_v47  ;;  %v3413_v47 = vld [vmem:[%s5299_s9 + $0x60] sm:$0xff] }
 0x723   : > { %3197 = vmatmul.msk.f32.gmra.mxu1 %vm1144_vm7, %v3412_v3  ;;  %v2605_v3 = vand.u32 2147483647, %v4847_v34 }
 0x725   : > { %v2614_v1 = vsub.f32 0.0, %v2605_v3 }
 0x727   : > { %v2625_v55 = vmul.f32 1.442695, %v2614_v1 }
 0x729   : > { %3362 = vpow2.f32 %v2625_v55 }
 0x72b   : > { %3198 = vmatmul.msk.f32.gmra.mxu1 %vm1144_vm7, %v3413_v47  ;;  %v3359_v47 = vpop.eup %3358 }
 0x72c   : > { %v2640_v10 = vadd.f32 1.0, %v3359_v47  ;;  %v3361_v2 = vpop.eup %3360  ;;  %v3416_v47 = vld [vmem:[%s5299_s9 + $0x78] sm:$0xff] }
 0x72d   : > { %v2649_v12 = vmul.f32 0.6931472, %v3361_v2 }
 0x72e   : > { %3364 = vlog2.f32 %v2640_v10 }
 0x72f   : > { %v3363_v1 = vpop.eup %3362  ;;  %v2666_v45 = vadd.f32 %v2649_v12, %v2594_v4  ;;  %3366 = vpow2.f32 %v2627_v19  ;;  %v2595_v12 = vmax.f32 %v4836_v39, 0.0  ;;  %v5373_v19 = vmov 0.0  }
 0x730   : > { %v2641_v10 = vadd.f32 1.0, %v3363_v1 }
 0x732   : > { %3368 = vlog2.f32 %v2641_v10 }
 0x733   : > { %3199 = vmatmul.msk.f32.gmra.mxu1 %vm1144_vm7, %v3414_v7  ;;  %v4861_v7 = vadd.f32 %v1033_v21, %v847_v50  ;;  %v4868_v21 = vadd.f32 %v1036_v23, %v852_v27  ;;  %v2675_v50 = vadd.f32 0.001, %v2666_v45 }
 0x734   : > { %v3365_v59 = vpop.eup %3364 }
 0x735   : > { %v2607_v3 = vand.u32 2147483647, %v4861_v7  ;;  %v2651_v36 = vmul.f32 0.6931472, %v3365_v59  ;;  %v2608_v2 = vand.u32 2147483647, %v4868_v21  ;;  %v3367_v27 = vpop.eup %3366 }
 0x736   : > { %v3417_v59 = vld [vmem:[%s5299_s9 + $0x80] sm:$0xff]  ;;  %v2642_v10 = vadd.f32 1.0, %v3367_v27 }
 0x737   : > { %v2616_v55 = vsub.f32 0.0, %v2607_v3  ;;  %v2667_v23 = vadd.f32 %v2651_v36, %v2595_v12  ;;  %v2617_v39 = vsub.f32 0.0, %v2608_v2  ;;  %v2596_v12 = vmax.f32 %v4847_v34, 0.0 }
 0x739   : > { %v2629_v54 = vmul.f32 1.442695, %v2616_v55 }
 0x73b   : > { %3200 = vmatmul.msk.f32.gmra.mxu1 %vm1144_vm7, %v3415_v40  ;;  %v1039_v40 = vpop.f32.mrf.mxu2  ;;  %3370 = vpow2.f32 %v2629_v54  ;;  %v3418_v54 = vld [vmem:[%s5299_s9 + $0x88] sm:$0xff] }
 0x73c   : > { %v4890_v1 = vadd.f32 %v1039_v40, %v4820_v56  ;;  %3372 = vlog2.f32 %v2642_v10 }
 0x743   : > { %3201 = vmatmul.msk.f32.gmra.mxu1 %vm1144_vm7, %v3416_v47 }
 0x748   : > { %v4870_v33 = vpop.f32.mrf.mxu1 }
 0x749   : > { %5372 = vst [vmem:[#allocation27_spill] sm:$0xff] %v4870_v33  ;;  %vm2352_vm6 = vcmp.eq.f32.partialorder %v4806_v24, %v4870_v33  ;;  %v3242_v47 = vadd.f32 -1.0, %v4870_v33  ;;  %v2676_v33 = vadd.f32 0.001, %v2667_v23 }
 0x74a   : > { %v4878_v3 = vsel %vm2352_vm6, 1.0, %v5373_v19 }
 0x74b   : > { %5374 = vst [vmem:[#allocation28_spill] sm:$0xff] %v4878_v3  ;;  %vm2693_vm9 = vcmp.eq.f32.partialorder %v4806_v24, %v3242_v47  ;;  %3202 = vmatmul.msk.f32.gmra.mxu1 %vm1144_vm7, %v3417_v59  ;;  %v4886_v45 = vmul.f32 %v4878_v3, %v2675_v50  ;;  %v1042_v47 = vpop.f32.mrf.mxu2  ;;  %v3369_v24 = vpop.eup %3368  ;;  %v2631_v59 = vmul.f32 1.442695, %v2617_v39  ;;  %v2609_v3 = vand.u32 2147483647, %v4890_v1 }
 0x74c   : > { %v3251_v4 = vsel %vm2693_vm9, 1.0, %v5373_v19  ;;  %v3371_v40 = vpop.eup %3370 }
 0x74d   : > { %v4892_v55 = vmul.f32 %v3251_v4, %v2675_v50  ;;  %v2653_v50 = vmul.f32 0.6931472, %v3369_v24  ;;  %3374 = vpow2.f32 %v2631_v59  ;;  %v2618_v23 = vsub.f32 0.0, %v2609_v3 }
 0x74e   : > { %v4914_v4 = vadd.f32 %v1042_v47, %v4808_v42  ;;  %v2643_v39 = vadd.f32 1.0, %v3371_v40  ;;  %v2597_v47 = vmax.f32 %v4854_v38, 0.0 }
 0x74f   : > { %5375 = vst [vmem:[#allocation29_spill] sm:$0xff] %v4892_v55  ;;  %v2668_v10 = vadd.f32 %v2653_v50, %v2596_v12 }
 0x750   : > { %v4894_v44 = vpop.f32.mrf.mxu1  ;;  %3376 = vlog2.f32 %v2643_v39 }
 0x751   : > { %5376 = vst [vmem:[#allocation30_spill] sm:$0xff] %v4894_v44  ;;  %vm2353_vm10 = vcmp.eq.f32.partialorder %v4739_v61, %v4894_v44  ;;  %v3243_v36 = vadd.f32 -1.0, %v4894_v44  ;;  %v2610_v44 = vand.u32 2147483647, %v4914_v4  ;;  %v4922_v59 = vadd.f32 0.001, %v2668_v10 }
 0x752   : > { %v4901_v56 = vsel %vm2353_vm10, 1.0, %v5373_v19 }
 0x753   : > { %5377 = vst [vmem:[#allocation31_spill] sm:$0xff] %v4901_v56  ;;  %vm2694_vm11 = vcmp.eq.f32.partialorder %v4739_v61, %v3243_v36  ;;  %3203 = vmatmul.msk.f32.gmra.mxu1 %vm1144_vm7, %v3418_v54  ;;  %v4909_v2 = vmul.f32 %v4901_v56, %v2676_v33  ;;  %v3373_v36 = vpop.eup %3372  ;;  %v1045_v55 = vpop.f32.mrf.mxu2  ;;  %v2633_v54 = vmul.f32 1.442695, %v2618_v23  ;;  %v2619_v40 = vsub.f32 0.0, %v2610_v44 }
 0x754   : > { %v3252_v27 = vsel %vm2694_vm11, 1.0, %v5373_v19  ;;  %v3375_v56 = vpop.eup %3374  ;;  %v2655_v3 = vmul.f32 0.6931472, %v3373_v36  ;;  %v4925_v42 = vadd.f32 %v1045_v55, %v4800_v60 }
 0x755   : > { %v4916_v24 = vmul.f32 %v3252_v27, %v2676_v33  ;;  %3378 = vpow2.f32 %v2633_v54  ;;  %v2644_v12 = vadd.f32 1.0, %v3375_v56  ;;  %v2635_v60 = vmul.f32 1.442695, %v2619_v40 }
 0x756   : > { %v2669_v27 = vadd.f32 %v2655_v3, %v2597_v47  ;;  %v2611_v23 = vand.u32 2147483647, %v4925_v42  ;;  %v3377_v39 = vpop.eup %3376  ;;  %v2598_v56 = vmax.f32 %v4861_v7, 0.0 }
 0x757   : > { %5378 = vst [vmem:[#allocation32_spill] sm:$0xff] %v4916_v24  ;;  %3380 = vlog2.f32 %v2644_v12  ;;  %v2657_v38 = vmul.f32 0.6931472, %v3377_v39 }
 0x758   : > { %v4918_v61 = vpop.f32.mrf.mxu1  ;;  %v2620_v54 = vsub.f32 0.0, %v2611_v23  ;;  %3382 = vpow2.f32 %v2635_v60  ;;  %v2599_v60 = vmax.f32 %v4868_v21, 0.0  ;;  %v2600_v21 = vmax.f32 %v4890_v1, 0.0 }
 0x759   : > { %v3244_v34 = vadd.f32 -1.0, %v4918_v61  ;;  %v2670_v47 = vadd.f32 %v2657_v38, %v2598_v56 }
 0x75a   : > { %v2637_v40 = vmul.f32 1.442695, %v2620_v54 }
 0x75b   : > { %vm2695_vm7 = vcmp.eq.f32.partialorder %v4792_v17, %v3244_v34  ;;  %v3379_v36 = vpop.eup %3378  ;;  %v4937_v34 = vadd.f32 0.001, %v2669_v27  ;;  %v4948_v39 = vadd.f32 0.001, %v2670_v47 }
 0x75c   : > { %v3253_v33 = vsel %vm2695_vm7, 1.0, %v5373_v19  ;;  %vm2354_vm7 = vcmp.eq.f32.partialorder %v4792_v17, %v4918_v61 }
 0x75d   : > { %v4931_v50 = vmul.f32 %v3253_v33, %v4922_v59  ;;  %v2645_v33 = vadd.f32 1.0, %v3379_v36  ;;  %v3381_v24 = vpop.eup %3380 }
 0x75e   : > { %v3383_v23 = vpop.eup %3382 }
 0x75f   : > { %5379 = vst [vmem:[#allocation33_spill] sm:$0xff] %v4931_v50  ;;  %3384 = vlog2.f32 %v2645_v33  ;;  %v2646_v38 = vadd.f32 1.0, %v3383_v23 }
 0x760   : > { %v4934_v10 = vpop.f32.mrf.mxu1  ;;  %3386 = vpow2.f32 %v2637_v40 }
 0x761   : > { %v3245_v55 = vadd.f32 -1.0, %v4934_v10  ;;  %3388 = vlog2.f32 %v2646_v38  ;;  %vm2355_vm11 = vcmp.eq.f32.partialorder %v4798_v46, %v4934_v10 }
 0x763   : > { %vm2696_vm12 = vcmp.eq.f32.partialorder %v4798_v46, %v3245_v55  ;;  %v2659_v55 = vmul.f32 0.6931472, %v3381_v24 }
 0x764   : > { %v3254_v44 = vsel %vm2696_vm12, 1.0, %v5373_v19  ;;  %vm1882_vm12 = vcmp.eq.s32.totalorder %v4709_v49, 1 }
 0x765   : > { %v4943_v3 = vmul.f32 %v3254_v44, %v4937_v34  ;;  %v2671_v54 = vadd.f32 %v2659_v55, %v2599_v60  ;;  %v3385_v44 = vpop.eup %3384 }
 0x766   : > { %v3387_v33 = vpop.eup %3386  ;;  %v2661_v40 = vmul.f32 0.6931472, %v3385_v44  ;;  %v2601_v44 = vmax.f32 %v4914_v4, 0.0  ;;  %v1721_v4 = vadd.f32 %v4642_v16, %v4664_v52 }
 0x767   : > { %5380 = vst [vmem:[#allocation34_spill] sm:$0xff] %v4943_v3  ;;  %v2680_v24 = vadd.f32 0.001, %v2671_v54  ;;  %v3389_v55 = vpop.eup %3388 }
 0x768   : > { %v4945_v12 = vpop.f32.mrf.mxu1  ;;  %v2672_v23 = vadd.f32 %v2661_v40, %v2600_v21  ;;  %v2663_v38 = vmul.f32 0.6931472, %v3389_v55  ;;  %v1756_v52 = vmul.f32 20.0, %v1721_v4 }
 0x769   : > { %v3246_v27 = vadd.f32 -1.0, %v4945_v12  ;;  %vm2356_vm10 = vcmp.eq.f32.partialorder %v4735_v28, %v4945_v12 }
 0x76a   : > { %v1774_v4 = vadd.f32 -10.0, %v1756_v52  ;;  %v5037_v52 = vsel %vm2354_vm7, 1.0, %v5373_v19 }
 0x76b   : > { %vm2697_vm0 = vcmp.eq.f32.partialorder %v4735_v28, %v3246_v27  ;;  %v2647_v27 = vadd.f32 1.0, %v3387_v33 }
 0x76c   : > { %v3255_v7 = vsel %vm2697_vm0, 1.0, %v5373_v19 }
 0x76d   : > { %v4954_v36 = vmul.f32 %v3255_v7, %v4948_v39  ;;  %3390 = vlog2.f32 %v2647_v27 }
 0x76f   : > { %5381 = vst [vmem:[#allocation35_spill] sm:$0xff] %v4954_v36  ;;  %v2681_v36 = vadd.f32 0.001, %v2672_v23 }
 0x770   : > { %v4956_v56 = vpop.f32.mrf.mxu1 }
 0x771   : > { %v3247_v47 = vadd.f32 -1.0, %v4956_v56  ;;  %vm2357_vm6 = vcmp.eq.f32.partialorder %v4784_v9, %v4956_v56 }
 0x773   : > { %vm2698_vm1 = vcmp.eq.f32.partialorder %v4784_v9, %v3247_v47  ;;  %v3391_v1 = vpop.eup %3390 }
 0x774   : > { %v3256_v50 = vsel %vm2698_vm1, 1.0, %v5373_v19  ;;  %v2665_v40 = vmul.f32 0.6931472, %v3391_v1  ;;  %vm1883_vm1 = vcmp.eq.s32.totalorder %v4770_v22, 1 }
 0x775   : > { %v4962_v7 = vmul.f32 %v3256_v50, %v2680_v24  ;;  %v2673_v50 = vadd.f32 %v2663_v38, %v2601_v44 }
 0x777   : > { %5382 = vst [vmem:[#allocation36_spill] sm:$0xff] %v4962_v7  ;;  %v2682_v21 = vadd.f32 0.001, %v2673_v50  ;;  %v2602_v7 = vmax.f32 %v4925_v42, 0.0 }
 0x778   : > { %v4964_v60 = vpop.f32.mrf.mxu1 }
 0x779   : > { %v3248_v3 = vadd.f32 -1.0, %v4964_v60  ;;  %v2674_v23 = vadd.f32 %v2665_v40, %v2602_v7  ;;  %vm2358_vm3 = vcmp.eq.f32.partialorder %v4790_v15, %v4964_v60 }
 0x77a   : > { %v5002_v1 = vsel %vm2358_vm3, 1.0, %v5373_v19 }
 0x77b   : > { %vm2699_vm14 = vcmp.eq.f32.partialorder %v4790_v15, %v3248_v3 }
 0x77c   : > { %v3257_v54 = vsel %vm2699_vm14, 1.0, %v5373_v19 }
 0x77d   : > { %v4970_v33 = vmul.f32 %v3257_v54, %v2681_v36  ;;  %v2683_v54 = vadd.f32 0.001, %v2674_v23  ;;  %v2758_v23 = vmul.f32 %v5002_v1, %v2681_v36 }
 0x77f   : > { %5383 = vst [vmem:[#allocation37_spill] sm:$0xff] %v4970_v33  ;;  %v5019_v33 = vsel %vm2356_vm10, 1.0, %v5373_v19 }
 0x780   : > { %v4972_v47 = vpop.f32.mrf.mxu1 }
 0x781   : > { %v3249_v27 = vadd.f32 -1.0, %v4972_v47  ;;  %vm2359_vm2 = vcmp.eq.f32.partialorder %v4727_v58, %v4972_v47 }
 0x782   : > { %v4992_v7 = vsel %vm2359_vm2, 1.0, %v5373_v19 }
 0x783   : > { %vm2700_vm15 = vcmp.eq.f32.partialorder %v4727_v58, %v3249_v27  ;;  %v2759_v40 = vmul.f32 %v4992_v7, %v2682_v21 }
 0x784   : > { %v3258_v3 = vsel %vm2700_vm15, 1.0, %v5373_v19  ;;  %vm1884_vm15 = vcmp.eq.s32.totalorder %v4754_v13, 1 }
 0x785   : > { %v4978_v55 = vmul.f32 %v3258_v3, %v2682_v21  ;;  %v5011_v3 = vsel %vm2357_vm6, 1.0, %v5373_v19 }
 0x788   : > { %v4984_v38 = vpop.f32.mrf.mxu1 }
 0x789   : > { %vm2360_vm5 = vcmp.eq.f32.partialorder %v4772_v48, %v4984_v38  ;;  %v3250_v42 = vadd.f32 -1.0, %v4984_v38 }
 0x78a   : > { %v4995_v44 = vsel %vm2360_vm5, 1.0, %v5373_v19 }
 0x78b   : > { %vm2701_vm9 = vcmp.eq.f32.partialorder %v4772_v48, %v3250_v42  ;;  %v2760_v16 = vmul.f32 %v4995_v44, %v2683_v54  ;;  %v1724_v42 = vadd.f32 %v4677_v11, %v4699_v20  ;;  %v2756_v11 = vmul.f32 %v5019_v33, %v4948_v39 }
 0x78c   : > { %v3259_v50 = vsel %vm2701_vm9, 1.0, %v5373_v19  ;;  %v5034_v20 = vsel %vm1882_vm12, 10.0, %v1774_v4  ;;  %v1727_v4 = vadd.f32 %v4706_v35, %v4716_v29 }
 0x78d   : > { %2768 = vmatpush.msrb.mxu3 %v2760_v16  ;;  %v5008_v27 = vmul.f32 %v3259_v50, %v2683_v54  ;;  %v2757_v54 = vmul.f32 %v5011_v3, %v2680_v24  ;;  %v5028_v50 = vsel %vm2355_vm11, 1.0, %v5373_v19  ;;  %v1757_v36 = vmul.f32 20.0, %v1724_v42 }
 0x78e   : > { %v2755_v24 = vmul.f32 %v5028_v50, %v4937_v34  ;;  %vm1885_vm11 = vcmp.eq.s32.totalorder %v4637_v8, 1 }
 0x78f   : > { %2769 = vmatpush.msrb.mxu3 %v2759_v40  ;;  %v1775_v39 = vadd.f32 -10.0, %v1757_v36 }
 0x790   : > { %v5021_v16 = vpop.f32.mrf.mxu1 }
 0x791   : > { %v2415_v21 = vadd.f32 1.0, %v5021_v16  ;;  %2770 = vmatpush.msrb.mxu3 %v2758_v23  ;;  %v2754_v23 = vmul.f32 %v5037_v52, %v4922_v59  ;;  %v1901_v34 = vsel %vm1883_vm1, 10.0, %v1775_v39  ;;  %v1730_v39 = vadd.f32 %v4724_v31, %v4731_v63 }
 0x792   : > { %vm2361_vm12 = vcmp.eq.f32.partialorder %v4778_v53, %v5021_v16  ;;  %v1744_v16 = vpop.f32.mrf.mxu3 }
 0x793   : > { %vm2433_vm0 = vcmp.eq.f32.partialorder %v4778_v53, %v2415_v21  ;;  %2771 = vmatpush.msrb.mxu3 %v2757_v54  ;;  %v1758_v54 = vmul.f32 20.0, %v1727_v4  ;;  %v1759_v4 = vmul.f32 20.0, %v1730_v39  ;;  %v3213_v8 = vsel %vm2361_vm12, 1.0, %v5373_v19 }
 0x794   : > { %v3231_v40 = vsel %vm2433_vm0, 1.0, %v5373_v19  ;;  %v2486_v53 = vmul.f32 %v4995_v44, %v4658_v43 }
 0x795   : > { %2772 = vmatpush.msrb.mxu3 %v2756_v11  ;;  %v5043_v49 = vmul.f32 %v3231_v40, %v5034_v20  ;;  %v1776_v35 = vadd.f32 -10.0, %v1758_v54 }
 0x797   : > { %2773 = vmatpush.msrb.mxu3 %v2755_v24  ;;  %v1902_v22 = vsel %vm1884_vm15, 10.0, %v1776_v35  ;;  %v1777_v35 = vadd.f32 -10.0, %v1759_v4 }
 0x798   : > { %v2238_v42 = vpop.f32.mrf.mxu1 }
 0x799   : > { %v2416_v21 = vadd.f32 1.0, %v2238_v42  ;;  %2774 = vmatpush.msrb.mxu3 %v2754_v23  ;;  %vm2362_vm7 = vcmp.eq.f32.partialorder %v4761_v6, %v2238_v42  ;;  %v5082_v39 = vsel %vm1885_vm11, 10.0, %v1777_v35  ;;  %v2487_v42 = vmul.f32 %v3213_v8, %v5034_v20  ;;  %v5384_v35 = vld [vmem:[#allocation13_spill] sm:$0xff] }
 0x79a   : > { %v2483_v20 = vmul.f32 %v5011_v3, %v4656_v51 }
 0x79b   : > { %vm2434_vm14 = vcmp.eq.f32.partialorder %v4761_v6, %v2416_v21  ;;  %2775 = vmatpush.msrb.mxu3 %v4909_v2 }
 0x79c   : > { %v3232_v11 = vsel %vm2434_vm14, 1.0, %v5373_v19 }
 0x79d   : > { %2776 = vmatpush.msrb.mxu3 %v4886_v45  ;;  %v5054_v59 = vmul.f32 %v3232_v11, %v1901_v34 }
 0x79e   : > { %3261 = vmatmul.msk.f32.vlgmr.msrb.gmra.mxu3 %vm2157_vm13, %v4722_v57 }
 0x7a0   : > { %v2241_v29 = vpop.f32.mrf.mxu1 }
 0x7a1   : > { %v2417_v36 = vadd.f32 1.0, %v2241_v29  ;;  %vm2363_vm10 = vcmp.eq.f32.partialorder %v4668_v18, %v2241_v29  ;;  %v3214_v29 = vsel %vm2362_vm7, 1.0, %v5373_v19 }
 0x7a2   : > { %v3215_v4 = vsel %vm2363_vm10, 1.0, %v5373_v19  ;;  %v2488_v6 = vmul.f32 %v3214_v29, %v1901_v34  ;;  %v1745_v34 = vadd.f32 %v1744_v16, %v4752_v14  ;;  %v5387_v14 = vld [vmem:[#allocation17_spill] sm:$0xff]  ;;  %v5388_v29 = vld [vmem:[#allocation26_spill] sm:$0xff] }
 0x7a3   : > { %vm2435_vm2 = vcmp.eq.f32.partialorder %v4668_v18, %v2417_v36 }
 0x7a4   : > { %v3233_v2 = vsel %vm2435_vm2, 1.0, %v5373_v19  ;;  %v1764_v44 = vmul.f32 20.0, %v1745_v34 }
 0x7a5   : > { %v5061_v40 = vmul.f32 %v3233_v2, %v1902_v22 }
 0x7a6   : > { %v1782_v3 = vadd.f32 -10.0, %v1764_v44 }
 0x7a8   : > { %v5063_v24 = vpop.f32.mrf.mxu1 }
 0x7a9   : > { %vm2364_vm9 = vcmp.eq.f32.partialorder %v4758_v37, %v5063_v24 }
 0x7aa   : > { %v3216_v36 = vsel %vm2364_vm9, 1.0, %v5373_v19 }
 0x7ab   : > { %v2490_v18 = vmul.f32 %v3216_v36, %v5082_v39  ;;  %v5385_v36 = vld [vmem:[#allocation16_spill] sm:$0xff] }
 0x7b0   : > { %v2247_v45 = vpop.f32.mrf.mxu1 }
 0x7b1   : > { %vm2365_vm5 = vcmp.eq.f32.partialorder %v4750_v32, %v2247_v45 }
 0x7b2   : > { %v3217_v31 = vsel %vm2365_vm5, 1.0, %v5373_v19 }
 0x7b3   : > { %v2491_v2 = vmul.f32 %v3217_v31, %v4737_v25  ;;  %v2482_v31 = vmul.f32 %v5019_v33, %v5384_v35  ;;  %v5389_v33 = vld [vmem:[#allocation18_spill] sm:$0xff] }
 0x7b8   : > { %v2250_v23 = vpop.f32.mrf.mxu1 }
 0x7b9   : > { %vm2366_vm3 = vcmp.eq.f32.partialorder %v4629_v5, %v2250_v23 }
 0x7ba   : > { %v3218_v13 = vsel %vm2366_vm3, 1.0, %v5373_v19 }
 0x7bb   : > { %v2492_v63 = vmul.f32 %v3218_v13, %v4741_v26  ;;  %v2489_v13 = vmul.f32 %v3215_v4, %v1902_v22  ;;  %v2484_v22 = vmul.f32 %v5002_v1, %v4649_v62  ;;  %v5386_v1 = vld [vmem:[#allocation25_spill] sm:$0xff]  ;;  %v2480_v4 = vmul.f32 %v5037_v52, %v5387_v14 }
 0x7c0   : > { %v2253_v21 = vpop.f32.mrf.mxu1 }
 0x7c1   : > { %vm2367_vm6 = vcmp.eq.f32.partialorder %v4733_v0, %v2253_v21 }
 0x7c2   : > { %v3219_v54 = vsel %vm2367_vm6, 1.0, %v5373_v19 }
 0x7c3   : > { %v2493_v11 = vmul.f32 %v3219_v54, %v4746_v41 }
 0x7c5   : > { %2496 = vmatpush.msra.mxu2 %v2493_v11  ;;  %v2485_v11 = vmul.f32 %v4992_v7, %v4644_v30  ;;  %v2481_v7 = vmul.f32 %v5028_v50, %v5385_v36 }
 0x7c7   : > { %2497 = vmatpush.msra.mxu2 %v2492_v63 }
 0x7c8   : > { %v5091_v54 = vpop.f32.mrf.mxu1 }
 0x7c9   : > { %2498 = vmatpush.msra.mxu2 %v2491_v2  ;;  %v2421_v2 = vadd.f32 1.0, %v2253_v21  ;;  %vm2368_vm1 = vcmp.eq.f32.partialorder %v5388_v29, %v5091_v54  ;;  %v5391_v21 = vld [vmem:[#allocation21_spill] sm:$0xff] }
 0x7ca   : > { %vm1890_vm15 = vcmp.eq.s32.totalorder %v5391_v21, 1  ;;  %v3220_v16 = vsel %vm2368_vm1, 1.0, %v5373_v19  ;;  %v5403_v21 = vld [vmem:[#allocation33_spill] sm:$0xff] }
 0x7cb   : > { %2499 = vmatpush.msra.mxu2 %v2490_v18  ;;  %v2420_v18 = vadd.f32 1.0, %v2250_v23  ;;  %vm2439_vm14 = vcmp.eq.f32.partialorder %v4733_v0, %v2421_v2  ;;  %v2418_v23 = vadd.f32 1.0, %v5063_v24  ;;  %v5394_v24 = vld [vmem:[#allocation22_spill] sm:$0xff] }
 0x7cc   : > { %v2494_v34 = vmul.f32 %v3220_v16, %v5394_v24 }
 0x7cd   : > { %2500 = vmatpush.msra.mxu2 %v2489_v13  ;;  %v5390_v13 = vld [vmem:[#allocation31_spill] sm:$0xff]  ;;  %vm2438_vm2 = vcmp.eq.f32.partialorder %v4629_v5, %v2420_v18  ;;  %vm2436_vm5 = vcmp.eq.f32.partialorder %v4758_v37, %v2418_v23  ;;  %v5398_v18 = vld [vmem:[#allocation24_spill] sm:$0xff] }
 0x7ce   : > { %v2479_v8 = vmul.f32 %v5390_v13, %v5389_v33  ;;  %v3236_v5 = vsel %vm2438_vm2, 1.0, %v5373_v19  ;;  %v3234_v44 = vsel %vm2436_vm5, 1.0, %v5373_v19  ;;  %v2422_v13 = vadd.f32 1.0, %v5091_v54 }
 0x7cf   : > { %2501 = vmatpush.msra.mxu2 %v2488_v6  ;;  %v2419_v6 = vadd.f32 1.0, %v2247_v45  ;;  %v3237_v45 = vsel %vm2439_vm14, 1.0, %v5373_v19  ;;  %v2548_v37 = vmul.f32 %v3234_v44, %v5082_v39 }
 0x7d0   : > { %v5104_v63 = vpop.f32.mrf.mxu1  ;;  %vm2440_vm2 = vcmp.eq.f32.partialorder %v5388_v29, %v2422_v13  ;;  %v5400_v29 = vld [vmem:[#allocation36_spill] sm:$0xff] }
 0x7d1   : > { %2502 = vmatpush.msra.mxu2 %v2487_v42  ;;  %vm2369_vm0 = vcmp.eq.f32.partialorder %v5386_v1, %v5104_v63  ;;  %v5392_v42 = vld [vmem:[#allocation19_spill] sm:$0xff]  ;;  %vm2437_vm3 = vcmp.eq.f32.partialorder %v4750_v32, %v2419_v6  ;;  %v2550_v32 = vmul.f32 %v3236_v5, %v4741_v26  ;;  %v2412_v26 = vadd.f32 1.0, %v4964_v60 }
 0x7d2   : > { %v3221_v50 = vsel %vm2369_vm0, 1.0, %v5373_v19  ;;  %v2409_v60 = vadd.f32 1.0, %v4934_v10  ;;  %v5396_v10 = vld [vmem:[#allocation27_spill] sm:$0xff] }
 0x7d3   : > { %2503 = vmatpush.msra.mxu2 %v2486_v53  ;;  %v5393_v53 = vld [vmem:[#allocation28_spill] sm:$0xff]  ;;  %vm2430_vm10 = vcmp.eq.f32.partialorder %v4790_v15, %v2412_v26 }
 0x7d4   : > { %v2478_v52 = vmul.f32 %v5393_v53, %v5392_v42  ;;  %vm2427_vm12 = vcmp.eq.f32.partialorder %v4798_v46, %v2409_v60  ;;  %v5405_v53 = vld [vmem:[#allocation29_spill] sm:$0xff] }
 0x7d5   : > { %2504 = vmatpush.msra.mxu2 %v2485_v11  ;;  %v5124_v11 = vsel %vm1890_vm15, 10.0, %v1782_v3  ;;  %v2423_v3 = vadd.f32 1.0, %v5104_v63 }
 0x7d6   : > { %v2495_v0 = vmul.f32 %v3221_v50, %v5124_v11 }
 0x7d7   : > { %2505 = vmatpush.msra.mxu2 %v2484_v22  ;;  %v5132_v22 = vld [vmem:[%s5300_s10] sm:$0x3f]  ;;  %vm2441_vm15 = vcmp.eq.f32.partialorder %v5386_v1, %v2423_v3 }
 0x7d8   : > { %v3239_v6 = vsel %vm2441_vm15, 1.0, %v5373_v19  ;;  %vm2895_vm15 = vcmask 23552  }
 0x7d9   : > { %2506 = vmatpush.msra.mxu2 %v2483_v20  ;;  %v2551_v20 = vmul.f32 %v3237_v45, %v4746_v41  ;;  %v5149_v41 = vld [vmem:[%s5300_s10 + $0x8] sm:$0x3f]  ;;  %v2553_v50 = vmul.f32 %v3239_v6, %v5124_v11 }
 0x7db   : > { %2507 = vmatpush.msra.mxu2 %v2482_v31  ;;  %v3235_v31 = vsel %vm2437_vm3, 1.0, %v5373_v19 }
 0x7dc   : > { %v2549_v2 = vmul.f32 %v3235_v31, %v4737_v25  ;;  %v2411_v25 = vadd.f32 1.0, %v4956_v56  ;;  %v2408_v56 = vadd.f32 1.0, %v4918_v61  ;;  %v5397_v61 = vld [vmem:[#allocation20_spill] sm:$0xff] }
 0x7dd   : > { %2508 = vmatpush.msra.mxu2 %v2481_v7  ;;  %v2414_v7 = vadd.f32 1.0, %v4984_v38  ;;  %v2410_v38 = vadd.f32 1.0, %v4945_v12 }
 0x7de   : > { %vm2429_vm11 = vcmp.eq.f32.partialorder %v4784_v9, %v2411_v25  ;;  %vm2426_vm0 = vcmp.eq.f32.partialorder %v4792_v17, %v2408_v56  ;;  %v5407_v25 = vld [vmem:[#allocation23_spill] sm:$0xff] }
 0x7df   : > { %2509 = vmatpush.msra.mxu2 %v2480_v4  ;;  %v2413_v4 = vadd.f32 1.0, %v4972_v47  ;;  %vm2432_vm6 = vcmp.eq.f32.partialorder %v4772_v48, %v2414_v7  ;;  %v3228_v48 = vsel %vm2430_vm10, 1.0, %v5373_v19  ;;  %vm2428_vm7 = vcmp.eq.f32.partialorder %v4735_v28, %v2410_v38 }
 0x7e0   : > { %v3230_v47 = vsel %vm2432_vm6, 1.0, %v5373_v19  ;;  %v3227_v12 = vsel %vm2429_vm11, 1.0, %v5373_v19  ;;  %v2542_v9 = vmul.f32 %v3228_v48, %v4649_v62  ;;  %v3224_v62 = vsel %vm2426_vm0, 1.0, %v5373_v19 }
 0x7e1   : > { %2510 = vmatpush.msra.mxu2 %v2479_v8  ;;  %vm2431_vm9 = vcmp.eq.f32.partialorder %v4727_v58, %v2413_v4  ;;  %v2544_v58 = vmul.f32 %v3230_v47, %v4658_v43  ;;  %v3226_v43 = vsel %vm2428_vm7, 1.0, %v5373_v19  ;;  %v2541_v28 = vmul.f32 %v3227_v12, %v4656_v51 }
 0x7e2   : > { %v3229_v39 = vsel %vm2431_vm9, 1.0, %v5373_v19  ;;  %v2540_v46 = vmul.f32 %v3226_v43, %v5384_v35  ;;  %v2538_v8 = vmul.f32 %v3224_v62, %v5387_v14  ;;  %v5399_v14 = vld [vmem:[#allocation37_spill] sm:$0xff]  ;;  %vm2720_vm6 = vcmp.eq.f32.partialorder %v5407_v25, 0.0 }
 0x7e3   : > { %2511 = vmatpush.msra.mxu2 %v2478_v52  ;;  %v2543_v15 = vmul.f32 %v3229_v39, %v4644_v30  ;;  %v3225_v30 = vsel %vm2427_vm12, 1.0, %v5373_v19  ;;  %vm2751_vm9 = vcmp.eq.f32.partialorder %v5407_v25, 19.0 }
 0x7e4   : > { %2512 = vmatmul.f32.vlgmr.msra.gmra.mxu2 %v5132_v22  ;;  %v2539_v17 = vmul.f32 %v3225_v30, %v5385_v36  ;;  %v3238_v36 = vsel %vm2440_vm2, 1.0, %v5373_v19 }
 0x7e5   : > { %2530 = vmatpush.msrb.mxu2 %v2495_v0  ;;  %v2552_v1 = vmul.f32 %v3238_v36, %v5394_v24 }
 0x7e7   : > { %2531 = vmatpush.msrb.mxu2 %v2494_v34 }
 0x7e9   : > { %2554 = vmatpush.msra.mxu2 %v2551_v20 }
 0x7eb   : > { %2555 = vmatpush.msra.mxu2 %v2550_v32  ;;  %v5406_v32 = vld [vmem:[#allocation15_spill] sm:$0xff] }
 0x7ec   : > { %3240 = vmatmul.msk.f32.vlgmr.msrb.gmra.mxu2 %vm1328_vm8, %v5149_v41 }
 0x7ed   : > { %2556 = vmatpush.msra.mxu2 %v2549_v2 }
 0x7ef   : > { %2557 = vmatpush.msra.mxu2 %v2548_v37 }
 0x7f1   : > { %2558 = vmatpush.msra.mxu2 %v5061_v40 }
 0x7f3   : > { %2559 = vmatpush.msra.mxu2 %v5054_v59  ;;  %v5395_v59 = vld [vmem:[#allocation30_spill] sm:$0xff] }
 0x7f4   : > { %v2407_v40 = vadd.f32 1.0, %v5395_v59 }
 0x7f5   : > { %2560 = vmatpush.msra.mxu2 %v5043_v49  ;;  %v2406_v49 = vadd.f32 1.0, %v5396_v10 }
 0x7f6   : > { %vm2425_vm1 = vcmp.eq.f32.partialorder %v5397_v61, %v2407_v40 }
 0x7f7   : > { %2561 = vmatpush.msra.mxu2 %v2544_v58  ;;  %vm2424_vm14 = vcmp.eq.f32.partialorder %v5398_v18, %v2406_v49  ;;  %v3223_v51 = vsel %vm2425_vm1, 1.0, %v5373_v19 }
 0x7f8   : > { %v3222_v63 = vsel %vm2424_vm14, 1.0, %v5373_v19  ;;  %v2537_v35 = vmul.f32 %v3223_v51, %v5389_v33  ;;  %v5401_v19 = vld [vmem:[#allocation35_spill] sm:$0xff]  ;;  %v5402_v33 = vld [vmem:[#allocation34_spill] sm:$0xff] }
 0x7f9   : > { %2562 = vmatpush.msra.mxu2 %v2543_v15  ;;  %v2536_v54 = vmul.f32 %v3222_v63, %v5392_v42  ;;  %v5404_v42 = vld [vmem:[#allocation32_spill] sm:$0xff] }
 0x7fb   : > { %2563 = vmatpush.msra.mxu2 %v2542_v9 }
 0x7fd   : > { %2564 = vmatpush.msra.mxu2 %v2541_v28 }
 0x7ff   : > { %2565 = vmatpush.msra.mxu2 %v2540_v46 }
 0x801   : > { %2566 = vmatpush.msra.mxu2 %v2539_v17 }
 0x803   : > { %2567 = vmatpush.msra.mxu2 %v2538_v8 }
 0x805   : > { %2568 = vmatpush.msra.mxu2 %v2537_v35 }
 0x807   : > { %2569 = vmatpush.msra.mxu2 %v2536_v54 }
 0x808   : > { %2570 = vmatmul.f32.vlgmr.msra.gmra.mxu2 %v5132_v22 }
 0x809   : > { %2588 = vmatpush.msrb.mxu2 %v2553_v50 }
 0x80b   : > { %2589 = vmatpush.msrb.mxu2 %v2552_v1 }
 0x80d   : > { %2737 = vmatpush.msra.mxu2 %v5008_v27 }
 0x80f   : > { %2738 = vmatpush.msra.mxu2 %v4978_v55 }
 0x810   : > { %3241 = vmatmul.msk.f32.vlgmr.msrb.gmra.mxu2 %vm1328_vm8, %v5149_v41 }
 0x811   : > { %2739 = vmatpush.msra.mxu2 %v5399_v14 }
 0x813   : > { %2740 = vmatpush.msra.mxu2 %v5400_v29 }
 0x815   : > { %2741 = vmatpush.msra.mxu2 %v5401_v19 }
 0x817   : > { %2742 = vmatpush.msra.mxu2 %v5402_v33 }
 0x819   : > { %2743 = vmatpush.msra.mxu2 %v5403_v21 }
 0x81b   : > { %2744 = vmatpush.msra.mxu2 %v5404_v42 }
 0x81d   : > { %2745 = vmatpush.msra.mxu2 %v5405_v53 }
 0x81e   : > { %3260 = vmatmul.msk.f32.vlgmr.msra.gmra.mxu2 %vm2157_vm13, %v4722_v57 }
 0x821   : > { %v2778_v26 = vpop.f32.mrf.mxu3 }
 0x822   : > { %v2781_v48 = vsel %vm2751_vm9, 1.0, %v2778_v26 }
 0x867   : > { %v2513_v55 = vpop.f32.mrf.mxu2 }
 0x86f   : > { %v2533_v27 = vpop.f32.mrf.mxu2 }
 0x870   : > { %v5212_v16 = vadd.f32 %v2533_v27, %v2513_v55 }
 0x872   : > { %v2802_v44 = vsub.f32 %v5406_v32, %v5212_v16 }
 0x88b   : > { %v2571_v52 = vpop.f32.mrf.mxu2 }
 0x893   : > { %v2591_v23 = vpop.f32.mrf.mxu2 }
 0x894   : > { %v2592_v11 = vadd.f32 %v2591_v23, %v2571_v52  ;;  %v5408_v52 = vld [vmem:[#allocation14_spill] sm:$0xff] }
 0x895   : > { %vm2868_vm7 = vcmp.ge.f32.partialorder %v5408_v52, -10.0  ;;  %vm2869_vm12 = vcmp.le.f32.partialorder %v5408_v52, 10.0 }
 0x896   : > { %v5215_v45 = vsub.f32 %v2592_v11, %v5212_v16  ;;  %vm2870_vm14 = vmand %vm2868_vm7, %vm2869_vm12 }
 0x898   : > { %3392 = vrcp.f32 %v5215_v45  ;;  %v2794_v24 = vand.u32 2147483648, %v5215_v45  ;;  %v2792_v57 = vand.u32 2147483647, %v5215_v45  ;;  %vm2788_vm13 = vweird.f32 %v5215_v45 }
 0x89a   : > { %v2795_v31 = vor.u32 1.1754944e-38, %v2794_v24  ;;  %vm2793_vm5 = vcmp.eq.f32.partialorder %v2792_v57, 8.507059e+37 }
 0x89e   : > { %v3393_v0 = vpop.eup %3392 }
 0x89f   : > { %v2784_v22 = vmul.f32 %v3393_v0, %v5215_v45  ;;  %vm2789_vm8 = vweird.f32 %v3393_v0 }
 0x8a0   : > { %vm2790_vm3 = vmor %vm2788_vm13, %vm2789_vm8 }
 0x8a1   : > { %v2785_v5 = vsub.f32 1.0, %v2784_v22  ;;  %v2747_v4 = vpop.f32.mrf.mxu2 }
 0x8a2   : > { %v2750_v39 = vsel %vm2720_vm6, 1.0, %v2747_v4 }
 0x8a3   : > { %v2786_v34 = vmul.f32 %v3393_v0, %v2785_v5  ;;  %v2806_v56 = vadd.f32 %v2781_v48, %v2750_v39 }
 0x8a5   : > { %v2787_v20 = vadd.f32 %v3393_v0, %v2786_v34 }
 0x8a7   : > { %v2791_v7 = vsel %vm2790_vm3, %v3393_v0, %v2787_v20 }
 0x8a8   : > { %v2796_v2 = vsel %vm2793_vm5, %v2795_v31, %v2791_v7  ;;  %v2894_v7 = vld [vmem:[%s5303_s13] sm:$0x1f] }
 0x8a9   : > { %v2799_v37 = vrot.slane %v2796_v2, 5  ;;  %v2803_v41 = vmul.f32 %v2802_v44, %v2796_v2 }
 0x8ab   : > { %v2801_v47 = vmul.f32 %v2799_v37, %v5215_v45  ;;  %v2804_v38 = vsub.f32 1.0, %v2803_v41  ;;  %v2845_v12 = vmul.f32 %v2803_v41, %v2781_v48  ;;  %v2818_v18 = vrot.slane %v2803_v41, 5 }
 0x8ad   : > { %v2805_v60 = vmul.f32 %v2804_v38, %v2803_v41  ;;  %v2807_v58 = vmul.f32 2.0, %v2801_v47  ;;  %v2855_v43 = vmul.f32 %v2804_v38, %v2750_v39  ;;  %v2846_v49 = vmul.f32 %v2845_v12, %v2803_v41 }
 0x8ae   : > { %v2844_v13 = vmul.f32 %v2801_v47, %v2801_v47  ;;  %v2820_v63 = vmul.f32 %v2818_v18, %v2801_v47 }
 0x8af   : > { %v2809_v15 = vrot.slane %v2807_v58, 3  ;;  %v2848_v59 = vrot.slane %v2805_v60, 5  ;;  %v2856_v3 = vmul.f32 %v2855_v43, %v2804_v38  ;;  %v2822_v51 = vmul.f32 %v2805_v60, %v2750_v39 }
 0x8b0   : > { %v2821_v1 = vmul.f32 %v2820_v63, %v2818_v18 }
 0x8b1   : > { %v2811_v40 = vsub.f32 %v2806_v56, %v2809_v15  ;;  %v2850_v9 = vmul.f32 %v2848_v59, %v2807_v58  ;;  %v2824_v54 = vrot.slane %v2822_v51, 5 }
 0x8b3   : > { %v2812_v10 = vmul.f32 %v2811_v40, %v2805_v60  ;;  %v2852_v28 = vrot.slane %v2850_v9, 3  ;;  %v2826_v33 = vadd.f32 %v2824_v54, %v2821_v1 }
 0x8b5   : > { %v2814_v30 = vrot.slane %v2812_v10, 5  ;;  %v2854_v61 = vadd.f32 %v2852_v28, %v2846_v49  ;;  %v2827_v0 = vmul.f32 %v2826_v33, %v5215_v45 }
 0x8b7   : > { %v2816_v46 = vadd.f32 %v2814_v30, %v2801_v47  ;;  %v2857_v62 = vadd.f32 %v2856_v3, %v2854_v61 }
 0x8b9   : > { %3394 = vrcp.f32 %v2816_v46  ;;  %v2859_v17 = vrot.slane %v2857_v62, 5  ;;  %v2839_v29 = vand.u32 2147483648, %v2816_v46  ;;  %v2837_v42 = vand.u32 2147483647, %v2816_v46 }
 0x8ba   : > { %3396 = vlog2.f32 %v2816_v46  ;;  %vm2833_vm11 = vweird.f32 %v2816_v46 }
 0x8bb   : > { %v2861_v8 = vmul.f32 %v2859_v17, %v2844_v13  ;;  %v2840_v23 = vor.u32 1.1754944e-38, %v2839_v29  ;;  %vm2838_vm1 = vcmp.eq.f32.partialorder %v2837_v42, 8.507059e+37 }
 0x8bd   : > { %3398 = vlog2.f32 %v2861_v8 }
 0x8bf   : > { %v3395_v35 = vpop.eup %3394 }
 0x8c0   : > { %v3397_v6 = vpop.eup %3396  ;;  %v2829_v36 = vmul.f32 %v3395_v35, %v2816_v46  ;;  %vm2834_vm10 = vweird.f32 %v3395_v35 }
 0x8c1   : > { %v2865_v50 = vmul.f32 0.6931472, %v3397_v6  ;;  %vm2835_vm0 = vmor %vm2833_vm11, %vm2834_vm10 }
 0x8c2   : > { %v2830_v14 = vsub.f32 1.0, %v2829_v36 }
 0x8c3   : > { %v3399_v19 = vpop.eup %3398  ;;  %v2866_v55 = vmul.f32 2.0, %v2865_v50 }
 0x8c4   : > { %v2831_v21 = vmul.f32 %v3395_v35, %v2830_v14  ;;  %v2863_v53 = vmul.f32 0.6931472, %v3399_v19 }
 0x8c6   : > { %v2832_v27 = vadd.f32 %v3395_v35, %v2831_v21  ;;  %v2867_v11 = vsub.f32 %v2863_v53, %v2866_v55 }
 0x8c8   : > { %v2836_v22 = vsel %vm2835_vm0, %v3395_v35, %v2832_v27  ;;  %v2876_v24 = vrot.slane %v2867_v11, 3 }
 0x8c9   : > { %v2841_v5 = vsel %vm2838_vm1, %v2840_v23, %v2836_v22 }
 0x8ca   : > { %v2842_v34 = vmul.f32 %v2841_v5, %v2827_v0  ;;  %v2878_v57 = vsel %vm2870_vm14, %v2876_v24, 0.0 }
 0x8cb   : > { %v2879_v31 = vsel %vm1139_vm4, %v2878_v57, 0.0 }
 0x8cc   : > { %v2843_v20 = vadd.f32 %v2842_v34, %v5212_v16  ;;  %v2880_v32 = vrot.slane %v2879_v31, 4 }
 0x8ce   : > { %v2872_v44 = vrot.slane %v2843_v20, 3  ;;  %v2881_v45 = vadd.f32 %v2880_v32, %v2879_v31 }
 0x8d0   : > { %v2874_v2 = vsel %vm2870_vm14, %v2872_v44, %v5408_v52  ;;  %v2882_v4 = vrot.slane %v2881_v45, 2 }
 0x8d1   : > { %3262 = vmatpush.msk.msrb.mxu2 %vm1139_vm4, %v2874_v2 }
 0x8d2   : > { %3263 = vmatmul.msk.f32.vlgmr.msrb.gmra.mxu2 %vm2895_vm15, %v2894_v7  ;;  %v2883_v16 = vadd.f32 %v2882_v4, %v2881_v45 }
 0x8d4   : > { %v2884_v37 = vrot.slane %v2883_v16, 1 }
 0x8d6   : > { %v2885_v41 = vadd.f32 %v2884_v37, %v2883_v16 }
 0x8d8   : > { %2886 = vst [vmem:[%s522_s29] sm:$0x1] %v2885_v41 }
 0x8d9   : > { %3449 = shalt.err (!%p3446_p3)
}
 0x8da   : > { %3269 = dma.vmem_to_hbm [thread:$0]  (%p3644_p5), %s2955_s18, 16, %s2957_s30, %s2930_s19   ;;  %v2891_v26 = vpop.permute.xlu2 %2890  ;;  %v3421_v25 = vld [vmem:[%s3671_s23] sm:$0x1f] }
 0x8db   : > { %s3048_s21 = sshll.u32 %s5238_s28, 3  ;;  %s3265_s29 = sshll.u32 %s3627_s25, 3  ;;  %v2893_v47 = vmul.f32 %v3421_v25, %v2891_v26 }
 0x8dc   : > { %s2939_s2 = scalar_lea.hbm %s5305_s15, %s3265_s29  ;;  %s516_s20 = scalar_lea.vmem [#allocation2], %s3048_s21 }
 0x8dd   : > { %s2941_s3 = sshll.u32 %s516_s20, 4  ;;  %s2943_s26 = sshll.u32 %s2939_s2, 4  ;;  %s2942_s3 = int_to_ptr.vmem [resolvable:$true] %s2941_s3  ;;  %s2944_s26 = int_to_ptr.hbm [resolvable:$true] %s2943_s26 }
 0x8de   : > { %s2925_s27 = scalar_lea.sflag [#allocation3], %s5238_s28  ;;  %s3464_s18 = sshra.s32 %s2944_s26, 4  ;;  %s3465_s18 = int_to_ptr.hbm [resolvable:$true] %s3464_s18 }
 0x8df   : > { %s3466_s25 = scalar_lea.hbm %s3465_s18, 8  ;;  %s3470_s19 = scalar_lea.hbm %s5305_s15, 16 }
 0x8e0   : > { %p3467_p4 = scmp.ne.s32.totalorder %s3465_s18, %s3466_s25  ;;  %p3471_p9 = scmp.lt.s32.totalorder %s3465_s18, %s5305_s15 }
 0x8e1   : > { %p3472_p10 = scmp.lt.s32.totalorder %s3470_s19, %s3466_s25 }
 0x8e2   : > { %p3468_p7 = pnand %p3467_p4, %p3644_p5 }
 0x8e3   : > { %p3473_p11 = por %p3472_p10, %p3471_p9 }
 0x8e4   : > { %p3469_p8 = pneg %p3468_p7 }
 0x8e6   : > { %p3474_p12 = pnand %p3473_p11, %p3469_p8 }
 0x955   : > { %v2919_v38 = vpop.f32.mrf.mxu2 }
 0x956   : > { %v2922_v39 = vadd.f32 %v2919_v38, %v2893_v47 }
 0x958   : > { %2923 = vst [vmem:[%s516_s20] sm:$0x1f] %v2922_v39 }
 0x959   : > { %3477 = shalt.err (!%p3474_p12)
}
 0x95a   : > { %3268 = dma.vmem_to_hbm [thread:$0]  (%p3644_p5), %s2942_s3, 128, %s2944_s26, %s2925_s27  }
 0x95b PF: > { %s5409_s28 = sld [smem:[#allocation8_spill]]  ;;  %p3279_p13 = scmp.ge.s32.totalorder %s3516_s24, 2 }
 0x95d   : > { %p3273_p0 = pnand %p3279_p13, %p3648_p6 }
 0x95f   : > { %p3274_p1 = pneg %p3273_p0 }
 0x961   : > { %s2968_s29 = sand.u32 1, %s5409_s28  }
 0x962   : > { %s2969_s1 = scalar_lea.sflag [#allocation3], %s2968_s29 }
 0x963   : > { %3495 = dma.done.wait (%p3274_p1), %s2969_s1, 128  }
 0x964   : > { %3497 = vsyncadd (%p3274_p1), %s2969_s1, 4294967168  ;;  %s2979_s2 = scalar_lea.sflag [#allocation5], %s2968_s29 }
 0x965   : > { %3499 = dma.done.wait (%p3274_p1), %s2979_s2, 16  }
 0x966   : > { %3501 = vsyncadd (%p3274_p1), %s2979_s2, 4294967280  ;;  %s5411_s24 = sld [smem:[#allocation10_spill]]  ;;  %s5414_s21 = smov %s3508_s22 }
 0x967   : > { %s5412_s20 = sld [smem:[#allocation9_spill]] }
 0x968   : > { %s5413_s23 = sld [smem:[#allocation11_spill]] }
 0x96c   : > { %p30_p5 = scmp.ge.s32.totalorder %s5411_s24, 4  }
 0x96d   : > { %s5415_s22 = smov %s5412_s20 }
 0x96e   :  { %32 = sbr.rel (!%p30_p5) target bundleno = 11 (0xb), region = 132 }
 0x973   :  { %2984 = vsyncpa [#allocation3], 1 }
 0x974   :  { %2986 = vsyncpa [#allocation3 + $0x1], 1 }
 0x975   :  { %2987 = vsyncpa [#allocation5], 1 }
 0x976   :  { %2989 = vsyncpa [#allocation5 + $0x1], 1 }

</bundles_post_ra>
